<compile_context>
chip_gen: v5e
topology: v5e:2x2
jax: 0.10.0
libtpu: 0.0.40
codegen_flags: <defaults>
</compile_context>

<pallas_src>
import jax
import jax.numpy as jnp
from jax.experimental import pallas as pl
from jax.experimental.pallas import tpu as pltpu


def conv_ps_prelu_kernel(x_ref, w_ref, b_ref, alpha_ref, o_ref, lhs_ref):
    """conv3x3 + bias + pixel-shuffle row interleave + PReLU for one row tile.

    x_ref:     (3, TR, W+2, Cin)   bf16 -- three H-shifted views of padded input
    w_ref:     (9*Cin, Cout)       bf16 -- rows (kh, kw, cin); cols (rh, rw, cs)
    b_ref:     (1, Cout)           f32  -- bias, same column order
    alpha_ref: (1,)                f32  -- PReLU shared slope (SMEM)
    o_ref:     (TR, r, W, Cout//r) f32  -- rows land at h*r + rh directly
    lhs_ref:   (TR*W, 9*Cin)       bf16 -- staged im2col tile (VMEM scratch)
    """
    TR = x_ref.shape[1]
    W = x_ref.shape[2] - 2
    Cin = x_ref.shape[3]
    r = o_ref.shape[1]
    CoutR = o_ref.shape[3]
    TM = TR * W

    # Stage the im2col tile once (9 shifted bf16 copies into scratch) ...
    for dh in range(3):
        xv = x_ref[dh]                                    # (TR, W+2, Cin)
        for dw in range(3):
            col = (dh * 3 + dw) * Cin
            lhs_ref[:, col:col + Cin] = xv[:, dw:dw + W, :].reshape(TM, Cin)

    # ... then ONE MXU dot: whole 9*Cin contraction stays inside the MXU acc.
    acc = jnp.dot(lhs_ref[...], w_ref[...], preferred_element_type=jnp.float32)
    acc = acc + b_ref[...]
    alpha = alpha_ref[0]
    out = jnp.where(acc >= 0.0, acc, alpha * acc)         # PReLU (shared scalar)

    # Fused pixel shuffle: r lane-dense (CoutR = 128)-wide stores; slot rh of
    # the output block is the (h*r + rh) image row.
    for rh in range(r):
        o_ref[:, rh, :, :] = (
            out[:, rh * CoutR:(rh + 1) * CoutR].reshape(TR, W, CoutR)
        ).astype(o_ref.dtype)


def _roundup(x, m):
    return ((x + m - 1) // m) * m


def _vmem_capacity_bytes():
    try:
        info = pltpu.get_tpu_info()
        cap = getattr(info, "vmem_capacity_bytes", None)
        if cap:
            return int(cap)
    except Exception:
        pass
    return 64 * 1024 * 1024            # conservative: assume v7x-sized VMEM


def _vmem_est_bytes(TR, W, Cin, Cout, r):
    """Rough per-step VMEM footprint (double-buffered blocks + scratch + live acc)."""
    K9 = 9 * Cin
    TM = TR * W
    lane = 128
    in_b = 2 * 3 * TR * _roundup(W + 2, 16) * _roundup(Cin, lane) * 2       # bf16, x2 buf
    out_b = 2 * TR * r * _roundup(W, 8) * _roundup(Cout // r, lane) * 4     # f32, x2 buf
    lhs_b = _roundup(TM, 16) * _roundup(K9, lane) * 2                       # scratch
    acc_b = _roundup(TM, 8) * _roundup(Cout, lane) * 4                      # live value
    w_b = 2 * (_roundup(K9, 16) * _roundup(Cout, lane) * 2
               + 8 * _roundup(Cout, lane) * 4)
    return in_b + out_b + lhs_b + acc_b + w_b


def _pick_row_tile(NR, W, Cin, Cout, r, max_out_rows, vmem_budget):
    """Image rows per grid step: as large as budget allows, with >= 2 grid steps."""
    cap = max(1, min(NR, max(1, max_out_rows // max(W, 1))))
    if NR >= 2:
        cap = max(1, min(cap, NR // 2))      # keep both v7x TensorCores busy
    tr = cap
    while tr > 1 and _vmem_est_bytes(tr, W, Cin, Cout, r) > vmem_budget:
        tr -= 1
    return tr


def pixel_shuffler_block(x_nchw, weight, bias, alpha, upscale_factor=2):
    """Forward pass of PixelShufflerBlock.

    x_nchw : (N, Cin, H, W) f32
    weight : (Cout, Cin, 3, 3) f32  (Cout = 256)
    bias   : (Cout,) f32
    alpha  : scalar f32 (PReLU shared slope)
    returns: (N, Cout // r^2, r*H, r*W) f32
    """
    r = upscale_factor
    N, Cin, H, W = x_nchw.shape
    Cout = weight.shape[0]
    Cs = Cout // (r * r)
    CoutR = Cout // r                       # = r * Cs (= 128 for the default block)
    K9 = 9 * Cin

    # Pad W so the in-kernel (TR, W, .) <-> (TR*W, .) regroupings are whole-tile.
    Wp = _roundup(W, 16)

    # ---- trace-time glue (tiny next to the conv output) ----
    x_nhwc = jnp.transpose(x_nchw, (0, 2, 3, 1)).astype(jnp.bfloat16)
    x_pad = jnp.pad(x_nhwc, ((0, 0), (1, 1), (1, 1 + Wp - W), (0, 0)))   # (N, H+2, Wp+2, Cin)
    xs = jnp.stack([x_pad[:, dh:dh + H] for dh in range(3)], axis=0)     # (3, N, H, Wp+2, Cin)
    NR = N * H
    xs = xs.reshape(3, NR, Wp + 2, Cin)

    # Conv weight (Cout, Cin, 3, 3) with Cout index = cs*r*r + rh*r + rw
    #   -> (9*Cin, Cout) with rows (kh, kw, cin) and cols (rh, rw, cs).
    w_mat = weight.reshape(Cs, r, r, Cin, 3, 3)
    w_mat = jnp.transpose(w_mat, (4, 5, 3, 1, 2, 0)).reshape(K9, Cout).astype(jnp.bfloat16)
    b_perm = jnp.transpose(bias.reshape(Cs, r, r), (1, 2, 0)).reshape(1, Cout)
    b_perm = b_perm.astype(jnp.float32)
    alpha_arr = jnp.asarray(alpha, jnp.float32).reshape(1)

    # ---- generation-aware tiling ----
    vmem_cap = _vmem_capacity_bytes()
    if vmem_cap >= 100 * 1024 * 1024:       # v5e / v6e: 128 MiB VMEM
        max_out_rows, vmem_limit = 8192, 80 * 1024 * 1024
    else:                                   # v7x: 64 MiB VMEM per TensorCore
        max_out_rows, vmem_limit = 4096, 44 * 1024 * 1024

    TR = _pick_row_tile(NR, Wp, Cin, Cout, r, max_out_rows, int(0.85 * vmem_limit))
    G = -(-NR // TR)                        # grid steps
    TR = -(-NR // G)                        # rebalance tiles (never larger than before)
    NR_pad = G * TR
    if NR_pad > NR:
        xs = jnp.pad(xs, ((0, 0), (0, NR_pad - NR), (0, 0), (0, 0)))
    TM = TR * Wp

    out = pl.pallas_call(
        conv_ps_prelu_kernel,
        out_shape=jax.ShapeDtypeStruct((NR_pad, r, Wp, CoutR), jnp.float32),
        grid_spec=pltpu.PrefetchScalarGridSpec(
            num_scalar_prefetch=0,
            grid=(G,),
            in_specs=[
                pl.BlockSpec((3, TR, Wp + 2, Cin), lambda i: (0, i, 0, 0)),
                pl.BlockSpec((K9, Cout), lambda i: (0, 0)),
                pl.BlockSpec((1, Cout), lambda i: (0, 0)),
                pl.BlockSpec(memory_space=pltpu.MemorySpace.SMEM),   # alpha scalar
            ],
            out_specs=pl.BlockSpec((TR, r, Wp, CoutR), lambda i: (i, 0, 0, 0)),
            scratch_shapes=[pltpu.VMEM((TM, K9), jnp.bfloat16)],
        ),
        compiler_params=pltpu.CompilerParams(
            dimension_semantics=("parallel",),
            vmem_limit_bytes=vmem_limit,
        ),
    )(xs, w_mat, b_perm, alpha_arr)

    out = out[:NR, :, :W, :]
    # (NR, r, W, r*Cs) row-major IS the NHWC pixel-shuffled tensor: pure reshape.
    y_nhwc = out.reshape(N, H * r, W * r, Cs)
    # TODO(synk): final NHWC->NCHW permutation (module API boundary) is left to XLA;
    # fusing it would require a lane-hostile per-channel scatter inside the kernel.
    return jnp.transpose(y_nhwc, (0, 3, 1, 2))              # (N, Cs, H*r, W*r)


def _reference(x_nchw, weight, bias, alpha, r=2):
    # pure-JAX reference (lax conv + pixel shuffle + PReLU), NCHW throughout
    conv = jax.lax.conv_general_dilated(
        x_nchw, weight, window_strides=(1, 1), padding=((1, 1), (1, 1)),
        dimension_numbers=("NCHW", "OIHW", "NCHW"))
    conv = conv + bias.reshape(1, -1, 1, 1)
    N, C, H, W = conv.shape
    Cs = C // (r * r)
    y = conv.reshape(N, Cs, r, r, H, W)
    y = jnp.transpose(y, (0, 1, 4, 2, 5, 3)).reshape(N, Cs, H * r, W * r)
    return jnp.where(y >= 0, y, alpha * y)


if __name__ == "__main__":
    key = jax.random.PRNGKey(0)
    k_x, k_w, k_b = jax.random.split(key, 3)

    N, Cin, H, W = 2, 4, 16, 16
    Cout, r = 256, 2

    x = jax.random.normal(k_x, (N, Cin, H, W), jnp.float32)

    # deterministic parameter init (Kaiming-uniform-like, as in nn.Conv2d)
    fan_in = Cin * 3 * 3
    bound = 1.0 / jnp.sqrt(jnp.float32(fan_in))
    weight = jax.random.uniform(k_w, (Cout, Cin, 3, 3), jnp.float32,
                                minval=-bound, maxval=bound)
    bias = jax.random.uniform(k_b, (Cout,), jnp.float32,
                              minval=-bound, maxval=bound)
    alpha = jnp.float32(0.25)    # nn.PReLU() default: single shared parameter

    out = jax.block_until_ready(
        pixel_shuffler_block(x, weight, bias, alpha, upscale_factor=r))

    # reference on the same bf16-rounded activations/weights the kernel consumes
    xq = x.astype(jnp.bfloat16).astype(jnp.float32)
    wq = weight.astype(jnp.bfloat16).astype(jnp.float32)
    ref = jax.block_until_ready(_reference(xq, wq, bias, alpha, r))

    assert out.shape == (N, Cout // (r * r), r * H, r * W), out.shape
    err = float(jnp.max(jnp.abs(out - ref)))
    assert jnp.allclose(out, ref, atol=2e-3, rtol=2e-3), err

    print("KERNEL_OK")
</pallas_src>

<mosaic_0001>
module attributes {stable_mosaic.version = 11 : i64} {
  func.func @conv_ps_prelu_kernel(%arg0: i32, %arg1: memref<3x16x18x4xbf16, #tpu.memory_space<vmem>>, %arg2: memref<36x256xbf16, #tpu.memory_space<vmem>>, %arg3: memref<1x256xf32, #tpu.memory_space<vmem>>, %arg4: memref<1xf32, #tpu.memory_space<smem>>, %arg5: memref<16x2x16x128xf32, #tpu.memory_space<vmem>>, %arg6: memref<256x36xbf16, #tpu.memory_space<vmem>>) attributes {dimension_semantics = [#tpu.dimension_semantics<parallel>], iteration_bounds = array<i64: 2>, scalar_prefetch = 0 : i64, scratch_operands = 1 : i64, tpu.core_type = #tpu.core_type<tc>, window_params = [{transform_indices = @transform_0, window_bounds = array<i64: 3, 16, 18, 4>}, {pipeline_mode = #tpu.pipeline_mode<synchronous>, transform_indices = @transform_1, window_bounds = array<i64: 36, 256>}, {pipeline_mode = #tpu.pipeline_mode<synchronous>, transform_indices = @transform_2, window_bounds = array<i64: 1, 256>}, {transform_indices = @transform_3, window_bounds = array<i64: 1>}, {transform_indices = @transform_4, window_bounds = array<i64: 16, 2, 16, 128>}]} {
    %c0 = arith.constant 0 : index
    %c0_0 = arith.constant 0 : index
    %c0_1 = arith.constant 0 : index
    %c0_2 = arith.constant 0 : index
    %0 = vector.load %arg1[%c0, %c0_0, %c0_1, %c0_2] : memref<3x16x18x4xbf16, #tpu.memory_space<vmem>>, vector<1x16x18x4xbf16>
    %1 = vector.shape_cast %0 : vector<1x16x18x4xbf16> to vector<16x18x4xbf16>
    %2 = vector.extract_strided_slice %1 {offsets = [0, 0, 0], sizes = [16, 16, 4], strides = [1, 1, 1]} : vector<16x18x4xbf16> to vector<16x16x4xbf16>
    %3 = vector.shape_cast %2 : vector<16x16x4xbf16> to vector<256x4xbf16>
    %c0_3 = arith.constant 0 : index
    %c0_4 = arith.constant 0 : index
    %4 = vector.load %arg6[%c0_3, %c0_4] : memref<256x36xbf16, #tpu.memory_space<vmem>>, vector<256x4xbf16>
    tpu.vector_store %arg6[%c0_3, %c0_4], %3 {strides = array<i32>} : memref<256x36xbf16, #tpu.memory_space<vmem>>, vector<256x4xbf16>,
    %5 = vector.extract_strided_slice %1 {offsets = [0, 1, 0], sizes = [16, 16, 4], strides = [1, 1, 1]} : vector<16x18x4xbf16> to vector<16x16x4xbf16>
    %6 = vector.shape_cast %5 : vector<16x16x4xbf16> to vector<256x4xbf16>
    %c0_5 = arith.constant 0 : index
    %c4 = arith.constant 4 : index
    %7 = vector.load %arg6[%c0_5, %c4] : memref<256x36xbf16, #tpu.memory_space<vmem>>, vector<256x4xbf16>
    tpu.vector_store %arg6[%c0_5, %c4], %6 {strides = array<i32>} : memref<256x36xbf16, #tpu.memory_space<vmem>>, vector<256x4xbf16>,
    %8 = vector.extract_strided_slice %1 {offsets = [0, 2, 0], sizes = [16, 16, 4], strides = [1, 1, 1]} : vector<16x18x4xbf16> to vector<16x16x4xbf16>
    %9 = vector.shape_cast %8 : vector<16x16x4xbf16> to vector<256x4xbf16>
    %c0_6 = arith.constant 0 : index
    %c8 = arith.constant 8 : index
    %10 = vector.load %arg6[%c0_6, %c8] : memref<256x36xbf16, #tpu.memory_space<vmem>>, vector<256x4xbf16>
    tpu.vector_store %arg6[%c0_6, %c8], %9 {strides = array<i32>} : memref<256x36xbf16, #tpu.memory_space<vmem>>, vector<256x4xbf16>,
    %c1 = arith.constant 1 : index
    %c0_7 = arith.constant 0 : index
    %c0_8 = arith.constant 0 : index
    %c0_9 = arith.constant 0 : index
    %11 = vector.load %arg1[%c1, %c0_7, %c0_8, %c0_9] : memref<3x16x18x4xbf16, #tpu.memory_space<vmem>>, vector<1x16x18x4xbf16>
    %12 = vector.shape_cast %11 : vector<1x16x18x4xbf16> to vector<16x18x4xbf16>
    %13 = vector.extract_strided_slice %12 {offsets = [0, 0, 0], sizes = [16, 16, 4], strides = [1, 1, 1]} : vector<16x18x4xbf16> to vector<16x16x4xbf16>
    %14 = vector.shape_cast %13 : vector<16x16x4xbf16> to vector<256x4xbf16>
    %c0_10 = arith.constant 0 : index
    %c12 = arith.constant 12 : index
    %15 = vector.load %arg6[%c0_10, %c12] : memref<256x36xbf16, #tpu.memory_space<vmem>>, vector<256x4xbf16>
    tpu.vector_store %arg6[%c0_10, %c12], %14 {strides = array<i32>} : memref<256x36xbf16, #tpu.memory_space<vmem>>, vector<256x4xbf16>,
    %16 = vector.extract_strided_slice %12 {offsets = [0, 1, 0], sizes = [16, 16, 4], strides = [1, 1, 1]} : vector<16x18x4xbf16> to vector<16x16x4xbf16>
    %17 = vector.shape_cast %16 : vector<16x16x4xbf16> to vector<256x4xbf16>
    %c0_11 = arith.constant 0 : index
    %c16 = arith.constant 16 : index
    %18 = vector.load %arg6[%c0_11, %c16] : memref<256x36xbf16, #tpu.memory_space<vmem>>, vector<256x4xbf16>
    tpu.vector_store %arg6[%c0_11, %c16], %17 {strides = array<i32>} : memref<256x36xbf16, #tpu.memory_space<vmem>>, vector<256x4xbf16>,
    %19 = vector.extract_strided_slice %12 {offsets = [0, 2, 0], sizes = [16, 16, 4], strides = [1, 1, 1]} : vector<16x18x4xbf16> to vector<16x16x4xbf16>
    %20 = vector.shape_cast %19 : vector<16x16x4xbf16> to vector<256x4xbf16>
    %c0_12 = arith.constant 0 : index
    %c20 = arith.constant 20 : index
    %21 = vector.load %arg6[%c0_12, %c20] : memref<256x36xbf16, #tpu.memory_space<vmem>>, vector<256x4xbf16>
    tpu.vector_store %arg6[%c0_12, %c20], %20 {strides = array<i32>} : memref<256x36xbf16, #tpu.memory_space<vmem>>, vector<256x4xbf16>,
    %c2 = arith.constant 2 : index
    %c0_13 = arith.constant 0 : index
    %c0_14 = arith.constant 0 : index
    %c0_15 = arith.constant 0 : index
    %22 = vector.load %arg1[%c2, %c0_13, %c0_14, %c0_15] : memref<3x16x18x4xbf16, #tpu.memory_space<vmem>>, vector<1x16x18x4xbf16>
    %23 = vector.shape_cast %22 : vector<1x16x18x4xbf16> to vector<16x18x4xbf16>
    %24 = vector.extract_strided_slice %23 {offsets = [0, 0, 0], sizes = [16, 16, 4], strides = [1, 1, 1]} : vector<16x18x4xbf16> to vector<16x16x4xbf16>
    %25 = vector.shape_cast %24 : vector<16x16x4xbf16> to vector<256x4xbf16>
    %c0_16 = arith.constant 0 : index
    %c24 = arith.constant 24 : index
    %26 = vector.load %arg6[%c0_16, %c24] : memref<256x36xbf16, #tpu.memory_space<vmem>>, vector<256x4xbf16>
    tpu.vector_store %arg6[%c0_16, %c24], %25 {strides = array<i32>} : memref<256x36xbf16, #tpu.memory_space<vmem>>, vector<256x4xbf16>,
    %27 = vector.extract_strided_slice %23 {offsets = [0, 1, 0], sizes = [16, 16, 4], strides = [1, 1, 1]} : vector<16x18x4xbf16> to vector<16x16x4xbf16>
    %28 = vector.shape_cast %27 : vector<16x16x4xbf16> to vector<256x4xbf16>
    %c0_17 = arith.constant 0 : index
    %c28 = arith.constant 28 : index
    %29 = vector.load %arg6[%c0_17, %c28] : memref<256x36xbf16, #tpu.memory_space<vmem>>, vector<256x4xbf16>
    tpu.vector_store %arg6[%c0_17, %c28], %28 {strides = array<i32>} : memref<256x36xbf16, #tpu.memory_space<vmem>>, vector<256x4xbf16>,
    %30 = vector.extract_strided_slice %23 {offsets = [0, 2, 0], sizes = [16, 16, 4], strides = [1, 1, 1]} : vector<16x18x4xbf16> to vector<16x16x4xbf16>
    %31 = vector.shape_cast %30 : vector<16x16x4xbf16> to vector<256x4xbf16>
    %c0_18 = arith.constant 0 : index
    %c32 = arith.constant 32 : index
    %32 = vector.load %arg6[%c0_18, %c32] : memref<256x36xbf16, #tpu.memory_space<vmem>>, vector<256x4xbf16>
    tpu.vector_store %arg6[%c0_18, %c32], %31 {strides = array<i32>} : memref<256x36xbf16, #tpu.memory_space<vmem>>, vector<256x4xbf16>,
    %c0_19 = arith.constant 0 : index
    %c0_20 = arith.constant 0 : index
    %33 = vector.load %arg6[%c0_19, %c0_20] : memref<256x36xbf16, #tpu.memory_space<vmem>>, vector<256x36xbf16>
    %c0_21 = arith.constant 0 : index
    %c0_22 = arith.constant 0 : index
    %34 = vector.load %arg2[%c0_21, %c0_22] : memref<36x256xbf16, #tpu.memory_space<vmem>>, vector<36x256xbf16>
    %cst = arith.constant dense<0.000000e+00> : vector<256x256xf32>
    %35 = tpu.matmul %33, %34, %cst {dimension_numbers = #tpu.dot_dimension_numbers<[1], [0], [0], [1], [0, 0, 1, 1], [], []>} : vector<256x36xbf16>, vector<36x256xbf16>, vector<256x256xf32> -> vector<256x256xf32>
    %c0_23 = arith.constant 0 : index
    %c0_24 = arith.constant 0 : index
    %36 = vector.load %arg3[%c0_23, %c0_24] : memref<1x256xf32, #tpu.memory_space<vmem>>, vector<1x256xf32>
    %37 = vector.broadcast %36 : vector<1x256xf32> to vector<256x256xf32>
    %38 = arith.addf %35, %37 : vector<256x256xf32>
    %c0_25 = arith.constant 0 : index
    %39 = memref.load %arg4[%c0_25] : memref<1xf32, #tpu.memory_space<smem>>
    %cst_26 = arith.constant 0.000000e+00 : f32
    %40 = vector.broadcast %cst_26 : f32 to vector<256x256xf32>
    %41 = arith.cmpf oge, %38, %40 : vector<256x256xf32>
    %42 = vector.broadcast %39 : f32 to vector<256x256xf32>
    %43 = arith.mulf %42, %38 : vector<256x256xf32>
    %44 = arith.select %41, %38, %43 : vector<256x256xi1>, vector<256x256xf32>
    %45 = vector.extract_strided_slice %44 {offsets = [0, 0], sizes = [256, 128], strides = [1, 1]} : vector<256x256xf32> to vector<256x128xf32>
    %46 = vector.shape_cast %45 : vector<256x128xf32> to vector<16x16x128xf32>
    %c0_27 = arith.constant 0 : index
    %c0_28 = arith.constant 0 : index
    %c0_29 = arith.constant 0 : index
    %c0_30 = arith.constant 0 : index
    %47 = vector.load %arg5[%c0_27, %c0_28, %c0_29, %c0_30] : memref<16x2x16x128xf32, #tpu.memory_space<vmem>>, vector<16x1x16x128xf32>
    %48 = vector.shape_cast %47 : vector<16x1x16x128xf32> to vector<16x16x128xf32>
    %49 = vector.shape_cast %46 : vector<16x16x128xf32> to vector<16x1x16x128xf32>
    tpu.vector_store %arg5[%c0_27, %c0_28, %c0_29, %c0_30], %49 {strides = array<i32>} : memref<16x2x16x128xf32, #tpu.memory_space<vmem>>, vector<16x1x16x128xf32>,
    %50 = vector.extract_strided_slice %44 {offsets = [0, 128], sizes = [256, 128], strides = [1, 1]} : vector<256x256xf32> to vector<256x128xf32>
    %51 = vector.shape_cast %50 : vector<256x128xf32> to vector<16x16x128xf32>
    %c0_31 = arith.constant 0 : index
    %c1_32 = arith.constant 1 : index
    %c0_33 = arith.constant 0 : index
    %c0_34 = arith.constant 0 : index
    %52 = vector.load %arg5[%c0_31, %c1_32, %c0_33, %c0_34] : memref<16x2x16x128xf32, #tpu.memory_space<vmem>>, vector<16x1x16x128xf32>
    %53 = vector.shape_cast %52 : vector<16x1x16x128xf32> to vector<16x16x128xf32>
    %54 = vector.shape_cast %51 : vector<16x16x128xf32> to vector<16x1x16x128xf32>
    tpu.vector_store %arg5[%c0_31, %c1_32, %c0_33, %c0_34], %54 {strides = array<i32>} : memref<16x2x16x128xf32, #tpu.memory_space<vmem>>, vector<16x1x16x128xf32>,
    return
  }
  func.func @transform_0(%arg0: i32) -> (i32, i32, i32, i32) {
    %c0_i32 = arith.constant 0 : i32
    %c0_i32_0 = arith.constant 0 : i32
    %c0_i32_1 = arith.constant 0 : i32
    %c0_i32_2 = arith.constant 0 : i32
    return %c0_i32, %arg0, %c0_i32_0, %c0_i32_1 : i32, i32, i32, i32
  }
  func.func @transform_1(%arg0: i32) -> (i32, i32) {
    %c0_i32 = arith.constant 0 : i32
    %c0_i32_0 = arith.constant 0 : i32
    %c0_i32_1 = arith.constant 0 : i32
    return %c0_i32, %c0_i32_0 : i32, i32
  }
  func.func @transform_2(%arg0: i32) -> (i32, i32) {
    %c0_i32 = arith.constant 0 : i32
    %c0_i32_0 = arith.constant 0 : i32
    %c0_i32_1 = arith.constant 0 : i32
    return %c0_i32, %c0_i32_0 : i32, i32
  }
  func.func @transform_3(%arg0: i32) -> i32 {
    %c0_i32 = arith.constant 0 : i32
    %c0_i32_0 = arith.constant 0 : i32
    return %c0_i32 : i32
  }
  func.func @transform_4(%arg0: i32) -> (i32, i32, i32, i32) {
    %c0_i32 = arith.constant 0 : i32
    %c0_i32_0 = arith.constant 0 : i32
    %c0_i32_1 = arith.constant 0 : i32
    %c0_i32_2 = arith.constant 0 : i32
    return %arg0, %c0_i32, %c0_i32_0, %c0_i32_1 : i32, i32, i32, i32
  }
}

</mosaic_0001>

<bundles_post_ra>
// kernel: tpu_custom_call.1
= control target key start
LH: loop header
LB: loop body
LE: loop exit
PB: predicated region body
PF: predicated region fallthrough
CT: control target
= control target key end

     0   :  { %s7300_s0 = inlined_call_operand.vmem [shape: bf16[3,32,18,4], index: 0, kind: input, shape index: {}]   ;;  %s7301_s1 = inlined_call_operand.vmem [shape: bf16[36,256], index: 1, kind: input, shape index: {}]   ;;  %s7302_s2 = inlined_call_operand.vmem [shape: f32[1,256], index: 2, kind: input, shape index: {}]   ;;  %s7303_s3 = inlined_call_operand.<no memory space> [shape: f32[1], index: 3, kind: input, shape index: {}]   ;;  %s7304_s4 = inlined_call_operand.hbm [shape: f32[32,2,16,128], index: 4, kind: output, shape index: {}]  }
   0x1   :  { %9 = sst [smem:[#allocation3]] %s7303_s3 }
   0x2   :  { %10 = vsyncpa [#allocation6], 0 }
   0x3   :  { %12 = vsyncpa [#allocation6 + $0x1], 0  ;;  %s4896_s17 = smov 0   ;;  %s4898_s18 = smov 0  }
   0x4   :  { %s4900_s19 = smov 0   ;;  %s4902_s20 = smov 0  }
   0x5 LB: > { %s4391_s3 = sadd.s32 4294967295, %s4857_s20   ;;  %s4392_s21 = sadd.s32 4294967294, %s4857_s20   ;;  %s4857_s20 = sphi %s4902_s20, %s7362_s20   ;;  %s4853_s19 = sphi %s4900_s19, %s7361_s19   ;;  %s4849_s18 = sphi %s4898_s18, %s7360_s18   ;;  %s4845_s17 = sphi %s4896_s17, %s7359_s17  }
   0x6   : > { %s4919_s22 = sadd.s32 1, %s4857_s20   ;;  %s25_s23 = sadd.s32 1, %s4853_s19 }
   0x7   : > { %s22_s24 = ssub.s32 %s4857_s20, %s4919_s22  ;;  %p32_p0 = scmp.ne.s32.totalorder %s4853_s19, %s4849_s18 }
   0x8   : > { %p23_p1 = scmp.eq.s32.totalorder %s22_s24, 0  ;;  %p33_p2 = scmp.eq.s32.totalorder %s4857_s20, 0 }
   0x9   : > { %p125_p3 = scmp.eq.s32.totalorder %s4391_s3, 1  ;;  %p130_p4 = scmp.ne.s32.totalorder %s4849_s18, %s4845_s17 }
   0xa   : > { %s4932_s25 = scalar_select %p23_p1, %s4853_s19, %s25_s23  }
   0xb   : > { %p34_p5 = por %p33_p2, %p32_p0  ;;  %p4934_p6 = por %p125_p3, %p32_p0 }
   0xc   : > { %p131_p7 = scmp.eq.s32.totalorder %s4392_s21, 1  ;;  %p4394_p9 = scmp.ge.s32.totalorder %s4857_s20, 2 }
   0xe   : > { %p4938_p8 = por %p131_p7, %p130_p4  ;;  %156 = sbr.rel (%p4394_p9) target bundleno = 96 (0x60), region = 28 }
  0x13   : > { %159 = sbr.rel (!%p34_p5) target bundleno = 96 (0x60), region = 32  ;;  %s161_s28 = sand.u32 (%p34_p5), 1, %s4853_s19  }
  0x14   : > { %s4723_s29 = smul.u32 (%p34_p5), 192, %s4857_s20 }
  0x15   : > { %s4722_s30 = smul.u32 (%p34_p5), 576, %s161_s28 }
  0x16   : > { %s4950_s7 = scalar_lea.vmem (%p34_p5), %s7300_s0, %s4723_s29 }
  0x17   : > { %v184_v0 = vld [vmem:[%s4950_s7] sm:$0xff] (%p34_p5)   ;;  %v188_v1 = vld [vmem:[%s4950_s7 + $0x8] sm:$0xff] (%p34_p5)   ;;  %v192_v2 = vld [vmem:[%s4950_s7 + $0x10] sm:$0xff] (%p34_p5)   ;;  %s4955_s8 = scalar_lea.vmem (%p34_p5), [#allocation4], %s4722_s30 }
  0x18   : > { %185 = vst [vmem:[%s4955_s8] sm:$0xff] %v184_v0   ;;  %v196_v3 = vld [vmem:[%s4950_s7 + $0x18] sm:$0xff]   ;;  %v200_v4 = vld [vmem:[%s4950_s7 + $0x20] sm:$0xff]   ;;  %v204_v5 = vld [vmem:[%s4950_s7 + $0x28] sm:$0xff]  }
  0x19   : > { %189 = vst [vmem:[%s4955_s8 + $0x8] sm:$0xff] %v188_v1   ;;  %v208_v6 = vld [vmem:[%s4950_s7 + $0x30] sm:$0xff]   ;;  %v212_v7 = vld [vmem:[%s4950_s7 + $0x38] sm:$0xff]   ;;  %v216_v8 = vld [vmem:[%s4950_s7 + $0x40] sm:$0xff]  }
  0x1a   : > { %193 = vst [vmem:[%s4955_s8 + $0x10] sm:$0xff] %v192_v2   ;;  %v220_v9 = vld [vmem:[%s4950_s7 + $0x48] sm:$0xff]   ;;  %v224_v10 = vld [vmem:[%s4950_s7 + $0x50] sm:$0xff]   ;;  %v228_v11 = vld [vmem:[%s4950_s7 + $0x58] sm:$0xff]  }
  0x1b   : > { %197 = vst [vmem:[%s4955_s8 + $0x18] sm:$0xff] %v196_v3   ;;  %v232_v12 = vld [vmem:[%s4950_s7 + $0x60] sm:$0xff]   ;;  %v236_v13 = vld [vmem:[%s4950_s7 + $0x68] sm:$0xff]   ;;  %v240_v14 = vld [vmem:[%s4950_s7 + $0x70] sm:$0xff]  }
  0x1c   : > { %201 = vst [vmem:[%s4955_s8 + $0x20] sm:$0xff] %v200_v4   ;;  %v244_v15 = vld [vmem:[%s4950_s7 + $0x78] sm:$0xff]   ;;  %v248_v16 = vld [vmem:[%s4950_s7 + $0x80] sm:$0xff]   ;;  %v252_v17 = vld [vmem:[%s4950_s7 + $0x88] sm:$0xff]  }
  0x1d   : > { %205 = vst [vmem:[%s4955_s8 + $0x28] sm:$0xff] %v204_v5   ;;  %v256_v18 = vld [vmem:[%s4950_s7 + $0x90] sm:$0xff]   ;;  %v260_v19 = vld [vmem:[%s4950_s7 + $0x98] sm:$0xff]   ;;  %v264_v20 = vld [vmem:[%s4950_s7 + $0xa0] sm:$0xff]  }
  0x1e   : > { %209 = vst [vmem:[%s4955_s8 + $0x30] sm:$0xff] %v208_v6   ;;  %v268_v21 = vld [vmem:[%s4950_s7 + $0xa8] sm:$0xff]   ;;  %v272_v22 = vld [vmem:[%s4950_s7 + $0xb0] sm:$0xff]   ;;  %v276_v23 = vld [vmem:[%s4950_s7 + $0xb8] sm:$0xff]  }
  0x1f   : > { %213 = vst [vmem:[%s4955_s8 + $0x38] sm:$0xff] %v212_v7   ;;  %v280_v24 = vld [vmem:[%s4950_s7 + $0x180] sm:$0xff]   ;;  %v284_v25 = vld [vmem:[%s4950_s7 + $0x188] sm:$0xff]   ;;  %v288_v26 = vld [vmem:[%s4950_s7 + $0x190] sm:$0xff]  }
  0x20   : > { %217 = vst [vmem:[%s4955_s8 + $0x40] sm:$0xff] %v216_v8   ;;  %v292_v27 = vld [vmem:[%s4950_s7 + $0x198] sm:$0xff]   ;;  %v296_v28 = vld [vmem:[%s4950_s7 + $0x1a0] sm:$0xff]   ;;  %v300_v29 = vld [vmem:[%s4950_s7 + $0x1a8] sm:$0xff]  }
  0x21   : > { %221 = vst [vmem:[%s4955_s8 + $0x48] sm:$0xff] %v220_v9   ;;  %v304_v30 = vld [vmem:[%s4950_s7 + $0x1b0] sm:$0xff]   ;;  %v308_v31 = vld [vmem:[%s4950_s7 + $0x1b8] sm:$0xff]   ;;  %v312_v32 = vld [vmem:[%s4950_s7 + $0x1c0] sm:$0xff]  }
  0x22   : > { %225 = vst [vmem:[%s4955_s8 + $0x50] sm:$0xff] %v224_v10   ;;  %v316_v33 = vld [vmem:[%s4950_s7 + $0x1c8] sm:$0xff]   ;;  %v320_v34 = vld [vmem:[%s4950_s7 + $0x1d0] sm:$0xff]   ;;  %v324_v35 = vld [vmem:[%s4950_s7 + $0x1d8] sm:$0xff]  }
  0x23   : > { %229 = vst [vmem:[%s4955_s8 + $0x58] sm:$0xff] %v228_v11   ;;  %v328_v36 = vld [vmem:[%s4950_s7 + $0x1e0] sm:$0xff]   ;;  %v332_v37 = vld [vmem:[%s4950_s7 + $0x1e8] sm:$0xff]   ;;  %v336_v38 = vld [vmem:[%s4950_s7 + $0x1f0] sm:$0xff]  }
  0x24   : > { %233 = vst [vmem:[%s4955_s8 + $0x60] sm:$0xff] %v232_v12   ;;  %v340_v39 = vld [vmem:[%s4950_s7 + $0x1f8] sm:$0xff]   ;;  %v344_v40 = vld [vmem:[%s4950_s7 + $0x200] sm:$0xff]   ;;  %v348_v41 = vld [vmem:[%s4950_s7 + $0x208] sm:$0xff]  }
  0x25   : > { %237 = vst [vmem:[%s4955_s8 + $0x68] sm:$0xff] %v236_v13   ;;  %v352_v42 = vld [vmem:[%s4950_s7 + $0x210] sm:$0xff]   ;;  %v356_v43 = vld [vmem:[%s4950_s7 + $0x218] sm:$0xff]   ;;  %v360_v44 = vld [vmem:[%s4950_s7 + $0x220] sm:$0xff]  }
  0x26   : > { %241 = vst [vmem:[%s4955_s8 + $0x70] sm:$0xff] %v240_v14   ;;  %v364_v45 = vld [vmem:[%s4950_s7 + $0x228] sm:$0xff]   ;;  %v368_v46 = vld [vmem:[%s4950_s7 + $0x230] sm:$0xff]   ;;  %v372_v47 = vld [vmem:[%s4950_s7 + $0x238] sm:$0xff]  }
  0x27   : > { %245 = vst [vmem:[%s4955_s8 + $0x78] sm:$0xff] %v244_v15   ;;  %v376_v48 = vld [vmem:[%s4950_s7 + $0x300] sm:$0xff]   ;;  %v380_v49 = vld [vmem:[%s4950_s7 + $0x308] sm:$0xff]   ;;  %v384_v50 = vld [vmem:[%s4950_s7 + $0x310] sm:$0xff]  }
  0x28   : > { %249 = vst [vmem:[%s4955_s8 + $0x80] sm:$0xff] %v248_v16   ;;  %v388_v51 = vld [vmem:[%s4950_s7 + $0x318] sm:$0xff]   ;;  %v392_v52 = vld [vmem:[%s4950_s7 + $0x320] sm:$0xff]   ;;  %v396_v53 = vld [vmem:[%s4950_s7 + $0x328] sm:$0xff]  }
  0x29   : > { %253 = vst [vmem:[%s4955_s8 + $0x88] sm:$0xff] %v252_v17   ;;  %v400_v54 = vld [vmem:[%s4950_s7 + $0x330] sm:$0xff]   ;;  %v404_v55 = vld [vmem:[%s4950_s7 + $0x338] sm:$0xff]   ;;  %v408_v56 = vld [vmem:[%s4950_s7 + $0x340] sm:$0xff]  }
  0x2a   : > { %257 = vst [vmem:[%s4955_s8 + $0x90] sm:$0xff] %v256_v18   ;;  %v412_v57 = vld [vmem:[%s4950_s7 + $0x348] sm:$0xff]   ;;  %v416_v58 = vld [vmem:[%s4950_s7 + $0x350] sm:$0xff]   ;;  %v420_v59 = vld [vmem:[%s4950_s7 + $0x358] sm:$0xff]  }
  0x2b   : > { %261 = vst [vmem:[%s4955_s8 + $0x98] sm:$0xff] %v260_v19   ;;  %v424_v60 = vld [vmem:[%s4950_s7 + $0x360] sm:$0xff]   ;;  %v428_v61 = vld [vmem:[%s4950_s7 + $0x368] sm:$0xff]   ;;  %v432_v62 = vld [vmem:[%s4950_s7 + $0x370] sm:$0xff]  }
  0x2c   : > { %265 = vst [vmem:[%s4955_s8 + $0xa0] sm:$0xff] %v264_v20   ;;  %v436_v63 = vld [vmem:[%s4950_s7 + $0x378] sm:$0xff]   ;;  %v440_v0 = vld [vmem:[%s4950_s7 + $0x380] sm:$0xff]   ;;  %v444_v1 = vld [vmem:[%s4950_s7 + $0x388] sm:$0xff]  }
  0x2d   : > { %269 = vst [vmem:[%s4955_s8 + $0xa8] sm:$0xff] %v268_v21   ;;  %v448_v2 = vld [vmem:[%s4950_s7 + $0x390] sm:$0xff]   ;;  %v452_v3 = vld [vmem:[%s4950_s7 + $0x398] sm:$0xff]   ;;  %v456_v4 = vld [vmem:[%s4950_s7 + $0x3a0] sm:$0xff]  }
  0x2e   : > { %273 = vst [vmem:[%s4955_s8 + $0xb0] sm:$0xff] %v272_v22   ;;  %v460_v5 = vld [vmem:[%s4950_s7 + $0x3a8] sm:$0xff]   ;;  %v464_v6 = vld [vmem:[%s4950_s7 + $0x3b0] sm:$0xff]   ;;  %v468_v7 = vld [vmem:[%s4950_s7 + $0x3b8] sm:$0xff]  }
  0x2f   : > { %277 = vst [vmem:[%s4955_s8 + $0xb8] sm:$0xff] %v276_v23  }
  0x30   : > { %281 = vst [vmem:[%s4955_s8 + $0xc0] sm:$0xff] %v280_v24  }
  0x31   : > { %285 = vst [vmem:[%s4955_s8 + $0xc8] sm:$0xff] %v284_v25  }
  0x32   : > { %289 = vst [vmem:[%s4955_s8 + $0xd0] sm:$0xff] %v288_v26  }
  0x33   : > { %293 = vst [vmem:[%s4955_s8 + $0xd8] sm:$0xff] %v292_v27  }
  0x34   : > { %297 = vst [vmem:[%s4955_s8 + $0xe0] sm:$0xff] %v296_v28  }
  0x35   : > { %301 = vst [vmem:[%s4955_s8 + $0xe8] sm:$0xff] %v300_v29  }
  0x36   : > { %305 = vst [vmem:[%s4955_s8 + $0xf0] sm:$0xff] %v304_v30  }
  0x37   : > { %309 = vst [vmem:[%s4955_s8 + $0xf8] sm:$0xff] %v308_v31  }
  0x38   : > { %313 = vst [vmem:[%s4955_s8 + $0x100] sm:$0xff] %v312_v32  }
  0x39   : > { %317 = vst [vmem:[%s4955_s8 + $0x108] sm:$0xff] %v316_v33  }
  0x3a   : > { %321 = vst [vmem:[%s4955_s8 + $0x110] sm:$0xff] %v320_v34  }
  0x3b   : > { %325 = vst [vmem:[%s4955_s8 + $0x118] sm:$0xff] %v324_v35  }
  0x3c   : > { %329 = vst [vmem:[%s4955_s8 + $0x120] sm:$0xff] %v328_v36  }
  0x3d   : > { %333 = vst [vmem:[%s4955_s8 + $0x128] sm:$0xff] %v332_v37  }
  0x3e   : > { %337 = vst [vmem:[%s4955_s8 + $0x130] sm:$0xff] %v336_v38  }
  0x3f   : > { %341 = vst [vmem:[%s4955_s8 + $0x138] sm:$0xff] %v340_v39  }
  0x40   : > { %345 = vst [vmem:[%s4955_s8 + $0x140] sm:$0xff] %v344_v40  }
  0x41   : > { %349 = vst [vmem:[%s4955_s8 + $0x148] sm:$0xff] %v348_v41  }
  0x42   : > { %353 = vst [vmem:[%s4955_s8 + $0x150] sm:$0xff] %v352_v42  }
  0x43   : > { %357 = vst [vmem:[%s4955_s8 + $0x158] sm:$0xff] %v356_v43  }
  0x44   : > { %361 = vst [vmem:[%s4955_s8 + $0x160] sm:$0xff] %v360_v44  }
  0x45   : > { %365 = vst [vmem:[%s4955_s8 + $0x168] sm:$0xff] %v364_v45  }
  0x46   : > { %369 = vst [vmem:[%s4955_s8 + $0x170] sm:$0xff] %v368_v46  }
  0x47   : > { %373 = vst [vmem:[%s4955_s8 + $0x178] sm:$0xff] %v372_v47  }
  0x48   : > { %377 = vst [vmem:[%s4955_s8 + $0x180] sm:$0xff] %v376_v48  }
  0x49   : > { %381 = vst [vmem:[%s4955_s8 + $0x188] sm:$0xff] %v380_v49  }
  0x4a   : > { %385 = vst [vmem:[%s4955_s8 + $0x190] sm:$0xff] %v384_v50  }
  0x4b   : > { %389 = vst [vmem:[%s4955_s8 + $0x198] sm:$0xff] %v388_v51  }
  0x4c   : > { %393 = vst [vmem:[%s4955_s8 + $0x1a0] sm:$0xff] %v392_v52  }
  0x4d   : > { %397 = vst [vmem:[%s4955_s8 + $0x1a8] sm:$0xff] %v396_v53  }
  0x4e   : > { %401 = vst [vmem:[%s4955_s8 + $0x1b0] sm:$0xff] %v400_v54  }
  0x4f   : > { %405 = vst [vmem:[%s4955_s8 + $0x1b8] sm:$0xff] %v404_v55  }
  0x50   : > { %409 = vst [vmem:[%s4955_s8 + $0x1c0] sm:$0xff] %v408_v56  }
  0x51   : > { %413 = vst [vmem:[%s4955_s8 + $0x1c8] sm:$0xff] %v412_v57  }
  0x52   : > { %417 = vst [vmem:[%s4955_s8 + $0x1d0] sm:$0xff] %v416_v58  }
  0x53   : > { %421 = vst [vmem:[%s4955_s8 + $0x1d8] sm:$0xff] %v420_v59  }
  0x54   : > { %425 = vst [vmem:[%s4955_s8 + $0x1e0] sm:$0xff] %v424_v60  }
  0x55   : > { %429 = vst [vmem:[%s4955_s8 + $0x1e8] sm:$0xff] %v428_v61  }
  0x56   : > { %433 = vst [vmem:[%s4955_s8 + $0x1f0] sm:$0xff] %v432_v62  }
  0x57   : > { %437 = vst [vmem:[%s4955_s8 + $0x1f8] sm:$0xff] %v436_v63  }
  0x58   : > { %441 = vst [vmem:[%s4955_s8 + $0x200] sm:$0xff] %v440_v0  }
  0x59   : > { %445 = vst [vmem:[%s4955_s8 + $0x208] sm:$0xff] %v444_v1  }
  0x5a   : > { %449 = vst [vmem:[%s4955_s8 + $0x210] sm:$0xff] %v448_v2  }
  0x5b   : > { %453 = vst [vmem:[%s4955_s8 + $0x218] sm:$0xff] %v452_v3  }
  0x5c   : > { %457 = vst [vmem:[%s4955_s8 + $0x220] sm:$0xff] %v456_v4  }
  0x5d   : > { %461 = vst [vmem:[%s4955_s8 + $0x228] sm:$0xff] %v460_v5  }
  0x5e   : > { %465 = vst [vmem:[%s4955_s8 + $0x230] sm:$0xff] %v464_v6  }
  0x5f   : > { %469 = vst [vmem:[%s4955_s8 + $0x238] sm:$0xff] %v468_v7  }
  0x60 PF: > { %p4398_p10 = scmp.ge.s32.totalorder %s4857_s20, 1  ;;  %p782_p11 = scmp.lt.s32.totalorder %s4857_s20, 3 }
  0x62   : > { %p783_p12 = pnand %p4398_p10, %p782_p11 }
  0x64   : > { %786 = sbr.rel (%p783_p12) target bundleno = 1067 (0x42b), region = 73 }
  0x69   : > { %s5101_s9 = sand.u32 1, %s4849_s18   ;;  %vm898_vm0 = vsmask.f32 3328  ;;  %vm899_vm1 = vsmask.f32 7440  ;;  %s4859_s12 = smov 4  }
  0x6a   : > { %s4724_s10 = smul.u32 576, %s5101_s9  ;;  %vm5138_vm2 = vmor %vm898_vm0, %vm899_vm1  ;;  %vm1462_vm3 = vcmask 1042432   ;;  %vm1463_vm4 = vcmask 1046532   ;;  %vm865_vm5 = vcmask 27648   ;;  %s4860_s13 = smov 8   ;;  %vm1381_vm7 = vcmask 60448  }
  0x6b   : > { %vm5456_vm6 = vmor %vm1462_vm3, %vm1463_vm4  ;;  %s4861_s14 = smov 12   ;;  %vm1673_vm8 = vcmask 93248   ;;  %s4862_s15 = smov 16   ;;  %vm1883_vm9 = vcmask 126048   ;;  %vm2396_vm10 = vcmask 158848   ;;  %vm2653_vm11 = vcmask 191648  }
  0x6c   : > { %s5104_s11 = scalar_lea.vmem [#allocation4], %s4724_s10  ;;  %s4863_s16 = smov 20   ;;  %vm3863_vm12 = vcmask 1041408   ;;  %vm2863_vm13 = vcmask 224448   ;;  %vm3376_vm14 = vcmask 257248   ;;  %vm3633_vm15 = vcmask 290048  }
  0x6d   : > { %v5107_v8 = vld [vmem:[%s5104_s11 + $0xc] sm:$0xf]  ;;  %v5110_v9 = vld [vmem:[%s5104_s11 + $0x10] sm:$0xf]  ;;  %v5113_v10 = vld [vmem:[%s5104_s11] sm:$0xf] }
  0x6e   : > { %v926_v11 = vshrl.u32 %v5107_v8, 16  ;;  %v929_v12 = vshll.u32 %v5107_v8, 16  ;;  %v935_v13 = vshll.u32 %v5110_v9, 16  ;;  %v5119_v14 = vld [vmem:[%s5104_s11 + $0x4] sm:$0xf]  ;;  %v902_v15 = vshrl.u32 %v5113_v10, 16 }
  0x6f   : > { %v905_v16 = vshll.u32 %v5113_v10, 16  ;;  %v911_v17 = vshll.u32 %v5119_v14, 16  ;;  %v939_v18 = vshrl.u32 %v5110_v9, 16  ;;  %v915_v19 = vshrl.u32 %v5119_v14, 16  ;;  %v5127_v23 = vld [vmem:[%s5104_s11 + $0x14] sm:$0x1] }
  0x70   : > { %v928_v20 = vrot.slane %v926_v11, 4  ;;  %v931_v21 = vrot.slane %v929_v12, 5  ;;  %v904_v22 = vrot.slane %v902_v15, 4  ;;  %v937_v24 = vrot.slane %v935_v13, 5  ;;  %v5130_v27 = vld [vmem:[%s5104_s11 + $0x28] sm:$0xf] }
  0x71   : > { %v907_v25 = vrot.slane %v905_v16, 5  ;;  %v941_v26 = vrot.slane %v939_v18, 4  ;;  %v913_v29 = vrot.slane %v911_v17, 5  ;;  %v5133_v30 = vld [vmem:[%s5104_s11 + $0x8] sm:$0x1]  ;;  %v917_v31 = vrot.slane %v915_v19, 4 }
  0x72   : > { %v932_v28 = vor.u32 %v931_v21, %v928_v20  ;;  %v983_v32 = vshll.u32 %v5130_v27, 16  ;;  %v945_v36 = vshll.u32 %v5127_v23, 16  ;;  %v987_v37 = vshrl.u32 %v5130_v27, 16  ;;  %v5145_v38 = vld [vmem:[%s5104_s11 + $0x24] sm:$0xf]  ;;  %s4864_s21 = smov 24  }
  0x73   : > { %v908_v34 = vor.u32 %v907_v25, %v904_v22  ;;  %v942_v35 = vor.u32 %v941_v26, %v937_v24  ;;  %v918_v41 = vor.u32 %v917_v31, %v913_v29  ;;  %v921_v42 = vshll.u32 %v5133_v30, 16  ;;  %v5158_v51 = vld [vmem:[%s5104_s11 + $0x2c] sm:$0x1]  ;;  %v5162_v54 = vld [vmem:[%s5104_s11 + $0x3c] sm:$0xf]  ;;  %s4865_s23 = smov 32  }
  0x74   : > { %v933_v39 = vrot.slane %v932_v28, 4  ;;  %v5148_v43 = vrot.slane %v983_v32, 5  ;;  %v989_v45 = vrot.slane %v987_v37, 4  ;;  %v974_v46 = vshrl.u32 %v5145_v38, 16  ;;  %v5165_v57 = vld [vmem:[%s5104_s11 + $0x34] sm:$0xf] }
  0x75   : > { %v909_v40 = vrot.slane %v908_v34, 4  ;;  %v977_v47 = vshll.u32 %v5145_v38, 16  ;;  %v943_v49 = vrot.slane %v942_v35, 4  ;;  %v947_v50 = vrot.slane %v945_v36, 5  ;;  %v5168_v58 = vld [vmem:[%s5104_s11 + $0x18] sm:$0xf] }
  0x76   : > { %v938_v44 = vsel %vm5138_vm2, %v933_v39, %v937_v24  ;;  %v976_v52 = vrot.slane %v974_v46, 4  ;;  %v919_v55 = vrot.slane %v918_v41, 4  ;;  %v923_v56 = vrot.slane %v921_v42, 5  ;;  %v5173_v61 = vld [vmem:[%s5104_s11 + $0x1c] sm:$0xf]  ;;  %s4866_s24 = smov 28  }
  0x77   : > { %1289 = vrot.lane.b32.xlu1 %v938_v44, %s4859_s12  ;;  %v914_v48 = vsel %vm5138_vm2, %v909_v40, %v913_v29  ;;  %v979_v53 = vrot.slane %v977_v47, 5  ;;  %v990_v59 = vor.u32 %v989_v45, %v5148_v43  ;;  %v993_v60 = vshll.u32 %v5158_v51, 16  ;;  %v5187_v11 = vld [vmem:[%s5104_s11 + $0x4c] sm:$0xf]  ;;  %v5190_v15 = vld [vmem:[%s5104_s11 + $0x40] sm:$0xf] }
  0x78   : > { %1285 = vrot.lane.b32.xlu0 %v914_v48, %s4859_s12  ;;  %v948_v62 = vsel %vm5138_vm2, %v943_v49, %v947_v50  ;;  %v1022_v63 = vshrl.u32 %v5162_v54, 16  ;;  %v1025_v0 = vshll.u32 %v5162_v54, 16  ;;  %v1007_v2 = vshll.u32 %v5165_v57, 16  ;;  %v5194_v19 = vld [vmem:[%s5104_s11 + $0x38] sm:$0x1]  ;;  %s4308_s29 = scalar_lea.sflag [#allocation6], %s5101_s9 }
  0x79   : > { %v980_v1 = vor.u32 %v979_v53, %v976_v52  ;;  %v1011_v3 = vshrl.u32 %v5165_v57, 16  ;;  %v950_v4 = vshrl.u32 %v5168_v58, 16  ;;  %v924_v5 = vsel %vm5138_vm2, %v919_v55, %v923_v56  ;;  %7327 = vst [vmem:[#allocation8_spill] sm:$0xff] %v5194_v19  ;;  %v5201_v26 = vld [vmem:[%s5104_s11 + $0x20] sm:$0x1]  ;;  %s4815_s8 = scalar_lea.hbm %s7304_s4, 1024 }
  0x7a   : > { %v953_v6 = vshll.u32 %v5168_v58, 16  ;;  %v959_v7 = vshll.u32 %v5173_v61, 16  ;;  %v991_v12 = vrot.slane %v990_v59, 4  ;;  %v995_v13 = vrot.slane %v993_v60, 5  ;;  %v5205_v32 = vld [vmem:[%s5104_s11 + $0x48] sm:$0xf] }
  0x7b   : > { %v952_v16 = vrot.slane %v950_v4, 4  ;;  %v1024_v17 = vrot.slane %v1022_v63, 4  ;;  %v1027_v18 = vrot.slane %v1025_v0, 5  ;;  %v981_v21 = vrot.slane %v980_v1, 4  ;;  %v5224_v53 = vld [vmem:[%s5104_s11 + $0x30] sm:$0xf] }
  0x7c   : > { %v955_v20 = vrot.slane %v953_v6, 5  ;;  %v5197_v22 = vrot.slane %v1007_v2, 5  ;;  %v1013_v24 = vrot.slane %v1011_v3, 4  ;;  %v1055_v25 = vshll.u32 %v5187_v11, 16  ;;  %v5228_v55 = vld [vmem:[%s5104_s11 + $0x50] sm:$0x1] }
  0x7d   : > { %v961_v29 = vrot.slane %v959_v7, 5  ;;  %v1059_v31 = vshrl.u32 %v5187_v11, 16  ;;  %v963_v34 = vshrl.u32 %v5173_v61, 16  ;;  %v996_v35 = vsel %vm5138_vm2, %v991_v12, %v995_v13  ;;  %7328 = vst [vmem:[#allocation9_spill] sm:$0xff] %v5228_v55  ;;  %v5240_v7 = vld [vmem:[%s5104_s11 + $0x58] sm:$0xf] }
  0x7e   : > { %v956_v28 = vor.u32 %v955_v20, %v952_v16  ;;  %v1031_v36 = vshll.u32 %v5190_v15, 16  ;;  %v1017_v37 = vshll.u32 %v5194_v19, 16  ;;  %v1028_v39 = vor.u32 %v1027_v18, %v1024_v17  ;;  %v5427_v19 = vld [vmem:[%s5104_s11 + $0xbc] sm:$0x1]  ;;  %868 = vst.msk [vmem:[#allocation2 + $0x8] sm:$0xf] %vm865_vm5, %v5107_v8 }
  0x7f   : > { %1291 = vrot.lane.b32.xlu1 %v948_v62, %s4859_s12  ;;  %v965_v41 = vrot.slane %v963_v34, 4  ;;  %v969_v42 = vshll.u32 %v5201_v26, 16  ;;  %v986_v44 = vsel %vm5138_vm2, %v981_v21, %v5148_v43  ;;  %v1014_v45 = vor.u32 %v1013_v24, %v5197_v22  ;;  %v5232_v62 = vld [vmem:[%s5104_s11 + $0x60] sm:$0xf]  ;;  %866 = vst.msk [vmem:[#allocation2] sm:$0xf] %vm865_vm5, %v5113_v10 }
  0x80   : > { %1287 = vrot.lane.b32.xlu0 %v924_v5, %s4859_s12  ;;  %v957_v40 = vrot.slane %v956_v28, 4  ;;  %v1046_v46 = vshrl.u32 %v5205_v32, 16  ;;  %v1049_v47 = vshll.u32 %v5205_v32, 16  ;;  %v5221_v49 = vrot.slane %v1055_v25, 5  ;;  %867 = vst.msk [vmem:[#allocation2 + $0x4] sm:$0xf] %vm865_vm5, %v5119_v14 }
  0x81   : > { %v1061_v50 = vrot.slane %v1059_v31, 4  ;;  %v966_v52 = vor.u32 %v965_v41, %v961_v29  ;;  %v1029_v43 = vrot.slane %v1028_v39, 4  ;;  %v1033_v56 = vrot.slane %v1031_v36, 5  ;;  %v5256_v39 = vld [vmem:[%s5104_s11 + $0x64] sm:$0xf] }
  0x82   : > { %v962_v48 = vsel %vm5138_vm2, %v957_v40, %v961_v29  ;;  %v971_v60 = vrot.slane %v969_v42, 5  ;;  %v1048_v63 = vrot.slane %v1046_v46, 4  ;;  %v1051_v0 = vrot.slane %v1049_v47, 5  ;;  %v5259_v40 = vld [vmem:[%s5104_s11 + $0x5c] sm:$0x1] }
  0x83   : > { %1293 = vrot.lane.b32.xlu2 %v962_v48, %s4859_s12  ;;  %v967_v59 = vrot.slane %v966_v52, 4  ;;  %v998_v1 = vshrl.u32 %v5224_v53, 16  ;;  %v1001_v2 = vshll.u32 %v5224_v53, 16  ;;  %v1015_v3 = vrot.slane %v1014_v45, 4  ;;  %7329 = vst [vmem:[#allocation10_spill] sm:$0xff] %v5259_v40 }
  0x84   : > { %v1019_v4 = vrot.slane %v1017_v37, 5  ;;  %v1062_v5 = vor.u32 %v1061_v50, %v5221_v49  ;;  %v1065_v6 = vshll.u32 %v5228_v55, 16  ;;  %v1094_v12 = vshrl.u32 %v5232_v62, 16  ;;  %v5265_v46 = vld [vmem:[%s5104_s11 + $0x44] sm:$0x1] }
  0x85   : > { %v1097_v13 = vshll.u32 %v5232_v62, 16  ;;  %v1000_v16 = vrot.slane %v998_v1, 4  ;;  %v1003_v17 = vrot.slane %v1001_v2, 5  ;;  %v1034_v18 = vsel %vm5138_vm2, %v1029_v43, %v1033_v56  ;;  %v5268_v48 = vld [vmem:[%s5104_s11 + $0x70] sm:$0xf] }
  0x86   : > { %v972_v20 = vsel %vm5138_vm2, %v967_v59, %v971_v60  ;;  %v1052_v21 = vor.u32 %v1051_v0, %v1048_v63  ;;  %v1079_v24 = vshll.u32 %v5240_v7, 16  ;;  %v1083_v25 = vshrl.u32 %v5240_v7, 16  ;;  %v5274_v59 = vld [vmem:[%s5104_s11 + $0x6c] sm:$0xf]  ;;  %v5277_v60 = vld [vmem:[%s5104_s11 + $0x54] sm:$0xf] }
  0x87   : > { %1299 = vrot.lane.b32.xlu1 %v996_v35, %s4859_s12  ;;  %v1004_v28 = vor.u32 %v1003_v17, %v1000_v16  ;;  %v1020_v29 = vsel %vm5138_vm2, %v1015_v3, %v1019_v4  ;;  %v1067_v31 = vrot.slane %v1065_v6, 5  ;;  %v1063_v34 = vrot.slane %v1062_v5, 4  ;;  %869 = vst.msk [vmem:[#allocation2 + $0xc] sm:$0xf] %vm865_vm5, %v5110_v9 }
  0x88   : > { %1297 = vrot.lane.b32.xlu0 %v986_v44, %s4859_s12  ;;  %v1096_v35 = vrot.slane %v1094_v12, 4  ;;  %v1099_v36 = vrot.slane %v1097_v13, 5  ;;  %v1035_v37 = vshrl.u32 %v5190_v15, 16  ;;  %v1053_v42 = vrot.slane %v1052_v21, 4  ;;  %870 = vst.msk [vmem:[#allocation2 + $0x10] sm:$0xf] %vm865_vm5, %v5168_v58 }
  0x89   : > { %v1005_v41 = vrot.slane %v1004_v28, 4  ;;  %v5262_v44 = vrot.slane %v1079_v24, 5  ;;  %v1085_v45 = vrot.slane %v1083_v25, 4  ;;  %v1068_v50 = vsel %vm5138_vm2, %v1063_v34, %v1067_v31  ;;  %v5298_v24 = vld [vmem:[%s5104_s11 + $0x74] sm:$0x1] }
  0x8a   : > { %v1037_v47 = vrot.slane %v1035_v37, 4  ;;  %v1100_v52 = vor.u32 %v1099_v36, %v1096_v35  ;;  %v1103_v43 = vshll.u32 %v5256_v39, 16  ;;  %v1089_v63 = vshll.u32 %v5259_v40, 16  ;;  %7330 = vst [vmem:[#allocation11_spill] sm:$0xff] %v5298_v24  ;;  %v5301_v36 = vld [vmem:[%s5104_s11 + $0x84] sm:$0xf] }
  0x8b   : > { %1295 = vrot.lane.b32.xlu2 %v972_v20, %s4859_s12  ;;  %v1010_v0 = vsel %vm5138_vm2, %v1005_v41, %v5197_v22  ;;  %v1041_v2 = vshll.u32 %v5265_v46, 16  ;;  %v1058_v3 = vsel %vm5138_vm2, %v1053_v42, %v5221_v49  ;;  %v1086_v4 = vor.u32 %v1085_v45, %v5262_v44  ;;  %v5304_v37 = vld [vmem:[%s5104_s11 + $0x7c] sm:$0xf]  ;;  %v5372_v40 = vld [vmem:[%s5104_s11 + $0xa0] sm:$0xf] }
  0x8c   : > { %v1038_v1 = vor.u32 %v1037_v47, %v1033_v56  ;;  %v1127_v5 = vshll.u32 %v5268_v48, 16  ;;  %v1131_v6 = vshrl.u32 %v5268_v48, 16  ;;  %v1118_v12 = vshrl.u32 %v5274_v59, 16  ;;  %871 = vst.msk [vmem:[#allocation2 + $0x14] sm:$0xf] %vm865_vm5, %v5173_v61 }
  0x8d   : > { %v1121_v13 = vshll.u32 %v5274_v59, 16  ;;  %v1070_v22 = vshrl.u32 %v5277_v60, 16  ;;  %v1073_v56 = vshll.u32 %v5277_v60, 16  ;;  %v1043_v16 = vrot.slane %v1041_v2, 5  ;;  %872 = vst.msk [vmem:[#allocation2 + $0x18] sm:$0xf] %vm865_vm5, %v5145_v38 }
  0x8e   : > { %v1039_v49 = vrot.slane %v1038_v1, 4  ;;  %v1101_v20 = vrot.slane %v1100_v52, 4  ;;  %v1105_v21 = vrot.slane %v1103_v43, 5  ;;  %v1129_v25 = vrot.slane %v1127_v5, 5  ;;  %873 = vst.msk [vmem:[#allocation2 + $0x1c] sm:$0xf] %vm865_vm5, %v5130_v27 }
  0x8f   : > { %1305 = vrot.lane.b32.xlu1 %v1034_v18, %s4859_s12  ;;  %v1072_v17 = vrot.slane %v1070_v22, 4  ;;  %v1075_v18 = vrot.slane %v1073_v56, 5  ;;  %v1133_v28 = vrot.slane %v1131_v6, 4  ;;  %v1091_v31 = vrot.slane %v1089_v63, 5  ;;  %v5324_v6 = vld [vmem:[%s5104_s11 + $0x94] sm:$0xf] }
  0x90   : > { %1303 = vrot.lane.b32.xlu0 %v1020_v29, %s4859_s12  ;;  %v1087_v29 = vrot.slane %v1086_v4, 4  ;;  %v1120_v34 = vrot.slane %v1118_v12, 4  ;;  %v1123_v35 = vrot.slane %v1121_v13, 5  ;;  %v1137_v41 = vshll.u32 %v5298_v24, 16  ;;  %v5321_v4 = vld [vmem:[%s5104_s11 + $0x88] sm:$0xf] }
  0x91   : > { %v1044_v42 = vsel %vm5138_vm2, %v1039_v49, %v1043_v16  ;;  %v1076_v45 = vor.u32 %v1075_v18, %v1072_v17  ;;  %v1107_v47 = vshrl.u32 %v5256_v39, 16  ;;  %v1134_v52 = vor.u32 %v1133_v28, %v1129_v25  ;;  %v5327_v12 = vld [vmem:[%s5104_s11 + $0x68] sm:$0x1]  ;;  %v5331_v17 = vld [vmem:[%s5104_s11 + $0x78] sm:$0xf] }
  0x92   : > { %v1166_v43 = vshrl.u32 %v5301_v36, 16  ;;  %v1169_v63 = vshll.u32 %v5301_v36, 16  ;;  %v1124_v1 = vor.u32 %v1123_v35, %v1120_v34  ;;  %v1151_v2 = vshll.u32 %v5304_v37, 16  ;;  %7331 = vst [vmem:[#allocation12_spill] sm:$0xff] %v5327_v12  ;;  %v5341_v35 = vld [vmem:[%s5104_s11 + $0x90] sm:$0xf] }
  0x93   : > { %1301 = vrot.lane.b32.xlu2 %v1010_v0, %s4859_s12  ;;  %v1092_v0 = vsel %vm5138_vm2, %v1087_v29, %v1091_v31  ;;  %v1077_v5 = vrot.slane %v1076_v45, 4  ;;  %v1109_v13 = vrot.slane %v1107_v47, 4  ;;  %v1135_v22 = vrot.slane %v1134_v52, 4  ;;  %874 = vst.msk [vmem:[#allocation2 + $0x20] sm:$0xf] %vm865_vm5, %v5224_v53 }
  0x94   : > { %v1139_v56 = vrot.slane %v1137_v41, 5  ;;  %v1168_v49 = vrot.slane %v1166_v43, 4  ;;  %v1171_v16 = vrot.slane %v1169_v63, 5  ;;  %v1125_v18 = vrot.slane %v1124_v1, 4  ;;  %875 = vst.msk [vmem:[#allocation2 + $0x24] sm:$0xf] %vm865_vm5, %v5165_v57 }
  0x95   : > { %v5336_v28 = vrot.slane %v1151_v2, 5  ;;  %v1199_v31 = vshll.u32 %v5324_v6, 16  ;;  %v1203_v34 = vshrl.u32 %v5324_v6, 16  ;;  %v1082_v41 = vsel %vm5138_vm2, %v1077_v5, %v5262_v44  ;;  %876 = vst.msk [vmem:[#allocation2 + $0x28] sm:$0xf] %vm865_vm5, %v5162_v54 }
  0x96   : > { %v1110_v45 = vor.u32 %v1109_v13, %v1105_v21  ;;  %v1142_v47 = vshrl.u32 %v5331_v17, 16  ;;  %v1140_v52 = vsel %vm5138_vm2, %v1135_v22, %v1139_v56  ;;  %v1172_v43 = vor.u32 %v1171_v16, %v1168_v49  ;;  %v5363_v13 = vld [vmem:[%s5104_s11 + $0x98] sm:$0x1]  ;;  %877 = vst.msk [vmem:[#allocation2 + $0x2c] sm:$0xf] %vm865_vm5, %v5190_v15 }
  0x97   : > { %1311 = vrot.lane.b32.xlu1 %v1068_v50, %s4859_s12  ;;  %v1106_v50 = vsel %vm5138_vm2, %v1101_v20, %v1105_v21  ;;  %v5334_v20 = vld [vmem:[%s5104_s11 + $0x80] sm:$0x1]  ;;  %v1175_v63 = vshll.u32 %v5321_v4, 16  ;;  %v1130_v1 = vsel %vm5138_vm2, %v1125_v18, %v1129_v25  ;;  %v1190_v44 = vshrl.u32 %v5341_v35, 16  ;;  %7333 = vst [vmem:[#allocation14_spill] sm:$0xff] %v5363_v13 }
  0x98   : > { %1309 = vrot.lane.b32.xlu0 %v1058_v3, %s4859_s12  ;;  %v1155_v3 = vshrl.u32 %v5304_v37, 16  ;;  %7332 = vst [vmem:[#allocation13_spill] sm:$0xff] %v5334_v20  ;;  %v1193_v21 = vshll.u32 %v5341_v35, 16  ;;  %v1205_v5 = vrot.slane %v1203_v34, 4  ;;  %v1111_v22 = vrot.slane %v1110_v45, 4 }
  0x99   : > { %v1144_v25 = vrot.slane %v1142_v47, 4  ;;  %v1173_v16 = vrot.slane %v1172_v43, 4  ;;  %v1177_v18 = vrot.slane %v1175_v63, 5  ;;  %v1179_v47 = vshrl.u32 %v5321_v4, 16  ;;  %878 = vst.msk [vmem:[#allocation2 + $0x30] sm:$0xf] %vm865_vm5, %v5205_v32 }
  0x9a   : > { %v1157_v29 = vrot.slane %v1155_v3, 4  ;;  %v5359_v3 = vrot.slane %v1199_v31, 5  ;;  %v1195_v24 = vrot.slane %v1193_v21, 5  ;;  %v5367_v31 = vld [vmem:[%s5104_s11 + $0xa8] sm:$0xf]  ;;  %vm3814_vm0 = vcmask 293888  }
  0x9b   : > { %1307 = vrot.lane.b32.xlu2 %v1044_v42, %s4859_s12  ;;  %v1113_v42 = vshll.u32 %v5327_v12, 16  ;;  %7334 = vst [vmem:[#allocation15_spill] sm:$0xff] %v5367_v31  ;;  %v1238_v43 = vshrl.u32 %v5367_v31, 16  ;;  %v1241_v63 = vshll.u32 %v5367_v31, 16 }
  0x9c   : > { %v1158_v2 = vor.u32 %v1157_v29, %v5336_v28  ;;  %v1206_v34 = vor.u32 %v1205_v5, %v5359_v3  ;;  %879 = vst.msk [vmem:[#allocation2 + $0x34] sm:$0xf] %vm865_vm5, %v5187_v11 }
  0x9d   : > { %v1115_v56 = vrot.slane %v1113_v42, 5  ;;  %880 = vst.msk [vmem:[#allocation2 + $0x38] sm:$0xf] %vm865_vm5, %v5277_v60 }
  0x9e   : > { %v1159_v29 = vrot.slane %v1158_v2, 4  ;;  %v1223_v2 = vshll.u32 %v5372_v40, 16  ;;  %v1207_v21 = vrot.slane %v1206_v34, 4  ;;  %881 = vst.msk [vmem:[#allocation2 + $0x3c] sm:$0xf] %vm865_vm5, %v5240_v7 }
  0x9f   : > { %1317 = vrot.lane.b32.xlu1 %v1106_v50, %s4859_s12  ;;  %v1145_v50 = vshll.u32 %v5331_v17, 16  ;;  %v1116_v42 = vsel %vm5138_vm2, %v1111_v22, %v1115_v56  ;;  %v5388_v22 = vld [vmem:[%s5104_s11 + $0xac] sm:$0xf]  ;;  %882 = vst.msk [vmem:[#allocation2 + $0x40] sm:$0xf] %vm865_vm5, %v5232_v62 }
  0xa0   : > { %1315 = vrot.lane.b32.xlu0 %v1092_v0, %s4859_s12  ;;  %v1161_v0 = vshll.u32 %v5334_v20, 16  ;;  %v1225_v34 = vrot.slane %v1223_v2, 5  ;;  %883 = vst.msk [vmem:[#allocation2 + $0x44] sm:$0xf] %vm865_vm5, %v5256_v39 }
  0xa1   : > { %v1147_v49 = vrot.slane %v1145_v50, 5  ;;  %v1178_v50 = vsel %vm5138_vm2, %v1173_v16, %v1177_v18  ;;  %v5395_v16 = vld [vmem:[%s5104_s11 + $0xa4] sm:$0x1]  ;;  %884 = vst.msk [vmem:[#allocation2 + $0x48] sm:$0xf] %vm865_vm5, %v5274_v59 }
  0xa2   : > { %v1163_v20 = vrot.slane %v1161_v0, 5  ;;  %7336 = vst [vmem:[#allocation17_spill] sm:$0xff] %v5395_v16 }
  0xa3   : > { %1313 = vrot.lane.b32.xlu2 %v1082_v41, %s4859_s12  ;;  %v1192_v41 = vrot.slane %v1190_v44, 4  ;;  %v1148_v45 = vor.u32 %v1147_v49, %v1144_v25  ;;  %v1227_v44 = vshrl.u32 %v5372_v40, 16  ;;  %v5391_v25 = vld [vmem:[%s5104_s11 + $0x8c] sm:$0x1]  ;;  %v1243_v49 = vrot.slane %v1241_v63, 5 }
  0xa4   : > { %v1164_v0 = vsel %vm5138_vm2, %v1159_v29, %v1163_v20  ;;  %7335 = vst [vmem:[#allocation16_spill] sm:$0xff] %v5391_v25  ;;  %v1181_v20 = vrot.slane %v1179_v47, 4  ;;  %v5398_v29 = vld [vmem:[%s5104_s11 + $0x9c] sm:$0xf]  ;;  %v1185_v47 = vshll.u32 %v5391_v25, 16 }
  0xa5   : > { %v1149_v56 = vrot.slane %v1148_v45, 4  ;;  %v1247_v45 = vshll.u32 %v5388_v22, 16  ;;  %885 = vst.msk [vmem:[#allocation2 + $0x4c] sm:$0xf] %vm865_vm5, %v5268_v48 }
  0xa6   : > { %v1182_v63 = vor.u32 %v1181_v20, %v1177_v18  ;;  %v1187_v20 = vrot.slane %v1185_v47, 5  ;;  %v1251_v47 = vshrl.u32 %v5388_v22, 16  ;;  %886 = vst.msk [vmem:[#allocation2 + $0x50] sm:$0xf] %vm865_vm5, %v5331_v17 }
  0xa7   : > { %1323 = vrot.lane.b32.xlu1 %v1140_v52, %s4859_s12  ;;  %v1209_v52 = vshll.u32 %v5363_v13, 16  ;;  %v5407_v13 = vld [vmem:[%s5104_s11 + $0xb4] sm:$0xf]  ;;  %v1249_v55 = vrot.slane %v1247_v45, 5  ;;  %v1281_v45 = vshll.u32 %v5427_v19, 16 }
  0xa8   : > { %1321 = vrot.lane.b32.xlu0 %v1130_v1, %s4859_s12  ;;  %v1196_v1 = vor.u32 %v1195_v24, %v1192_v41  ;;  %v1240_v24 = vrot.slane %v1238_v43, 4  ;;  %7338 = vst [vmem:[#allocation19_spill] sm:$0xff] %v5407_v13  ;;  %v1154_v43 = vsel %vm5138_vm2, %v1149_v56, %v5336_v28  ;;  %v1262_v28 = vshrl.u32 %v5407_v13, 16 }
  0xa9   : > { %v1211_v5 = vrot.slane %v1209_v52, 5  ;;  %v1229_v52 = vrot.slane %v1227_v44, 4  ;;  %v1233_v44 = vshll.u32 %v5395_v16, 16  ;;  %v1265_v18 = vshll.u32 %v5407_v13, 16  ;;  %887 = vst.msk [vmem:[#allocation2 + $0x54] sm:$0xf] %vm865_vm5, %v5304_v37 }
  0xaa   : > { %v1197_v41 = vrot.slane %v1196_v1, 4  ;;  %v1217_v1 = vshll.u32 %v5398_v29, 16  ;;  %v1244_v2 = vor.u32 %v1243_v49, %v1240_v24  ;;  %v1183_v56 = vrot.slane %v1182_v63, 4  ;;  %888 = vst.msk [vmem:[#allocation2 + $0x58] sm:$0xf] %vm865_vm5, %v5301_v36 }
  0xab   : > { %1319 = vrot.lane.b32.xlu2 %v1116_v42, %s4859_s12  ;;  %v5401_v42 = vld [vmem:[%s5104_s11 + $0xb8] sm:$0xf]  ;;  %v1230_v12 = vor.u32 %v1229_v52, %v1225_v34  ;;  %v1235_v52 = vrot.slane %v1233_v44, 5  ;;  %v1264_v31 = vrot.slane %v1262_v28, 4  ;;  %v1267_v13 = vrot.slane %v1265_v18, 5 }
  0xac   : > { %7337 = vst [vmem:[#allocation18_spill] sm:$0xff] %v5401_v42  ;;  %v1202_v25 = vsel %vm5138_vm2, %v1197_v41, %v5359_v3  ;;  %v1219_v49 = vrot.slane %v1217_v1, 5  ;;  %v1245_v16 = vrot.slane %v1244_v2, 4  ;;  %v1253_v2 = vrot.slane %v1251_v47, 4 }
  0xad   : > { %v1231_v41 = vrot.slane %v1230_v12, 4  ;;  %v4402_v47 = vrot.slane %v5168_v58, 9  ;;  %889 = vst.msk [vmem:[#allocation2 + $0x5c] sm:$0xf] %vm865_vm5, %v5321_v4 }
  0xae   : > { %v1254_v18 = vor.u32 %v1253_v2, %v1249_v55  ;;  %v1505_v2 = vrot.slane %v5265_v46, 5  ;;  %890 = vst.msk [vmem:[#allocation2 + $0x60] sm:$0xf] %vm865_vm5, %v5341_v35 }
  0xaf   : > { %1329 = vrot.lane.b32.xlu1 %v1178_v50, %s4859_s12  ;;  %v1212_v50 = vsel %vm5138_vm2, %v1207_v21, %v1211_v5  ;;  %v1271_v21 = vshll.u32 %v5401_v42, 16  ;;  %v1275_v5 = vshrl.u32 %v5401_v42, 16  ;;  %v1236_v12 = vsel %vm5138_vm2, %v1231_v41, %v1235_v52  ;;  %891 = vst.msk [vmem:[#allocation2 + $0x64] sm:$0xf] %vm865_vm5, %v5324_v6 }
  0xb0   : > { %1327 = vrot.lane.b32.xlu0 %v1164_v0, %s4859_s12  ;;  %v1214_v0 = vshrl.u32 %v5398_v29, 16  ;;  %v1470_v41 = vrot.slane %v5133_v30, 5  ;;  %v1484_v30 = vrot.slane %v5201_v26, 5  ;;  %v1488_v26 = vrot.slane %v5130_v27, 5  ;;  %892 = vst.msk [vmem:[#allocation2 + $0x68] sm:$0xf] %vm865_vm5, %v5398_v29 }
  0xb1   : > { %v1273_v42 = vrot.slane %v1271_v21, 5  ;;  %v1277_v3 = vrot.slane %v1275_v5, 4  ;;  %v1283_v21 = vrot.slane %v1281_v45, 5  ;;  %v5441_v5 = vld [vmem:[%s5104_s11 + $0xb0] sm:$0x1]  ;;  %v4404_v27 = vrot.slane %v5224_v53, 9 }
  0xb2   : > { %v1216_v24 = vrot.slane %v1214_v0, 4  ;;  %v1268_v0 = vor.u32 %v1267_v13, %v1264_v31  ;;  %v1495_v45 = vrot.slane %v5165_v57, 5  ;;  %v1502_v53 = vrot.slane %v5190_v15, 5  ;;  %893 = vst.msk [vmem:[#allocation2 + $0x6c] sm:$0xf] %vm865_vm5, %v5372_v40 }
  0xb3   : > { %1325 = vrot.lane.b32.xlu2 %v1154_v43, %s4859_s12  ;;  %v1278_v63 = vor.u32 %v1277_v3, %v1273_v42  ;;  %v4403_v15 = vrot.slane %v5145_v38, 9  ;;  %895 = vst.msk [vmem:[#allocation2 + $0x74] sm:$0xf] %vm865_vm5, %v5388_v22 }
  0xb4   : > { %v1220_v43 = vor.u32 %v1219_v49, %v1216_v24  ;;  %v1255_v24 = vrot.slane %v1254_v18, 4  ;;  %v1496_v57 = vsel %vm5456_vm6, %v4404_v27, %v1495_v45  ;;  %v7342_v18 = vld [vmem:[#allocation19_spill] sm:$0xff] }
  0xb5   : > { %v1279_v44 = vrot.slane %v1278_v63, 4  ;;  %v1477_v63 = vrot.slane %v5127_v23, 5  ;;  %v1489_v38 = vsel %vm5456_vm6, %v4403_v15, %v1488_v26  ;;  %896 = vst.msk [vmem:[#allocation2 + $0x78] sm:$0xf] %vm865_vm5, %v7342_v18 }
  0xb6   : > { %v1221_v1 = vrot.slane %v1220_v43, 4  ;;  %v1481_v43 = vrot.slane %v5173_v61, 5 }
  0xb7   : > { %1335 = vrot.lane.b32.xlu1 %v1212_v50, %s4859_s12  ;;  %v1188_v50 = vsel %vm5138_vm2, %v1183_v56, %v1187_v20  ;;  %v1257_v56 = vshll.u32 %v5441_v5, 16  ;;  %v1284_v13 = vsel %vm5138_vm2, %v1279_v44, %v1283_v21  ;;  %v1467_v20 = vrot.slane %v5119_v14, 5 }
  0xb8   : > { %1333 = vrot.lane.b32.xlu0 %v1202_v25, %s4859_s12  ;;  %v1250_v25 = vsel %vm5138_vm2, %v1245_v16, %v1249_v55  ;;  %v1269_v16 = vrot.slane %v1268_v0, 4  ;;  %v1226_v28 = vsel %vm5138_vm2, %v1221_v1, %v1225_v34  ;;  %v4401_v55 = vrot.slane %v5107_v8, 9 }
  0xb9   : > { %v1259_v49 = vrot.slane %v1257_v56, 5  ;;  %v1474_v34 = vrot.slane %v5110_v9, 5  ;;  %v4400_v14 = vrot.slane %v5113_v10, 9  ;;  %v1483_v9 = vrot.slane %v1481_v43, 4 }
  0xba   : > { %v1274_v31 = vsel %vm5138_vm2, %v1269_v16, %v1273_v42  ;;  %v1469_v42 = vrot.slane %v1467_v20, 4  ;;  %v1482_v58 = vsel %vm5456_vm6, %v4402_v47, %v1481_v43  ;;  %v1491_v0 = vrot.slane %v5158_v51, 5  ;;  %v7341_v16 = vld [vmem:[#allocation15_spill] sm:$0xff] }
  0xbb   : > { %1331 = vrot.lane.b32.xlu2 %v1188_v50, %s4859_s12  ;;  %v1260_v52 = vsel %vm5138_vm2, %v1255_v24, %v1259_v49  ;;  %v1475_v50 = vsel %vm5456_vm6, %v4401_v55, %v1474_v34  ;;  %v1468_v10 = vsel %vm5456_vm6, %v4400_v14, %v1467_v20  ;;  %v1485_v61 = vsel %vm5456_vm6, %v1483_v9, %v1484_v30  ;;  %v7344_v20 = vld [vmem:[#allocation18_spill] sm:$0xff]  ;;  %v7346_v9 = vld [vmem:[#allocation12_spill] sm:$0xff] }
  0xbc   : > { %v1471_v8 = vsel %vm5456_vm6, %v1469_v42, %v1470_v41  ;;  %v1504_v1 = vrot.slane %v1502_v53, 4  ;;  %v4405_v21 = vrot.slane %v5162_v54, 9  ;;  %894 = vst.msk [vmem:[#allocation2 + $0x70] sm:$0xf] %vm865_vm5, %v7341_v16  ;;  %v1497_v56 = vrot.slane %v1495_v45, 4  ;;  %v7345_v42 = vld [vmem:[#allocation9_spill] sm:$0xff] }
  0xbd   : > { %897 = vst.msk [vmem:[#allocation2 + $0x7c] sm:$0xf] %vm865_vm5, %v7344_v20  ;;  %v1516_v24 = vrot.slane %v5240_v7, 5  ;;  %v1512_v41 = vrot.slane %v7345_v42, 5  ;;  %v1523_v7 = vrot.slane %v5256_v39, 5  ;;  %v1526_v30 = vrot.slane %v7346_v9, 5 }
  0xbe   : > { %v1506_v46 = vsel %vm5456_vm6, %v1504_v1, %v1505_v2  ;;  %v1503_v54 = vsel %vm5456_vm6, %v4405_v21, %v1502_v53  ;;  %v4410_v45 = vrot.slane %v5331_v17, 9  ;;  %v7348_v53 = vld [vmem:[#allocation11_spill] sm:$0xff]  ;;  %v4409_v2 = vrot.slane %v5274_v59, 9  ;;  %v7349_v21 = vld [vmem:[#allocation16_spill] sm:$0xff] }
  0xbf   : > { %1341 = vrot.lane.b32.xlu1 %v1250_v25, %s4859_s12  ;;  %v1476_v25 = vrot.slane %v1474_v34, 4  ;;  %v1525_v14 = vrot.slane %v1523_v7, 4 }
  0xc0   : > { %1339 = vrot.lane.b32.xlu0 %v1236_v12, %s4859_s12  ;;  %v1490_v12 = vrot.slane %v1488_v26, 4 }
  0xc1   : > { %v1478_v23 = vsel %vm5456_vm6, %v1476_v25, %v1477_v63  ;;  %v1530_v25 = vrot.slane %v5268_v48, 5  ;;  %v7347_v63 = vld [vmem:[#allocation10_spill] sm:$0xff] }
  0xc2   : > { %v1492_v51 = vsel %vm5456_vm6, %v1490_v12, %v1491_v0  ;;  %v1519_v27 = vrot.slane %v7347_v63, 5  ;;  %v1537_v12 = vrot.slane %v5304_v37, 5  ;;  %v1544_v37 = vrot.slane %v5321_v4, 5 }
  0xc3   : > { %1337 = vrot.lane.b32.xlu2 %v1226_v28, %s4859_s12  ;;  %v1509_v28 = vrot.slane %v5187_v11, 5  ;;  %v4407_v11 = vrot.slane %v5277_v60, 9 }
  0xc4   : > { %v1538_v17 = vsel %vm5456_vm6, %v4410_v45, %v1537_v12 }
  0xc5   : > { %v1511_v34 = vrot.slane %v1509_v28, 4  ;;  %v1517_v60 = vsel %vm5456_vm6, %v4407_v11, %v1516_v24  ;;  %v7350_v11 = vld [vmem:[#allocation13_spill] sm:$0xff] }
  0xc7   : > { %1347 = vrot.lane.b32.xlu1 %v1284_v13, %s4859_s12  ;;  %v7343_v13 = vld [vmem:[#allocation8_spill] sm:$0xff]  ;;  %v1513_v43 = vsel %vm5456_vm6, %v1511_v34, %v1512_v41 }
  0xc8   : > { %1345 = vrot.lane.b32.xlu0 %v1274_v31, %s4859_s12  ;;  %v1498_v31 = vrot.slane %v7343_v13, 5 }
  0xcb   : > { %1343 = vrot.lane.b32.xlu2 %v1260_v52, %s4859_s12  ;;  %s4399_s12 = sshll.u32 %s5101_s9, 9 }
  0xcf   : > { %1581 = vrot.lane.b32.xlu1 %v1475_v50, %s4860_s13  ;;  %v1499_v50 = vsel %vm5456_vm6, %v1497_v56, %v1498_v31  ;;  %v1531_v56 = vsel %vm5456_vm6, %v4409_v2, %v1530_v25  ;;  %v1551_v31 = vrot.slane %v5324_v6, 5 }
  0xd0   : > { %1579 = vrot.lane.b32.xlu0 %v1471_v8, %s4860_s13  ;;  %v4406_v8 = vrot.slane %v5205_v32, 9  ;;  %v1527_v32 = vsel %vm5456_vm6, %v1525_v14, %v1526_v30  ;;  %v1568_v14 = vrot.slane %v5441_v5, 5 }
  0xd1   : > { %v1553_v41 = vrot.slane %v1551_v31, 4 }
  0xd3   : > { %1577 = vrot.lane.b32.xlu2 %v1468_v10, %s4860_s13 }
  0xd7   : > { %1587 = vrot.lane.b32.xlu1 %v1485_v61, %s4860_s13  ;;  %v4408_v61 = vrot.slane %v5232_v62, 9  ;;  %v1518_v62 = vrot.slane %v1516_v24, 4  ;;  %v1540_v24 = vrot.slane %v7350_v11, 5 }
  0xd8   : > { %1585 = vrot.lane.b32.xlu0 %v1482_v58, %s4860_s13  ;;  %v1510_v58 = vsel %vm5456_vm6, %v4406_v8, %v1509_v28  ;;  %v4411_v28 = vrot.slane %v5301_v36, 9  ;;  %v1539_v36 = vrot.slane %v1537_v12, 4 }
  0xd9   : > { %v1524_v26 = vsel %vm5456_vm6, %v4408_v61, %v1523_v7  ;;  %v1520_v15 = vsel %vm5456_vm6, %v1518_v62, %v1519_v27  ;;  %v1572_v61 = vrot.slane %v7344_v20, 5  ;;  %v1575_v62 = vrot.slane %v5427_v19, 5  ;;  %v5683_v27 = vld [vmem:[%s5104_s11 + $0xc0] sm:$0xf] }
  0xda   : > { %v1545_v13 = vsel %vm5456_vm6, %v4411_v28, %v1544_v37  ;;  %v4415_v19 = vrot.slane %v7342_v18, 9  ;;  %v5701_v18 = vld [vmem:[%s5104_s11 + $0xcc] sm:$0xf] }
  0xdb   : > { %1583 = vrot.lane.b32.xlu2 %v1478_v23, %s4860_s13 }
  0xdd   : > { %v1294_v44 = vpop.permute.xlu2 %1293 }
  0xde   : > { %1386 = vst.msk [vmem:[#allocation2 + $0x10] sm:$0xf] %vm1381_vm7, %v1294_v44  ;;  %v1546_v44 = vrot.slane %v1544_v37, 4  ;;  %v5715_v37 = vld [vmem:[%s5104_s11 + $0xe4] sm:$0xf] }
  0xdf   : > { %1593 = vrot.lane.b32.xlu1 %v1496_v57, %s4860_s13  ;;  %v1532_v57 = vrot.slane %v1530_v25, 4  ;;  %v1574_v25 = vrot.slane %v1572_v61, 4 }
  0xe0   : > { %1591 = vrot.lane.b32.xlu0 %v1492_v51, %s4860_s13  ;;  %v1533_v51 = vrot.slane %v7348_v53, 5  ;;  %v5698_v53 = vld [vmem:[%s5104_s11 + $0xd0] sm:$0xf] }
  0xe1   : > { %v1576_v45 = vsel %vm5456_vm6, %v1574_v25, %v1575_v62  ;;  %v1917_v25 = vshrl.u32 %v5683_v27, 16  ;;  %v1920_v62 = vshll.u32 %v5683_v27, 16 }
  0xe2   : > { %v1534_v1 = vsel %vm5456_vm6, %v1532_v57, %v1533_v51  ;;  %v1573_v57 = vsel %vm5456_vm6, %v4415_v19, %v1572_v61 }
  0xe3   : > { %1589 = vrot.lane.b32.xlu2 %v1489_v38, %s4860_s13  ;;  %v1547_v38 = vrot.slane %v7349_v21, 5 }
  0xe5   : > { %v1296_v49 = vpop.permute.xlu2 %1295  ;;  %v1548_v59 = vsel %vm5456_vm6, %v1546_v44, %v1547_v38  ;;  %v5730_v38 = vld [vmem:[%s5104_s11 + $0xd8] sm:$0xf] }
  0xe6   : > { %1387 = vst.msk [vmem:[#allocation2 + $0x14] sm:$0xf] %vm1381_vm7, %v1296_v49  ;;  %v4413_v49 = vrot.slane %v5398_v29, 9 }
  0xe7   : > { %1599 = vrot.lane.b32.xlu1 %v1506_v46, %s4860_s13 }
  0xe8   : > { %1597 = vrot.lane.b32.xlu0 %v1503_v54, %s4860_s13 }
  0xe9   : > { %v1290_v55 = vpop.permute.xlu1 %1289 }
  0xea   : > { %1384 = vst.msk [vmem:[#allocation2 + $0x8] sm:$0xf] %vm1381_vm7, %v1290_v55  ;;  %v1286_v52 = vpop.permute.xlu0 %1285  ;;  %v1558_v55 = vrot.slane %v5372_v40, 5  ;;  %v1565_v40 = vrot.slane %v5388_v22, 5 }
  0xeb   : > { %1382 = vst.msk [vmem:[#allocation2] sm:$0xf] %vm1381_vm7, %v1286_v52  ;;  %1595 = vrot.lane.b32.xlu2 %v1499_v50, %s4860_s13  ;;  %v7351_v52 = vld [vmem:[#allocation14_spill] sm:$0xff] }
  0xec   : > { %v1554_v50 = vrot.slane %v7351_v52, 5  ;;  %v1559_v29 = vsel %vm5456_vm6, %v4413_v49, %v1558_v55  ;;  %v1567_v8 = vrot.slane %v1565_v40, 4  ;;  %v5766_v49 = vld [vmem:[%s5104_s11 + $0xfc] sm:$0xf] }
  0xed   : > { %v1302_v47 = vpop.permute.xlu2 %1301 }
  0xee   : > { %1390 = vst.msk [vmem:[#allocation2 + $0x20] sm:$0xf] %vm1381_vm7, %v1302_v47  ;;  %v1555_v7 = vsel %vm5456_vm6, %v1553_v41, %v1554_v50  ;;  %v4414_v47 = vrot.slane %v7341_v16, 9  ;;  %v1560_v16 = vrot.slane %v1558_v55, 4  ;;  %v5769_v55 = vld [vmem:[%s5104_s11 + $0x118] sm:$0xf] }
  0xef   : > { %1605 = vrot.lane.b32.xlu1 %v1517_v60, %s4860_s13  ;;  %v1541_v60 = vsel %vm5456_vm6, %v1539_v36, %v1540_v24  ;;  %v5784_v50 = vld [vmem:[%s5104_s11 + $0x10c] sm:$0xf] }
  0xf0   : > { %1603 = vrot.lane.b32.xlu0 %v1513_v43, %s4860_s13  ;;  %v4412_v43 = vrot.slane %v5341_v35, 9  ;;  %v1569_v35 = vsel %vm5456_vm6, %v1567_v8, %v1568_v14  ;;  %v1566_v5 = vsel %vm5456_vm6, %v4414_v47, %v1565_v40  ;;  %7353 = vst [vmem:[#allocation15_spill] sm:$0xff] %v5784_v50  ;;  %v5805_v8 = vld [vmem:[%s5104_s11 + $0x13c] sm:$0xf]  ;;  %v5808_v14 = vld [vmem:[%s5104_s11 + $0x138] sm:$0xf] }
  0xf1   : > { %v1292_v10 = vpop.permute.xlu1 %1291 }
  0xf2   : > { %1385 = vst.msk [vmem:[#allocation2 + $0xc] sm:$0xf] %vm1381_vm7, %v1292_v10  ;;  %v1288_v39 = vpop.permute.xlu0 %1287  ;;  %v1552_v10 = vsel %vm5456_vm6, %v4412_v43, %v1551_v31  ;;  %v5754_v31 = vld [vmem:[%s5104_s11 + $0x100] sm:$0xf] }
  0xf3   : > { %1383 = vst.msk [vmem:[#allocation2 + $0x4] sm:$0xf] %vm1381_vm7, %v1288_v39  ;;  %1601 = vrot.lane.b32.xlu2 %v1510_v58, %s4860_s13  ;;  %v7352_v39 = vld [vmem:[#allocation17_spill] sm:$0xff]  ;;  %v5802_v43 = vld [vmem:[%s5104_s11 + $0x120] sm:$0xf] }
  0xf4   : > { %v1561_v58 = vrot.slane %v7352_v39, 5  ;;  %v5838_v39 = vld [vmem:[%s5104_s11 + $0x144] sm:$0xf] }
  0xf5   : > { %v1308_v0 = vpop.permute.xlu2 %1307 }
  0xf6   : > { %1393 = vst.msk [vmem:[#allocation2 + $0x2c] sm:$0xf] %vm1381_vm7, %v1308_v0  ;;  %v1562_v20 = vsel %vm5456_vm6, %v1560_v16, %v1561_v58 }
  0xf7   : > { %1611 = vrot.lane.b32.xlu1 %v1527_v32, %s4860_s13 }
  0xf8   : > { %1609 = vrot.lane.b32.xlu0 %v1524_v26, %s4860_s13 }
  0xf9   : > { %v1300_v23 = vpop.permute.xlu1 %1299 }
  0xfa   : > { %1389 = vst.msk [vmem:[#allocation2 + $0x1c] sm:$0xf] %vm1381_vm7, %v1300_v23  ;;  %v1298_v48 = vpop.permute.xlu0 %1297 }
  0xfb   : > { %1388 = vst.msk [vmem:[#allocation2 + $0x18] sm:$0xf] %vm1381_vm7, %v1298_v48  ;;  %1607 = vrot.lane.b32.xlu2 %v1520_v15, %s4860_s13 }
  0xfd   : > { %v1314_v46 = vpop.permute.xlu2 %1313 }
  0xfe   : > { %1396 = vst.msk [vmem:[#allocation2 + $0x38] sm:$0xf] %vm1381_vm7, %v1314_v46  ;;  %v5733_v46 = vld [vmem:[%s5104_s11 + $0xf4] sm:$0xf] }
  0xff   : > { %1617 = vrot.lane.b32.xlu1 %v1538_v17, %s4860_s13  ;;  %v5712_v17 = vld [vmem:[%s5104_s11 + $0xc4] sm:$0xf] }
 0x100   : > { %1615 = vrot.lane.b32.xlu0 %v1534_v1, %s4860_s13  ;;  %v5718_v1 = vld [vmem:[%s5104_s11 + $0xdc] sm:$0xf]  ;;  %v1926_v58 = vshll.u32 %v5712_v17, 16 }
 0x101   : > { %v1306_v54 = vpop.permute.xlu1 %1305 }
 0x102   : > { %1392 = vst.msk [vmem:[#allocation2 + $0x28] sm:$0xf] %vm1381_vm7, %v1306_v54  ;;  %v1304_v4 = vpop.permute.xlu0 %1303  ;;  %v5736_v54 = vld [vmem:[%s5104_s11 + $0xf0] sm:$0xf] }
 0x103   : > { %1391 = vst.msk [vmem:[#allocation2 + $0x24] sm:$0xf] %vm1381_vm7, %v1304_v4  ;;  %1613 = vrot.lane.b32.xlu2 %v1531_v56, %s4860_s13 }
 0x105   : > { %v1320_v34 = vpop.permute.xlu2 %1319 }
 0x106   : > { %1399 = vst.msk [vmem:[#allocation2 + $0x44] sm:$0xf] %vm1381_vm7, %v1320_v34  ;;  %v5772_v34 = vld [vmem:[%s5104_s11 + $0x114] sm:$0xf] }
 0x107   : > { %1623 = vrot.lane.b32.xlu1 %v1548_v59, %s4860_s13  ;;  %v5748_v59 = vld [vmem:[%s5104_s11 + $0xe8] sm:$0xf] }
 0x108   : > { %1621 = vrot.lane.b32.xlu0 %v1545_v13, %s4860_s13  ;;  %v5751_v13 = vld [vmem:[%s5104_s11 + $0x108] sm:$0xf] }
 0x109   : > { %v1312_v42 = vpop.permute.xlu1 %1311 }
 0x10a   : > { %1395 = vst.msk [vmem:[#allocation2 + $0x34] sm:$0xf] %vm1381_vm7, %v1312_v42  ;;  %v1310_v6 = vpop.permute.xlu0 %1309 }
 0x10b   : > { %1394 = vst.msk [vmem:[#allocation2 + $0x30] sm:$0xf] %vm1381_vm7, %v1310_v6  ;;  %1619 = vrot.lane.b32.xlu2 %v1541_v60, %s4860_s13  ;;  %v5787_v6 = vld [vmem:[%s5104_s11 + $0x12c] sm:$0xf]  ;;  %v5790_v60 = vld [vmem:[%s5104_s11 + $0x124] sm:$0xf] }
 0x10d   : > { %v1326_v9 = vpop.permute.xlu2 %1325 }
 0x10e   : > { %1402 = vst.msk [vmem:[#allocation2 + $0x50] sm:$0xf] %vm1381_vm7, %v1326_v9 }
 0x10f   : > { %1629 = vrot.lane.b32.xlu1 %v1559_v29, %s4860_s13 }
 0x110   : > { %1627 = vrot.lane.b32.xlu0 %v1555_v7, %s4860_s13 }
 0x111   : > { %v1318_v30 = vpop.permute.xlu1 %1317 }
 0x112   : > { %1398 = vst.msk [vmem:[#allocation2 + $0x40] sm:$0xf] %vm1381_vm7, %v1318_v30  ;;  %v1316_v22 = vpop.permute.xlu0 %1315 }
 0x113   : > { %1397 = vst.msk [vmem:[#allocation2 + $0x3c] sm:$0xf] %vm1381_vm7, %v1316_v22  ;;  %1625 = vrot.lane.b32.xlu2 %v1552_v10, %s4860_s13  ;;  %v5820_v22 = vld [vmem:[%s5104_s11 + $0x130] sm:$0xf] }
 0x114   : > { %7354 = vst [vmem:[#allocation19_spill] sm:$0xff] %v5820_v22  ;;  %v5823_v10 = vld [vmem:[%s5104_s11 + $0x150] sm:$0xf] }
 0x115   : > { %v1332_v32 = vpop.permute.xlu2 %1331 }
 0x116   : > { %1405 = vst.msk [vmem:[#allocation2 + $0x5c] sm:$0xf] %vm1381_vm7, %v1332_v32  ;;  %v1930_v32 = vshrl.u32 %v5712_v17, 16 }
 0x117   : > { %1635 = vrot.lane.b32.xlu1 %v1569_v35, %s4860_s13  ;;  %v5826_v35 = vld [vmem:[%s5104_s11 + $0x148] sm:$0xf] }
 0x118   : > { %1633 = vrot.lane.b32.xlu0 %v1566_v5, %s4860_s13 }
 0x119   : > { %v1324_v26 = vpop.permute.xlu1 %1323 }
 0x11a   : > { %1401 = vst.msk [vmem:[#allocation2 + $0x4c] sm:$0xf] %vm1381_vm7, %v1324_v26  ;;  %v1322_v63 = vpop.permute.xlu0 %1321  ;;  %v5843_v26 = vld [vmem:[%s5104_s11 + $0x160] sm:$0xf] }
 0x11b   : > { %1400 = vst.msk [vmem:[#allocation2 + $0x48] sm:$0xf] %vm1381_vm7, %v1322_v63  ;;  %1631 = vrot.lane.b32.xlu2 %v1562_v20, %s4860_s13  ;;  %v5848_v63 = vld [vmem:[%s5104_s11 + $0x15c] sm:$0xf]  ;;  %v1928_v20 = vrot.slane %v1926_v58, 5  ;;  %v1992_v58 = vshll.u32 %v5715_v37, 16 }
 0x11d   : > { %v1338_v12 = vpop.permute.xlu2 %1337 }
 0x11e   : > { %1408 = vst.msk [vmem:[#allocation2 + $0x68] sm:$0xf] %vm1381_vm7, %v1338_v12  ;;  %v1919_v12 = vrot.slane %v1917_v25, 4  ;;  %v5896_v25 = vld [vmem:[%s5104_s11 + $0x168] sm:$0xf] }
 0x11f   : > { %1787 = vrot.lane.b32.xlu1 %v5683_v27, %s4861_s14 }
 0x120   : > { %1639 = vrot.lane.b32.xlu0 %v1576_v45, %s4860_s13  ;;  %v1932_v45 = vrot.slane %v1930_v32, 4  ;;  %v1998_v32 = vshll.u32 %v5748_v59, 16 }
 0x121   : > { %v1330_v0 = vpop.permute.xlu1 %1329 }
 0x122   : > { %1404 = vst.msk [vmem:[#allocation2 + $0x58] sm:$0xf] %vm1381_vm7, %v1330_v0  ;;  %v1328_v23 = vpop.permute.xlu0 %1327  ;;  %v1922_v0 = vrot.slane %v1920_v62, 5  ;;  %v2002_v62 = vshrl.u32 %v5748_v59, 16 }
 0x123   : > { %1403 = vst.msk [vmem:[#allocation2 + $0x54] sm:$0xf] %vm1381_vm7, %v1328_v23  ;;  %1637 = vrot.lane.b32.xlu2 %v1573_v57, %s4860_s13  ;;  %v5858_v23 = vld [vmem:[%s5104_s11 + $0xc8] sm:$0x1] }
 0x125   : > { %v1344_v51 = vpop.permute.xlu2 %1343 }
 0x126   : > { %1411 = vst.msk [vmem:[#allocation2 + $0x74] sm:$0xf] %vm1381_vm7, %v1344_v51  ;;  %v5863_v51 = vld [vmem:[%s5104_s11 + $0x154] sm:$0xf] }
 0x127   : > { %1793 = vrot.lane.b32.xlu1 %v5698_v53, %s4861_s14 }
 0x128   : > { %1791 = vrot.lane.b32.xlu0 %v5701_v18, %s4861_s14 }
 0x129   : > { %v1336_v48 = vpop.permute.xlu1 %1335 }
 0x12a   : > { %1407 = vst.msk [vmem:[#allocation2 + $0x64] sm:$0xf] %vm1381_vm7, %v1336_v48  ;;  %v1334_v15 = vpop.permute.xlu0 %1333  ;;  %v1965_v48 = vshrl.u32 %v5730_v38, 16 }
 0x12b   : > { %1406 = vst.msk [vmem:[#allocation2 + $0x60] sm:$0xf] %vm1381_vm7, %v1334_v15  ;;  %1789 = vrot.lane.b32.xlu2 %v5712_v17, %s4861_s14  ;;  %v1968_v15 = vshll.u32 %v5730_v38, 16 }
 0x12d   : > { %v1578_v2 = vpop.permute.xlu2 %1577 }
 0x12e   : > { %1674 = vst.msk [vmem:[#allocation2] sm:$0xf] %vm1673_vm8, %v1578_v2  ;;  %v5868_v2 = vld [vmem:[%s5104_s11 + $0x174] sm:$0xf] }
 0x12f   : > { %1799 = vrot.lane.b32.xlu1 %v5715_v37, %s4861_s14 }
 0x130   : > { %1797 = vrot.lane.b32.xlu0 %v5718_v1, %s4861_s14 }
 0x131   : > { %v1342_v44 = vpop.permute.xlu1 %1341 }
 0x132   : > { %1410 = vst.msk [vmem:[#allocation2 + $0x70] sm:$0xf] %vm1381_vm7, %v1342_v44  ;;  %v1340_v21 = vpop.permute.xlu0 %1339  ;;  %v1933_v44 = vor.u32 %v1932_v45, %v1928_v20 }
 0x133   : > { %1409 = vst.msk [vmem:[#allocation2 + $0x6c] sm:$0xf] %vm1381_vm7, %v1340_v21  ;;  %1795 = vrot.lane.b32.xlu2 %v5730_v38, %s4861_s14  ;;  %v1936_v21 = vshll.u32 %v5858_v23, 16 }
 0x135   : > { %v1584_v28 = vpop.permute.xlu2 %1583 }
 0x136   : > { %1677 = vst.msk [vmem:[#allocation2 + $0xc] sm:$0xf] %vm1673_vm8, %v1584_v28  ;;  %v1950_v28 = vshll.u32 %v5698_v53, 16 }
 0x137   : > { %1805 = vrot.lane.b32.xlu1 %v5733_v46, %s4861_s14 }
 0x138   : > { %1803 = vrot.lane.b32.xlu0 %v5736_v54, %s4861_s14 }
 0x139   : > { %v1348_v4 = vpop.permute.xlu1 %1347 }
 0x13a   : > { %1413 = vst.msk [vmem:[#allocation2 + $0x7c] sm:$0xf] %vm1381_vm7, %v1348_v4  ;;  %v1346_v56 = vpop.permute.xlu0 %1345  ;;  %v1954_v4 = vshrl.u32 %v5698_v53, 16 }
 0x13b   : > { %1412 = vst.msk [vmem:[#allocation2 + $0x78] sm:$0xf] %vm1381_vm7, %v1346_v56  ;;  %1801 = vrot.lane.b32.xlu2 %v5748_v59, %s4861_s14  ;;  %v5874_v56 = vld [vmem:[%s5104_s11 + $0x16c] sm:$0xf] }
 0x13d   : > { %v1590_v36 = vpop.permute.xlu2 %1589 }
 0x13e   : > { %1680 = vst.msk [vmem:[#allocation2 + $0x18] sm:$0xf] %vm1673_vm8, %v1590_v36  ;;  %v1923_v36 = vor.u32 %v1922_v0, %v1919_v12  ;;  %v1974_v12 = vshll.u32 %v5718_v1, 16 }
 0x13f   : > { %1811 = vrot.lane.b32.xlu1 %v5751_v13, %s4861_s14 }
 0x140   : > { %1809 = vrot.lane.b32.xlu0 %v5754_v31, %s4861_s14 }
 0x141   : > { %v1582_v11 = vpop.permute.xlu1 %1581 }
 0x142   : > { %1676 = vst.msk [vmem:[#allocation2 + $0x8] sm:$0xf] %vm1673_vm8, %v1582_v11  ;;  %v1580_v24 = vpop.permute.xlu0 %1579  ;;  %v1967_v11 = vrot.slane %v1965_v48, 4 }
 0x143   : > { %1675 = vst.msk [vmem:[#allocation2 + $0x4] sm:$0xf] %vm1673_vm8, %v1580_v24  ;;  %1807 = vrot.lane.b32.xlu2 %v5766_v49, %s4861_s14  ;;  %v1970_v24 = vrot.slane %v1968_v15, 5 }
 0x145   : > { %v1596_v42 = vpop.permute.xlu2 %1595 }
 0x146   : > { %1683 = vst.msk [vmem:[#allocation2 + $0x24] sm:$0xf] %vm1673_vm8, %v1596_v42  ;;  %v1934_v42 = vrot.slane %v1933_v44, 4  ;;  %v1994_v44 = vrot.slane %v1992_v58, 5 }
 0x147   : > { %1817 = vrot.lane.b32.xlu1 %v5769_v55, %s4861_s14 }
 0x148   : > { %1815 = vrot.lane.b32.xlu0 %v5772_v34, %s4861_s14 }
 0x149   : > { %v1588_v41 = vpop.permute.xlu1 %1587 }
 0x14a   : > { %1679 = vst.msk [vmem:[#allocation2 + $0x14] sm:$0xf] %vm1673_vm8, %v1588_v41  ;;  %v1586_v52 = vpop.permute.xlu0 %1585  ;;  %v1938_v41 = vrot.slane %v1936_v21, 5  ;;  %v5909_v21 = vrot.slane %v1998_v32, 5 }
 0x14b   : > { %1678 = vst.msk [vmem:[#allocation2 + $0x10] sm:$0xf] %vm1673_vm8, %v1586_v52  ;;  %1813 = vrot.lane.b32.xlu2 %v5784_v50, %s4861_s14 }
 0x14c   : > { %v1939_v45 = vsel %vm5138_vm2, %v1934_v42, %v1938_v41  ;;  %v5916_v41 = vld [vmem:[%s5104_s11 + $0xec] sm:$0x1] }
 0x14d   : > { %v1602_v29 = vpop.permute.xlu2 %1601  ;;  %v2008_v32 = vshll.u32 %v5916_v41, 16 }
 0x14e   : > { %1686 = vst.msk [vmem:[#allocation2 + $0x30] sm:$0xf] %vm1673_vm8, %v1602_v29  ;;  %v5882_v29 = vrot.slane %v1950_v28, 5  ;;  %v2004_v28 = vrot.slane %v2002_v62, 4  ;;  %v2026_v62 = vshrl.u32 %v5733_v46, 16 }
 0x14f   : > { %1823 = vrot.lane.b32.xlu1 %v5787_v6, %s4861_s14 }
 0x150   : > { %1821 = vrot.lane.b32.xlu0 %v5790_v60, %s4861_s14  ;;  %v2005_v58 = vor.u32 %v2004_v28, %v5909_v21  ;;  %v2010_v28 = vrot.slane %v2008_v32, 5  ;;  %v2074_v32 = vshrl.u32 %v5784_v50, 16 }
 0x151   : > { %v1594_v40 = vpop.permute.xlu1 %1593 }
 0x152   : > { %1682 = vst.msk [vmem:[#allocation2 + $0x20] sm:$0xf] %vm1673_vm8, %v1594_v40  ;;  %v1592_v7 = vpop.permute.xlu0 %1591  ;;  %v1956_v40 = vrot.slane %v1954_v4, 4  ;;  %v5912_v4 = vrot.slane %v1974_v12, 5 }
 0x153   : > { %1681 = vst.msk [vmem:[#allocation2 + $0x1c] sm:$0xf] %vm1673_vm8, %v1592_v7  ;;  %1819 = vrot.lane.b32.xlu2 %v5802_v43, %s4861_s14  ;;  %v1941_v7 = vshrl.u32 %v5701_v18, 16 }
 0x155   : > { %v1608_v9 = vpop.permute.xlu2 %1607 }
 0x156   : > { %1689 = vst.msk [vmem:[#allocation2 + $0x3c] sm:$0xf] %vm1673_vm8, %v1608_v9 }
 0x157   : > { %1829 = vrot.lane.b32.xlu1 %v5805_v8, %s4861_s14 }
 0x158   : > { %1827 = vrot.lane.b32.xlu0 %v5808_v14, %s4861_s14 }
 0x159   : > { %v1600_v30 = vpop.permute.xlu1 %1599 }
 0x15a   : > { %1685 = vst.msk [vmem:[#allocation2 + $0x2c] sm:$0xf] %vm1673_vm8, %v1600_v30  ;;  %v1598_v47 = vpop.permute.xlu0 %1597  ;;  %v1924_v30 = vrot.slane %v1923_v36, 4 }
 0x15b   : > { %1684 = vst.msk [vmem:[#allocation2 + $0x28] sm:$0xf] %vm1673_vm8, %v1598_v47  ;;  %1825 = vrot.lane.b32.xlu2 %v5820_v22, %s4861_s14  ;;  %v1944_v47 = vshll.u32 %v5701_v18, 16 }
 0x15c   : > { %v1929_v0 = vsel %vm5138_vm2, %v1924_v30, %v1928_v20  ;;  %v5924_v30 = vld [vmem:[%s5104_s11 + $0x178] sm:$0xf] }
 0x15d   : > { %v1614_v5 = vpop.permute.xlu2 %1613  ;;  %v1946_v48 = vrot.slane %v1944_v47, 5 }
 0x15e   : > { %1692 = vst.msk [vmem:[#allocation2 + $0x48] sm:$0xf] %vm1673_vm8, %v1614_v5  ;;  %v1989_v5 = vshrl.u32 %v5715_v37, 16 }
 0x15f   : > { %1835 = vrot.lane.b32.xlu1 %v5823_v10, %s4861_s14 }
 0x160   : > { %1833 = vrot.lane.b32.xlu0 %v5826_v35, %s4861_s14  ;;  %v1991_v15 = vrot.slane %v1989_v5, 4  ;;  %v2040_v5 = vshll.u32 %v5766_v49, 16 }
 0x161   : > { %v1606_v61 = vpop.permute.xlu1 %1605 }
 0x162   : > { %1688 = vst.msk [vmem:[#allocation2 + $0x38] sm:$0xf] %vm1673_vm8, %v1606_v61  ;;  %v1604_v16 = vpop.permute.xlu0 %1603 }
 0x163   : > { %1687 = vst.msk [vmem:[#allocation2 + $0x34] sm:$0xf] %vm1673_vm8, %v1604_v16  ;;  %1831 = vrot.lane.b32.xlu2 %v5838_v39, %s4861_s14  ;;  %v5890_v16 = vld [vmem:[%s5104_s11 + $0xd4] sm:$0x1] }
 0x164   : > { %v1960_v37 = vshll.u32 %v5890_v16, 16 }
 0x165   : > { %v1620_v19 = vpop.permute.xlu2 %1619 }
 0x166   : > { %1695 = vst.msk [vmem:[#allocation2 + $0x54] sm:$0xf] %vm1673_vm8, %v1620_v19  ;;  %v1971_v19 = vor.u32 %v1970_v24, %v1967_v11  ;;  %v1962_v42 = vrot.slane %v1960_v37, 5 }
 0x167   : > { %1841 = vrot.lane.b32.xlu1 %v5843_v26, %s4861_s14 }
 0x168   : > { %1839 = vrot.lane.b32.xlu0 %v5848_v63, %s4861_s14  ;;  %v1972_v20 = vrot.slane %v1971_v19, 4  ;;  %v1995_v19 = vor.u32 %v1994_v44, %v1991_v15  ;;  %v2028_v15 = vrot.slane %v2026_v62, 4  ;;  %v2013_v44 = vshrl.u32 %v5736_v54, 16 }
 0x169   : > { %v1612_v27 = vpop.permute.xlu1 %1611 }
 0x16a   : > { %1691 = vst.msk [vmem:[#allocation2 + $0x44] sm:$0xf] %vm1673_vm8, %v1612_v27  ;;  %v1610_v57 = vpop.permute.xlu0 %1609  ;;  %v1957_v27 = vor.u32 %v1956_v40, %v5882_v29 }
 0x16b   : > { %1690 = vst.msk [vmem:[#allocation2 + $0x40] sm:$0xf] %vm1673_vm8, %v1610_v57  ;;  %1837 = vrot.lane.b32.xlu2 %v5863_v51, %s4861_s14  ;;  %v1943_v57 = vrot.slane %v1941_v7, 4  ;;  %v2022_v7 = vshll.u32 %v5733_v46, 16 }
 0x16c   : > { %v1958_v24 = vrot.slane %v1957_v27, 4 }
 0x16d   : > { %v1626_v52 = vpop.permute.xlu2 %1625  ;;  %v1947_v47 = vor.u32 %v1946_v48, %v1943_v57  ;;  %v2042_v57 = vrot.slane %v2040_v5, 5  ;;  %v2006_v48 = vrot.slane %v2005_v58, 4 }
 0x16e   : > { %1698 = vst.msk [vmem:[#allocation2 + $0x60] sm:$0xf] %vm1673_vm8, %v1626_v52  ;;  %v1978_v52 = vshrl.u32 %v5718_v1, 16 }
 0x16f   : > { %1847 = vrot.lane.b32.xlu1 %v5868_v2, %s4861_s14  ;;  %v1948_v27 = vrot.slane %v1947_v47, 4  ;;  %v2070_v47 = vshll.u32 %v5784_v50, 16 }
 0x170   : > { %1845 = vrot.lane.b32.xlu0 %v5874_v56, %s4861_s14  ;;  %v1980_v12 = vrot.slane %v1978_v52, 4  ;;  %v2061_v52 = vshrl.u32 %v5751_v13, 16 }
 0x171   : > { %v1618_v9 = vpop.permute.xlu1 %1617  ;;  %v1953_v5 = vsel %vm5138_vm2, %v1948_v27, %v5882_v29 }
 0x172   : > { %1694 = vst.msk [vmem:[#allocation2 + $0x50] sm:$0xf] %vm1673_vm8, %v1618_v9  ;;  %v1616_v61 = vpop.permute.xlu0 %1615  ;;  %v2037_v9 = vshrl.u32 %v5766_v49, 16 }
 0x173   : > { %1693 = vst.msk [vmem:[#allocation2 + $0x4c] sm:$0xf] %vm1673_vm8, %v1616_v61  ;;  %1843 = vrot.lane.b32.xlu2 %v5896_v25, %s4861_s14  ;;  %v1977_v61 = vsel %vm5138_vm2, %v1972_v20, %v5912_v4 }
 0x174   : > { %v2039_v37 = vrot.slane %v2037_v9, 4  ;;  %v5951_v9 = vld [vmem:[%s5104_s11 + $0xf8] sm:$0x1] }
 0x175   : > { %v1632_v36 = vpop.permute.xlu2 %1631  ;;  %7355 = vst [vmem:[#allocation8_spill] sm:$0xff] %v5951_v9  ;;  %v2032_v29 = vshll.u32 %v5951_v9, 16 }
 0x176   : > { %1701 = vst.msk [vmem:[#allocation2 + $0x6c] sm:$0xf] %vm1673_vm8, %v1632_v36  ;;  %v5942_v36 = vld [vmem:[%s5104_s11 + $0xe0] sm:$0x1]  ;;  %v2043_v62 = vor.u32 %v2042_v57, %v2039_v37  ;;  %v2050_v37 = vshrl.u32 %v5754_v31, 16  ;;  %v2094_v57 = vshll.u32 %v5769_v55, 16 }
 0x177   : > { %2302 = vrot.lane.b32.xlu1 %v1939_v45, %s4862_s15  ;;  %v1963_v45 = vsel %vm5138_vm2, %v1958_v24, %v1962_v42  ;;  %v1996_v42 = vrot.slane %v1995_v19, 4  ;;  %v1984_v58 = vshll.u32 %v5942_v36, 16  ;;  %v2015_v19 = vrot.slane %v2013_v44, 4 }
 0x178   : > { %2300 = vrot.lane.b32.xlu0 %v1929_v0, %s4862_s15  ;;  %v5937_v0 = vrot.slane %v2022_v7, 5  ;;  %v2044_v44 = vrot.slane %v2043_v62, 4  ;;  %v2109_v62 = vshrl.u32 %v5802_v43, 16 }
 0x179   : > { %v1624_v11 = vpop.permute.xlu1 %1623 }
 0x17a   : > { %1697 = vst.msk [vmem:[#allocation2 + $0x5c] sm:$0xf] %vm1673_vm8, %v1624_v11  ;;  %v1622_v40 = vpop.permute.xlu0 %1621  ;;  %v2016_v11 = vshll.u32 %v5736_v54, 16 }
 0x17b   : > { %1696 = vst.msk [vmem:[#allocation2 + $0x58] sm:$0xf] %vm1673_vm8, %v1622_v40  ;;  %1849 = vrot.lane.b32.xlu2 %v5924_v30, %s4861_s14  ;;  %v2064_v40 = vshll.u32 %v5751_v13, 16  ;;  %v2011_v13 = vsel %vm5138_vm2, %v2006_v48, %v2010_v28  ;;  %v1986_v28 = vrot.slane %v1984_v58, 5 }
 0x17d   : > { %v1638_v20 = vpop.permute.xlu2 %1637  ;;  %v2066_v27 = vrot.slane %v2064_v40, 5 }
 0x17e   : > { %1704 = vst.msk [vmem:[#allocation2 + $0x78] sm:$0xf] %vm1673_vm8, %v1638_v20  ;;  %v2001_v20 = vsel %vm5138_vm2, %v1996_v42, %v5909_v21  ;;  %v5973_v21 = vrot.slane %v2070_v47, 5  ;;  %v2205_v47 = vshrl.u32 %v5823_v10, 16 }
 0x17f   : > { %2308 = vrot.lane.b32.xlu1 %v1977_v61, %s4862_s15  ;;  %v1981_v61 = vor.u32 %v1980_v12, %v5912_v4  ;;  %v2018_v4 = vrot.slane %v2016_v11, 5  ;;  %v2063_v12 = vrot.slane %v2061_v52, 4 }
 0x180   : > { %2306 = vrot.lane.b32.xlu0 %v1963_v45, %s4862_s15  ;;  %v2046_v45 = vshll.u32 %v5754_v31, 16 }
 0x181   : > { %v1630_v24 = vpop.permute.xlu1 %1629  ;;  %v1982_v48 = vrot.slane %v1981_v61, 4  ;;  %v2085_v61 = vshrl.u32 %v5772_v34, 16  ;;  %v2067_v9 = vor.u32 %v2066_v27, %v2063_v12 }
 0x182   : > { %1700 = vst.msk [vmem:[#allocation2 + $0x68] sm:$0xf] %vm1673_vm8, %v1630_v24  ;;  %v1628_v7 = vpop.permute.xlu0 %1627  ;;  %v2029_v24 = vor.u32 %v2028_v15, %v5937_v0  ;;  %v2076_v15 = vrot.slane %v2074_v32, 4  ;;  %v5976_v11 = vrot.slane %v2046_v45, 5  ;;  %v2208_v32 = vshll.u32 %v5823_v10, 16 }
 0x183   : > { %1699 = vst.msk [vmem:[#allocation2 + $0x64] sm:$0xf] %vm1673_vm8, %v1628_v7  ;;  %2304 = vrot.lane.b32.xlu2 %v1953_v5, %s4862_s15  ;;  %v2034_v7 = vrot.slane %v2032_v29, 5  ;;  %v5980_v5 = vld [vmem:[%s5104_s11 + $0x110] sm:$0x1]  ;;  %v1987_v45 = vsel %vm5138_vm2, %v1982_v48, %v1986_v28  ;;  %v5997_v10 = vrot.slane %v2094_v57, 5 }
 0x184   : > { %v2030_v40 = vrot.slane %v2029_v24, 4  ;;  %v2112_v24 = vshll.u32 %v5802_v43, 16  ;;  %v2077_v29 = vor.u32 %v2076_v15, %v5973_v21  ;;  %v2088_v43 = vshll.u32 %v5772_v34, 16  ;;  %v6010_v34 = vld [vmem:[%s5104_s11 + $0x104] sm:$0x1] }
 0x185   : > { %v1790_v42 = vpop.permute.xlu2 %1789  ;;  %v2207_v48 = vrot.slane %v2205_v47, 4  ;;  %v2210_v28 = vrot.slane %v2208_v32, 5  ;;  %v2111_v15 = vrot.slane %v2109_v62, 4  ;;  %v2068_v32 = vrot.slane %v2067_v9, 4 }
 0x186   : > { %1885 = vst.msk [vmem:[#allocation2 + $0x4] sm:$0xf] %vm1883_vm9, %v1790_v42  ;;  %v2080_v42 = vshll.u32 %v5980_v5, 16  ;;  %v2114_v57 = vrot.slane %v2112_v24, 5  ;;  %v2078_v12 = vrot.slane %v2077_v29, 4  ;;  %v2142_v62 = vshll.u32 %v5820_v22, 16 }
 0x187   : > { %2314 = vrot.lane.b32.xlu1 %v2011_v13, %s4862_s15  ;;  %v2098_v13 = vshrl.u32 %v5769_v55, 16  ;;  %v2049_v55 = vsel %vm5138_vm2, %v2044_v44, %v5976_v11  ;;  %v2214_v44 = vshll.u32 %v5863_v51, 16  ;;  %v6020_v24 = vld [vmem:[%s5104_s11 + $0x11c] sm:$0x1]  ;;  %v2056_v9 = vshll.u32 %v6010_v34, 16 }
 0x188   : > { %2312 = vrot.lane.b32.xlu0 %v2001_v20, %s4862_s15  ;;  %v2019_v20 = vor.u32 %v2018_v4, %v2015_v19  ;;  %v6001_v19 = vrot.slane %v2085_v61, 4  ;;  %v2133_v4 = vshrl.u32 %v5787_v6, 16  ;;  %v2082_v27 = vrot.slane %v2080_v42, 5 }
 0x189   : > { %v1636_v52 = vpop.permute.xlu1 %1635  ;;  %v2100_v50 = vrot.slane %v2098_v13, 4  ;;  %v2157_v13 = vshrl.u32 %v5808_v14, 16  ;;  %v2160_v61 = vshll.u32 %v5808_v14, 16  ;;  %v2211_v29 = vor.u32 %v2210_v28, %v2207_v48 }
 0x18a   : > { %1703 = vst.msk [vmem:[#allocation2 + $0x74] sm:$0xf] %vm1673_vm8, %v1636_v52  ;;  %v1634_v58 = vpop.permute.xlu0 %1633  ;;  %v2052_v52 = vrot.slane %v2050_v37, 4  ;;  %v2020_v37 = vrot.slane %v2019_v20, 4  ;;  %v6028_v42 = vrot.slane %v2214_v44, 5  ;;  %v2135_v48 = vrot.slane %v2133_v4, 4 }
 0x18b   : > { %1702 = vst.msk [vmem:[#allocation2 + $0x70] sm:$0xf] %vm1673_vm8, %v1634_v58  ;;  %v2035_v58 = vsel %vm5138_vm2, %v2030_v40, %v2034_v7  ;;  %2310 = vrot.lane.b32.xlu2 %v1987_v45, %s4862_s15  ;;  %v2136_v7 = vshll.u32 %v5787_v6, 16  ;;  %v2146_v45 = vshrl.u32 %v5820_v22, 16  ;;  %v2101_v22 = vor.u32 %v2100_v50, %v5997_v10 }
 0x18c   : > { %v2025_v6 = vsel %vm5138_vm2, %v2020_v37, %v5937_v0  ;;  %v2104_v0 = vshll.u32 %v6020_v24, 16  ;;  %v2159_v37 = vrot.slane %v2157_v13, 4  ;;  %v2058_v44 = vrot.slane %v2056_v9, 5 }
 0x18d   : > { %v1796_v40 = vpop.permute.xlu2 %1795  ;;  %v2138_v28 = vrot.slane %v2136_v7, 5  ;;  %v2102_v13 = vrot.slane %v2101_v22, 4  ;;  %v2184_v22 = vshll.u32 %v5838_v39, 16 }
 0x18e   : > { %1888 = vst.msk [vmem:[#allocation2 + $0x10] sm:$0xf] %vm1883_vm9, %v1796_v40  ;;  %v2115_v40 = vor.u32 %v2114_v57, %v2111_v15  ;;  %v2162_v15 = vrot.slane %v2160_v61, 5  ;;  %v2106_v61 = vrot.slane %v2104_v0, 5  ;;  %v2170_v0 = vshrl.u32 %v5805_v8, 16 }
 0x18f   : > { %2320 = vrot.lane.b32.xlu1 %v2049_v55, %s4862_s15  ;;  %v2053_v55 = vor.u32 %v2052_v52, %v5976_v11  ;;  %v6038_v11 = vrot.slane %v2211_v29, 4  ;;  %v2090_v52 = vrot.slane %v2088_v43, 5  ;;  %v2181_v29 = vshrl.u32 %v5838_v39, 16 }
 0x190   : > { %2318 = vrot.lane.b32.xlu0 %v2035_v58, %s4862_s15  ;;  %v2083_v58 = vsel %vm5138_vm2, %v2078_v12, %v2082_v27  ;;  %v2148_v12 = vrot.slane %v2146_v45, 4  ;;  %v2116_v43 = vrot.slane %v2115_v40, 4  ;;  %v2280_v45 = vshll.u32 %v5868_v2, 16 }
 0x191   : > { %v1788_v47 = vpop.permute.xlu1 %1787  ;;  %v2054_v57 = vrot.slane %v2053_v55, 4  ;;  %v2217_v50 = vsel %vm5138_vm2, %v6038_v11, %v6028_v42  ;;  %v2166_v55 = vshll.u32 %v5805_v8, 16  ;;  %v2107_v39 = vsel %vm5138_vm2, %v2102_v13, %v2106_v61  ;;  %v6083_v61 = vld [vmem:[%s5104_s11 + $0x128] sm:$0x1] }
 0x192   : > { %1884 = vst.msk [vmem:[#allocation2] sm:$0xf] %vm1883_vm9, %v1788_v47  ;;  %v1640_v20 = vpop.permute.xlu0 %1639  ;;  %v2118_v47 = vshll.u32 %v5790_v60, 16 }
 0x193   : > { %1705 = vst.msk [vmem:[#allocation2 + $0x7c] sm:$0xf] %vm1673_vm8, %v1640_v20  ;;  %v2073_v20 = vsel %vm5138_vm2, %v2068_v32, %v5973_v21  ;;  %2316 = vrot.lane.b32.xlu2 %v2025_v6, %s4862_s15  ;;  %v6046_v21 = vrot.slane %v2142_v62, 5  ;;  %v6053_v32 = vld [vmem:[%s5104_s11 + $0x134] sm:$0x1]  ;;  %v2122_v6 = vshrl.u32 %v5790_v60, 16  ;;  %v2091_v60 = vor.u32 %v2090_v52, %v6001_v19 }
 0x194   : > { %v6049_v4 = vrot.slane %v2118_v47, 5  ;;  %v2277_v62 = vshrl.u32 %v5868_v2, 16  ;;  %v2152_v47 = vshll.u32 %v6053_v32, 16 }
 0x195   : > { %v1802_v27 = vpop.permute.xlu2 %1801  ;;  %v2149_v2 = vor.u32 %v2148_v12, %v6046_v21  ;;  %v2183_v12 = vrot.slane %v2181_v29, 4  ;;  %v2232_v29 = vshll.u32 %v5848_v63, 16 }
 0x196   : > { %1891 = vst.msk [vmem:[#allocation2 + $0x1c] sm:$0xf] %vm1883_vm9, %v1802_v27  ;;  %v2121_v40 = vsel %vm5138_vm2, %v2116_v43, %v6049_v4  ;;  %v2139_v27 = vor.u32 %v2138_v28, %v2135_v48  ;;  %v2279_v19 = vrot.slane %v2277_v62, 4  ;;  %v2186_v43 = vrot.slane %v2184_v22, 5 }
 0x197   : > { %2326 = vrot.lane.b32.xlu1 %v2083_v58, %s4862_s15  ;;  %v2059_v58 = vsel %vm5138_vm2, %v2054_v57, %v2058_v44  ;;  %v6074_v57 = vrot.slane %v2166_v55, 5  ;;  %v2282_v44 = vrot.slane %v2280_v45, 5  ;;  %v2150_v48 = vrot.slane %v2149_v2, 4 }
 0x198   : > { %2324 = vrot.lane.b32.xlu0 %v2073_v20, %s4862_s15  ;;  %v2163_v20 = vor.u32 %v2162_v15, %v2159_v37  ;;  %v2092_v37 = vrot.slane %v2091_v60, 4  ;;  %v2286_v15 = vshll.u32 %v5924_v30, 16  ;;  %v2154_v28 = vrot.slane %v2152_v47, 5  ;;  %v6095_v60 = vld [vmem:[%s5104_s11 + $0x140] sm:$0x1] }
 0x199   : > { %v1794_v7 = vpop.permute.xlu1 %1793  ;;  %v2172_v55 = vrot.slane %v2170_v0, 4  ;;  %v2229_v62 = vshrl.u32 %v5848_v63, 16  ;;  %v2218_v22 = vshrl.u32 %v5863_v51, 16  ;;  %v2128_v47 = vshll.u32 %v6083_v61, 16 }
 0x19a   : > { %1887 = vst.msk [vmem:[#allocation2 + $0xc] sm:$0xf] %vm1883_vm9, %v1794_v7  ;;  %v1792_v9 = vpop.permute.xlu0 %1791  ;;  %v2124_v7 = vrot.slane %v2122_v6, 4  ;;  %v6077_v52 = vrot.slane %v2163_v20, 4  ;;  %v2283_v20 = vor.u32 %v2282_v44, %v2279_v19  ;;  %v6103_v0 = vrot.slane %v2286_v15, 5 }
 0x19b   : > { %1886 = vst.msk [vmem:[#allocation2 + $0x8] sm:$0xf] %vm1883_vm9, %v1792_v9  ;;  %2322 = vrot.lane.b32.xlu2 %v2059_v58, %s4862_s15  ;;  %v2140_v9 = vrot.slane %v2139_v27, 4  ;;  %v2155_v63 = vsel %vm5138_vm2, %v2150_v48, %v2154_v28  ;;  %v2187_v51 = vor.u32 %v2186_v43, %v2183_v12  ;;  %v2130_v44 = vrot.slane %v2128_v47, 5 }
 0x19c   : > { %v2169_v6 = vsel %vm5138_vm2, %v6077_v52, %v6074_v57  ;;  %v2125_v2 = vor.u32 %v2124_v7, %v6049_v4  ;;  %v6113_v4 = vrot.slane %v2283_v20, 4  ;;  %v2231_v7 = vrot.slane %v2229_v62, 4  ;;  %v4454_v62 = vld [vmem:[%s5104_s11 + $0x158] sm:$0x1] }
 0x19d   : > { %v1808_v13 = vpop.permute.xlu2 %1807  ;;  %v2145_v27 = vsel %vm5138_vm2, %v2140_v9, %v6046_v21  ;;  %v2234_v21 = vrot.slane %v2232_v29, 5  ;;  %v2220_v43 = vrot.slane %v2218_v22, 4  ;;  %v2238_v9 = vshll.u32 %v5843_v26, 16 }
 0x19e   : > { %1894 = vst.msk [vmem:[#allocation2 + $0x28] sm:$0xf] %vm1883_vm9, %v1808_v13  ;;  %v2173_v13 = vor.u32 %v2172_v55, %v6074_v57  ;;  %v2126_v19 = vrot.slane %v2125_v2, 4  ;;  %v2289_v12 = vsel %vm5138_vm2, %v6113_v4, %v6103_v0  ;;  %v2253_v29 = vshrl.u32 %v5896_v25, 16  ;;  %v4463_v57 = vld [vmem:[%s5104_s11 + $0x17c] sm:$0x1] }
 0x19f   : > { %2332 = vrot.lane.b32.xlu1 %v2121_v40, %s4862_s15  ;;  %v2097_v40 = vsel %vm5138_vm2, %v2092_v37, %v5997_v10  ;;  %v2176_v10 = vshll.u32 %v6095_v60, 16  ;;  %v2188_v37 = vrot.slane %v2187_v51, 4  ;;  %v2256_v22 = vshll.u32 %v5896_v25, 16 }
 0x1a0   : > { %2330 = vrot.lane.b32.xlu0 %v2107_v39, %s4862_s15  ;;  %v2190_v39 = vshll.u32 %v5826_v35, 16  ;;  %v2174_v55 = vrot.slane %v2173_v13, 4  ;;  %v2131_v2 = vsel %vm5138_vm2, %v2126_v19, %v2130_v44  ;;  %v2221_v20 = vor.u32 %v2220_v43, %v6028_v42 }
 0x1a1   : > { %v1800_v45 = vpop.permute.xlu1 %1799  ;;  %v2235_v51 = vor.u32 %v2234_v21, %v2231_v7  ;;  %v2258_v19 = vrot.slane %v2256_v22, 5  ;;  %v6146_v21 = vld [vmem:[%s5104_s11 + $0x14c] sm:$0x1] }
 0x1a2   : > { %1890 = vst.msk [vmem:[#allocation2 + $0x18] sm:$0xf] %vm1883_vm9, %v1800_v45  ;;  %v1798_v58 = vpop.permute.xlu0 %1797  ;;  %v2192_v15 = vrot.slane %v2190_v39, 5  ;;  %v2178_v45 = vrot.slane %v2176_v10, 5  ;;  %v2242_v39 = vshrl.u32 %v5843_v26, 16  ;;  %v2255_v10 = vrot.slane %v2253_v29, 4 }
 0x1a3   : > { %1889 = vst.msk [vmem:[#allocation2 + $0x14] sm:$0xf] %vm1883_vm9, %v1798_v58  ;;  %2328 = vrot.lane.b32.xlu2 %v2097_v40, %s4862_s15  ;;  %v2194_v40 = vshrl.u32 %v5826_v35, 16  ;;  %v6141_v25 = vrot.slane %v2235_v51, 4  ;;  %v2222_v7 = vrot.slane %v2221_v20, 4  ;;  %v2262_v29 = vshll.u32 %v5874_v56, 16 }
 0x1a4   : > { %v2193_v47 = vsel %vm5138_vm2, %v2188_v37, %v2192_v15  ;;  %v2179_v35 = vsel %vm5138_vm2, %v2174_v55, %v2178_v45  ;;  %v2244_v37 = vrot.slane %v2242_v39, 4  ;;  %v4457_v55 = vld [vmem:[%s5104_s11 + $0x164] sm:$0x1] }
 0x1a5   : > { %v1814_v48 = vpop.permute.xlu2 %1813  ;;  %v2196_v13 = vrot.slane %v2194_v40, 4  ;;  %v2259_v40 = vor.u32 %v2258_v19, %v2255_v10 }
 0x1a6   : > { %1897 = vst.msk [vmem:[#allocation2 + $0x34] sm:$0xf] %vm1883_vm9, %v1814_v48 }
 0x1a7   : > { %2338 = vrot.lane.b32.xlu1 %v2155_v63, %s4862_s15  ;;  %v2224_v63 = vshll.u32 %v4454_v62, 16  ;;  %v2197_v45 = vor.u32 %v2196_v13, %v2192_v15  ;;  %v2200_v62 = vshll.u32 %v6146_v21, 16  ;;  %v2260_v20 = vrot.slane %v2259_v40, 4 }
 0x1a8   : > { %2336 = vrot.lane.b32.xlu0 %v2145_v27, %s4862_s15  ;;  %v6138_v27 = vrot.slane %v2238_v9, 5  ;;  %v2290_v9 = vshrl.u32 %v5924_v30, 16  ;;  %v2454_v40 = vrot.slane %v5698_v53, 5 }
 0x1a9   : > { %v1806_v28 = vpop.permute.xlu1 %1805  ;;  %v2226_v44 = vrot.slane %v2224_v63, 5  ;;  %v2198_v30 = vrot.slane %v2197_v45, 4  ;;  %v2202_v15 = vrot.slane %v2200_v62, 5  ;;  %v2264_v63 = vrot.slane %v2262_v29, 5 }
 0x1aa   : > { %1893 = vst.msk [vmem:[#allocation2 + $0x24] sm:$0xf] %vm1883_vm9, %v1806_v28  ;;  %v1804_v58 = vpop.permute.xlu0 %1803  ;;  %v2241_v43 = vsel %vm5138_vm2, %v6141_v25, %v6138_v27  ;;  %v2245_v22 = vor.u32 %v2244_v37, %v6138_v27  ;;  %v2296_v25 = vshll.u32 %v4463_v57, 16  ;;  %v2447_v45 = vrot.slane %v5712_v17, 5 }
 0x1ab   : > { %1892 = vst.msk [vmem:[#allocation2 + $0x20] sm:$0xf] %vm1883_vm9, %v1804_v58  ;;  %2334 = vrot.lane.b32.xlu2 %v2131_v2, %s4862_s15  ;;  %v2227_v58 = vsel %vm5138_vm2, %v2222_v7, %v2226_v44  ;;  %v2248_v2 = vshll.u32 %v4457_v55, 16  ;;  %v2203_v42 = vsel %vm5138_vm2, %v2198_v30, %v2202_v15  ;;  %v2265_v11 = vsel %vm5138_vm2, %v2260_v20, %v2264_v63  ;;  %v4460_v44 = vld [vmem:[%s5104_s11 + $0x170] sm:$0x1] }
 0x1ac   : > { %v2298_v19 = vrot.slane %v2296_v25, 5  ;;  %v2464_v15 = vrot.slane %v5942_v36, 5  ;;  %v4466_v20 = vrot.slane %v5730_v38, 9  ;;  %v2517_v38 = vrot.slane %v5805_v8, 5 }
 0x1ad   : > { %v1820_v26 = vpop.permute.xlu2 %1819  ;;  %v2250_v27 = vrot.slane %v2248_v2, 5  ;;  %v2456_v57 = vrot.slane %v2454_v40, 4  ;;  %v2471_v25 = vrot.slane %v5916_v41, 5 }
 0x1ae   : > { %1900 = vst.msk [vmem:[#allocation2 + $0x40] sm:$0xf] %vm1883_vm9, %v1820_v26 }
 0x1af   : > { %2344 = vrot.lane.b32.xlu1 %v2193_v47, %s4862_s15  ;;  %v2292_v47 = vrot.slane %v2290_v9, 4 }
 0x1b0   : > { %2342 = vrot.lane.b32.xlu0 %v2179_v35, %s4862_s15  ;;  %v2246_v35 = vrot.slane %v2245_v22, 4  ;;  %v2449_v22 = vrot.slane %v2447_v45, 4 }
 0x1b1   : > { %v1812_v48 = vpop.permute.xlu1 %1811 }
 0x1b2   : > { %1896 = vst.msk [vmem:[#allocation2 + $0x30] sm:$0xf] %vm1883_vm9, %v1812_v48  ;;  %v1810_v28 = vpop.permute.xlu0 %1809  ;;  %v2251_v13 = vsel %vm5138_vm2, %v2246_v35, %v2250_v27  ;;  %v2468_v35 = vrot.slane %v5748_v59, 5  ;;  %v4474_v27 = vrot.slane %v5808_v14, 9  ;;  %v2475_v59 = vrot.slane %v5733_v46, 5 }
 0x1b3   : > { %1895 = vst.msk [vmem:[#allocation2 + $0x2c] sm:$0xf] %vm1883_vm9, %v1810_v28  ;;  %2340 = vrot.lane.b32.xlu2 %v2169_v6, %s4862_s15  ;;  %v2266_v6 = vshrl.u32 %v5874_v56, 16  ;;  %v2272_v28 = vshll.u32 %v4460_v44, 16 }
 0x1b4   : > { %v6252_v46 = vsel %vm5456_vm6, %v4474_v27, %v2517_v38 }
 0x1b5   : > { %v1826_v51 = vpop.permute.xlu2 %1825  ;;  %v2268_v10 = vrot.slane %v2266_v6, 4  ;;  %v2274_v9 = vrot.slane %v2272_v28, 5  ;;  %v4468_v6 = vrot.slane %v5736_v54, 9  ;;  %v2482_v54 = vrot.slane %v5754_v31, 5  ;;  %v7356_v28 = vld [vmem:[#allocation15_spill] sm:$0xff] }
 0x1b6   : > { %1903 = vst.msk [vmem:[#allocation2 + $0x4c] sm:$0xf] %vm1883_vm9, %v1826_v51 }
 0x1b7   : > { %2350 = vrot.lane.b32.xlu1 %v2227_v58, %s4862_s15  ;;  %v2269_v48 = vor.u32 %v2268_v10, %v2264_v63  ;;  %v4465_v58 = vrot.slane %v5701_v18, 9  ;;  %v2461_v18 = vrot.slane %v5718_v1, 5  ;;  %v2476_v41 = vsel %vm5456_vm6, %v4468_v6, %v2475_v59  ;;  %v4774_v10 = vld [vmem:[%s5104_s11 + $0xe4] sm:$0xf] }
 0x1b8   : > { %2348 = vrot.lane.b32.xlu0 %v2217_v50, %s4862_s15  ;;  %v2293_v50 = vor.u32 %v2292_v47, %v6103_v0 }
 0x1b9   : > { %v1818_v39 = vpop.permute.xlu1 %1817  ;;  %v2270_v62 = vrot.slane %v2269_v48, 4  ;;  %v2455_v53 = vsel %vm5456_vm6, %v4465_v58, %v2454_v40  ;;  %v2463_v30 = vrot.slane %v2461_v18, 4  ;;  %v2462_v36 = vsel %vm5456_vm6, %v4466_v20, %v2461_v18  ;;  %v4775_v58 = vld [vmem:[%s5104_s11 + $0x114] sm:$0xf] }
 0x1ba   : > { %1899 = vst.msk [vmem:[#allocation2 + $0x3c] sm:$0xf] %vm1883_vm9, %v1818_v39  ;;  %v1816_v52 = vpop.permute.xlu0 %1815  ;;  %v2294_v56 = vrot.slane %v2293_v50, 4  ;;  %v2470_v50 = vrot.slane %v2468_v35, 4  ;;  %v4471_v40 = vrot.slane %v4775_v58, 9 }
 0x1bb   : > { %1898 = vst.msk [vmem:[#allocation2 + $0x38] sm:$0xf] %vm1883_vm9, %v1816_v52  ;;  %2346 = vrot.lane.b32.xlu2 %v2203_v42, %s4862_s15  ;;  %v2275_v0 = vsel %vm5138_vm2, %v2270_v62, %v2274_v9  ;;  %v2465_v39 = vsel %vm5456_vm6, %v2463_v30, %v2464_v15  ;;  %v2457_v52 = vrot.slane %v5890_v16, 5  ;;  %v7357_v62 = vld [vmem:[#allocation8_spill] sm:$0xff] }
 0x1bc   : > { %v2299_v55 = vsel %vm5138_vm2, %v2294_v56, %v2298_v19  ;;  %v4467_v56 = vrot.slane %v4774_v10, 9  ;;  %v2484_v19 = vrot.slane %v2482_v54, 4  ;;  %v2478_v9 = vrot.slane %v7357_v62, 5 }
 0x1bd   : > { %v1832_v7 = vpop.permute.xlu2 %1831  ;;  %v2458_v16 = vsel %vm5456_vm6, %v2456_v57, %v2457_v52  ;;  %v7358_v57 = vld [vmem:[#allocation19_spill] sm:$0xff] }
 0x1be   : > { %1906 = vst.msk [vmem:[#allocation2 + $0x58] sm:$0xf] %vm1883_vm9, %v1832_v7  ;;  %v2485_v7 = vrot.slane %v6010_v34, 5  ;;  %v2469_v48 = vsel %vm5456_vm6, %v4467_v56, %v2468_v35  ;;  %v2510_v52 = vrot.slane %v7358_v57, 5  ;;  %v2527_v56 = vrot.slane %v6146_v21, 5 }
 0x1bf   : > { %2356 = vrot.lane.b32.xlu1 %v2265_v11, %s4862_s15 }
 0x1c0   : > { %2354 = vrot.lane.b32.xlu0 %v2251_v13, %s4862_s15  ;;  %v2472_v13 = vsel %vm5456_vm6, %v2470_v50, %v2471_v25  ;;  %v2486_v34 = vsel %vm5456_vm6, %v2484_v19, %v2485_v7  ;;  %v2512_v50 = vrot.slane %v2510_v52, 4  ;;  %v2513_v25 = vrot.slane %v6053_v32, 5  ;;  %v4781_v32 = vld [vmem:[%s5104_s11 + $0x12c] sm:$0xf]  ;;  %v4782_v7 = vld [vmem:[%s5104_s11 + $0x144] sm:$0xf] }
 0x1c1   : > { %v1824_v26 = vpop.permute.xlu1 %1823 }
 0x1c2   : > { %1902 = vst.msk [vmem:[#allocation2 + $0x48] sm:$0xf] %vm1883_vm9, %v1824_v26  ;;  %v1822_v37 = vpop.permute.xlu0 %1821  ;;  %v4469_v26 = vrot.slane %v5766_v49, 9  ;;  %v2477_v49 = vrot.slane %v2475_v59, 4  ;;  %v2499_v59 = vrot.slane %v6020_v24, 5 }
 0x1c3   : > { %1901 = vst.msk [vmem:[#allocation2 + $0x44] sm:$0xf] %vm1883_vm9, %v1822_v37  ;;  %2352 = vrot.lane.b32.xlu2 %v2241_v43, %s4862_s15  ;;  %v2450_v43 = vrot.slane %v5858_v23, 5  ;;  %v4773_v23 = vld [vmem:[%s5104_s11 + $0xc0] sm:$0xf] }
 0x1c4   : > { %v4780_v24 = vld [vmem:[%s5104_s11 + $0x148] sm:$0xf] }
 0x1c5   : > { %v1838_v29 = vpop.permute.xlu2 %1837  ;;  %v2451_v4 = vsel %vm5456_vm6, %v2449_v22, %v2450_v43 }
 0x1c6   : > { %1909 = vst.msk [vmem:[#allocation2 + $0x64] sm:$0xf] %vm1883_vm9, %v1838_v29  ;;  %v4776_v29 = vld [vmem:[%s5104_s11 + $0x118] sm:$0xf] }
 0x1c7   : > { %2362 = vrot.lane.b32.xlu1 %v2299_v55, %s4862_s15  ;;  %v2489_v55 = vrot.slane %v7356_v28, 5 }
 0x1c8   : > { %2360 = vrot.lane.b32.xlu0 %v2289_v12, %s4862_s15  ;;  %v4464_v12 = vrot.slane %v4773_v23, 9 }
 0x1c9   : > { %v1830_v17 = vpop.permute.xlu1 %1829 }
 0x1ca   : > { %1905 = vst.msk [vmem:[#allocation2 + $0x54] sm:$0xf] %vm1883_vm9, %v1830_v17  ;;  %v1828_v2 = vpop.permute.xlu0 %1827  ;;  %v2448_v51 = vsel %vm5456_vm6, %v4464_v12, %v2447_v45  ;;  %v2483_v45 = vsel %vm5456_vm6, %v4469_v26, %v2482_v54  ;;  %v2496_v17 = vrot.slane %v4776_v29, 5  ;;  %v2524_v54 = vrot.slane %v4780_v24, 5  ;;  %v4504_v29 = vld [vmem:[%s5104_s11 + $0x1e0] sm:$0xf] }
 0x1cb   : > { %1904 = vst.msk [vmem:[#allocation2 + $0x50] sm:$0xf] %vm1883_vm9, %v1828_v2  ;;  %2358 = vrot.lane.b32.xlu2 %v2275_v0, %s4862_s15  ;;  %v2491_v2 = vrot.slane %v2489_v55, 4  ;;  %v2492_v0 = vrot.slane %v5980_v5, 5  ;;  %v4778_v5 = vld [vmem:[%s5104_s11 + $0x108] sm:$0xf] }
 0x1cc   : > { %v2497_v12 = vsel %vm5456_vm6, %v4471_v40, %v2496_v17  ;;  %v4470_v15 = vrot.slane %v4778_v5, 9  ;;  %v2498_v6 = vrot.slane %v2496_v17, 4  ;;  %v2526_v10 = vrot.slane %v2524_v54, 4  ;;  %v6352_v17 = vld [vmem:[%s5104_s11 + $0x1e8] sm:$0x1] }
 0x1cd   : > { %v1844_v47 = vpop.permute.xlu2 %1843  ;;  %v2493_v30 = vsel %vm5456_vm6, %v2491_v2, %v2492_v0  ;;  %v3089_v8 = vshrl.u32 %v4504_v29, 16  ;;  %v4783_v2 = vld [vmem:[%s5104_s11 + $0x150] sm:$0xf] }
 0x1ce   : > { %1912 = vst.msk [vmem:[#allocation2 + $0x70] sm:$0xf] %vm1883_vm9, %v1844_v47  ;;  %v4476_v0 = vrot.slane %v4783_v2, 9 }
 0x1cf   : > { %2561 = vrot.lane.b32.xlu1 %v2455_v53, %s4863_s16  ;;  %v2479_v53 = vsel %vm5456_vm6, %v2477_v49, %v2478_v9 }
 0x1d0   : > { %2559 = vrot.lane.b32.xlu0 %v2451_v4, %s4863_s16  ;;  %v4777_v4 = vld [vmem:[%s5104_s11 + $0x124] sm:$0xf] }
 0x1d1   : > { %v1836_v1 = vpop.permute.xlu1 %1835  ;;  %v2503_v23 = vrot.slane %v4777_v4, 5  ;;  %v3091_v4 = vrot.slane %v3089_v8, 4  ;;  %v4507_v8 = vld [vmem:[%s5104_s11 + $0x1ec] sm:$0xf] }
 0x1d2   : > { %1908 = vst.msk [vmem:[#allocation2 + $0x60] sm:$0xf] %vm1883_vm9, %v1836_v1  ;;  %v1834_v63 = vpop.permute.xlu0 %1833  ;;  %v2506_v1 = vrot.slane %v6083_v61, 5 }
 0x1d3   : > { %1907 = vst.msk [vmem:[#allocation2 + $0x5c] sm:$0xf] %vm1883_vm9, %v1834_v63  ;;  %2557 = vrot.lane.b32.xlu2 %v2448_v51, %s4863_s16  ;;  %v2505_v47 = vrot.slane %v2503_v23, 4  ;;  %v4779_v51 = vld [vmem:[%s5104_s11 + $0x120] sm:$0xf] }
 0x1d5   : > { %v1850_v42 = vpop.permute.xlu2 %1849  ;;  %v2507_v27 = vsel %vm5456_vm6, %v2505_v47, %v2506_v1 }
 0x1d6   : > { %1915 = vst.msk [vmem:[#allocation2 + $0x7c] sm:$0xf] %vm1883_vm9, %v1850_v42 }
 0x1d7   : > { %2567 = vrot.lane.b32.xlu1 %v2465_v39, %s4863_s16  ;;  %v4472_v39 = vrot.slane %v4779_v51, 9 }
 0x1d8   : > { %2565 = vrot.lane.b32.xlu0 %v2462_v36, %s4863_s16  ;;  %v2490_v36 = vsel %vm5456_vm6, %v4470_v15, %v2489_v55  ;;  %v2519_v55 = vrot.slane %v2517_v38, 4 }
 0x1d9   : > { %v1842_v11 = vpop.permute.xlu1 %1841  ;;  %v2504_v61 = vsel %vm5456_vm6, %v4472_v39, %v2503_v23 }
 0x1da   : > { %1911 = vst.msk [vmem:[#allocation2 + $0x6c] sm:$0xf] %vm1883_vm9, %v1842_v11  ;;  %v1840_v14 = vpop.permute.xlu0 %1839 }
 0x1db   : > { %1910 = vst.msk [vmem:[#allocation2 + $0x68] sm:$0xf] %vm1883_vm9, %v1840_v14  ;;  %2563 = vrot.lane.b32.xlu2 %v2458_v16, %s4863_s16  ;;  %v2500_v16 = vsel %vm5456_vm6, %v2498_v6, %v2499_v59 }
 0x1dd   : > { %v2305_v44 = vpop.permute.xlu2 %2304 }
 0x1de   : > { %2399 = vst.msk [vmem:[#allocation2 + $0x8] sm:$0xf] %vm2396_vm10, %v2305_v44  ;;  %v4475_v44 = vrot.slane %v4782_v7, 9 }
 0x1df   : > { %2573 = vrot.lane.b32.xlu1 %v2476_v41, %s4863_s16  ;;  %v2514_v41 = vsel %vm5456_vm6, %v2512_v50, %v2513_v25  ;;  %v4480_v50 = vld [vmem:[%s5104_s11 + $0x180] sm:$0xf]  ;;  %v6391_v25 = vld [vmem:[%s5104_s11 + $0x188] sm:$0x1] }
 0x1e0   : > { %2571 = vrot.lane.b32.xlu0 %v2472_v13, %s4863_s16  ;;  %v4473_v13 = vrot.slane %v4781_v32, 9  ;;  %v2525_v21 = vsel %vm5456_vm6, %v4475_v44, %v2524_v54  ;;  %v4528_v7 = vrot.slane %v4480_v50, 9 }
 0x1e1   : > { %v1848_v31 = vpop.permute.xlu1 %1847 }
 0x1e2   : > { %1914 = vst.msk [vmem:[#allocation2 + $0x78] sm:$0xf] %vm1883_vm9, %v1848_v31  ;;  %v1846_v37 = vpop.permute.xlu0 %1845 }
 0x1e3   : > { %1913 = vst.msk [vmem:[#allocation2 + $0x74] sm:$0xf] %vm1883_vm9, %v1846_v37  ;;  %2569 = vrot.lane.b32.xlu2 %v2469_v48, %s4863_s16  ;;  %v6331_v37 = vld [vmem:[%s5104_s11 + $0x1e4] sm:$0xf]  ;;  %v2528_v48 = vsel %vm5456_vm6, %v2526_v10, %v2527_v56  ;;  %v3486_v56 = vrot.slane %v6352_v17, 5 }
 0x1e4   : > { %v3102_v28 = vshrl.u32 %v6331_v37, 16 }
 0x1e5   : > { %v2311_v22 = vpop.permute.xlu2 %2310 }
 0x1e6   : > { %2402 = vst.msk [vmem:[#allocation2 + $0x14] sm:$0xf] %vm2396_vm10, %v2311_v22  ;;  %v3104_v58 = vrot.slane %v3102_v28, 4 }
 0x1e7   : > { %2579 = vrot.lane.b32.xlu1 %v2486_v34, %s4863_s16  ;;  %v3098_v34 = vshll.u32 %v6331_v37, 16 }
 0x1e8   : > { %2577 = vrot.lane.b32.xlu0 %v2483_v45, %s4863_s16  ;;  %v2520_v45 = vrot.slane %v6095_v60, 5  ;;  %v3092_v60 = vshll.u32 %v4504_v29, 16 }
 0x1e9   : > { %v2303_v43 = vpop.permute.xlu1 %2302  ;;  %v3100_v9 = vrot.slane %v3098_v34, 5 }
 0x1ea   : > { %2398 = vst.msk [vmem:[#allocation2 + $0x4] sm:$0xf] %vm2396_vm10, %v2303_v43  ;;  %v2301_v18 = vpop.permute.xlu0 %2300  ;;  %v2521_v38 = vsel %vm5456_vm6, %v2519_v55, %v2520_v45  ;;  %v3108_v43 = vshll.u32 %v6352_v17, 16  ;;  %v3094_v23 = vrot.slane %v3092_v60, 5  ;;  %v6424_v60 = vld [vmem:[%s5104_s11 + $0x1f4] sm:$0x1] }
 0x1eb   : > { %2397 = vst.msk [vmem:[#allocation2] sm:$0xf] %vm2396_vm10, %v2301_v18  ;;  %2575 = vrot.lane.b32.xlu2 %v2479_v53, %s4863_s16  ;;  %v3105_v22 = vor.u32 %v3104_v58, %v3100_v9  ;;  %v6361_v18 = vld [vmem:[%s5104_s11 + $0x154] sm:$0xf] }
 0x1ec   : > { %v2531_v53 = vrot.slane %v6361_v18, 5  ;;  %v3110_v1 = vrot.slane %v3108_v43, 5  ;;  %v3095_v39 = vor.u32 %v3094_v23, %v3091_v4 }
 0x1ed   : > { %v2317_v20 = vpop.permute.xlu2 %2316  ;;  %v3106_v47 = vrot.slane %v3105_v22, 4  ;;  %v3116_v22 = vshll.u32 %v4507_v8, 16 }
 0x1ee   : > { %2405 = vst.msk [vmem:[#allocation2 + $0x20] sm:$0xf] %vm2396_vm10, %v2317_v20  ;;  %v2532_v51 = vsel %vm5456_vm6, %v4476_v0, %v2531_v53  ;;  %v3132_v0 = vshll.u32 %v6424_v60, 16 }
 0x1ef   : > { %2585 = vrot.lane.b32.xlu1 %v2497_v12, %s4863_s16  ;;  %v3483_v12 = vrot.slane %v6331_v37, 5  ;;  %v3118_v23 = vrot.slane %v3116_v22, 5  ;;  %v6490_v22 = vld [vmem:[%s5104_s11 + $0x200] sm:$0x1] }
 0x1f0   : > { %2583 = vrot.lane.b32.xlu0 %v2493_v30, %s4863_s16  ;;  %v4536_v30 = vrot.slane %v4504_v29, 9 }
 0x1f1   : > { %v2309_v63 = vpop.permute.xlu1 %2308  ;;  %v3485_v10 = vrot.slane %v3483_v12, 4 }
 0x1f2   : > { %2401 = vst.msk [vmem:[#allocation2 + $0x10] sm:$0xf] %vm2396_vm10, %v2309_v63  ;;  %v2307_v35 = vpop.permute.xlu0 %2306  ;;  %v6371_v63 = vld [vmem:[%s5104_s11 + $0x184] sm:$0xf] }
 0x1f3   : > { %2400 = vst.msk [vmem:[#allocation2 + $0xc] sm:$0xf] %vm2396_vm10, %v2307_v35  ;;  %2581 = vrot.lane.b32.xlu2 %v2490_v36, %s4863_s16  ;;  %v3484_v35 = vsel %vm5456_vm6, %v4536_v30, %v3483_v12  ;;  %v3111_v36 = vsel %vm5138_vm2, %v3106_v47, %v3110_v1  ;;  %v2910_v57 = vshrl.u32 %v6371_v63, 16  ;;  %v3430_v30 = vrot.slane %v6391_v25, 5 }
 0x1f5   : > { %v2323_v42 = vpop.permute.xlu2 %2322 }
 0x1f6   : > { %2408 = vst.msk [vmem:[#allocation2 + $0x2c] sm:$0xf] %vm2396_vm10, %v2323_v42  ;;  %v2912_v42 = vrot.slane %v2910_v57, 4 }
 0x1f7   : > { %2591 = vrot.lane.b32.xlu1 %v2507_v27, %s4863_s16  ;;  %v2906_v27 = vshll.u32 %v6371_v63, 16 }
 0x1f8   : > { %2589 = vrot.lane.b32.xlu0 %v2504_v61, %s4863_s16 }
 0x1f9   : > { %v2315_v11 = vpop.permute.xlu1 %2314  ;;  %v2908_v59 = vrot.slane %v2906_v27, 5 }
 0x1fa   : > { %2404 = vst.msk [vmem:[#allocation2 + $0x1c] sm:$0xf] %vm2396_vm10, %v2315_v11  ;;  %v2313_v14 = vpop.permute.xlu0 %2312 }
 0x1fb   : > { %2403 = vst.msk [vmem:[#allocation2 + $0x18] sm:$0xf] %vm2396_vm10, %v2313_v14  ;;  %2587 = vrot.lane.b32.xlu2 %v2500_v16, %s4863_s16  ;;  %v2897_v14 = vshrl.u32 %v4480_v50, 16  ;;  %v2900_v16 = vshll.u32 %v4480_v50, 16  ;;  %v2913_v54 = vor.u32 %v2912_v42, %v2908_v59 }
 0x1fd   : > { %v2329_v19 = vpop.permute.xlu2 %2328  ;;  %v2899_v32 = vrot.slane %v2897_v14, 4  ;;  %v4483_v14 = vld [vmem:[%s5104_s11 + $0x18c] sm:$0xf] }
 0x1fe   : > { %2411 = vst.msk [vmem:[#allocation2 + $0x38] sm:$0xf] %vm2396_vm10, %v2329_v19  ;;  %v3427_v19 = vrot.slane %v6371_v63, 5 }
 0x1ff   : > { %2597 = vrot.lane.b32.xlu1 %v6252_v46, %s4863_s16  ;;  %v2511_v46 = vsel %vm5456_vm6, %v4473_v13, %v2510_v52  ;;  %v3096_v52 = vrot.slane %v3095_v39, 4  ;;  %v2902_v13 = vrot.slane %v2900_v16, 5  ;;  %v6439_v39 = vld [vmem:[%s5104_s11 + $0x190] sm:$0xf]  ;;  %v6457_v16 = vld [vmem:[%s5104_s11 + $0x194] sm:$0x1] }
 0x200   : > { %2595 = vrot.lane.b32.xlu0 %v2514_v41, %s4863_s16  ;;  %v2916_v41 = vshll.u32 %v6391_v25, 16  ;;  %v3428_v28 = vsel %vm5456_vm6, %v4528_v7, %v3427_v19  ;;  %v3429_v12 = vrot.slane %v3427_v19, 4  ;;  %v3493_v7 = vrot.slane %v6424_v60, 5 }
 0x201   : > { %v2321_v31 = vpop.permute.xlu1 %2320  ;;  %v3101_v24 = vsel %vm5138_vm2, %v3096_v52, %v3100_v9  ;;  %v2903_v34 = vor.u32 %v2902_v13, %v2899_v32  ;;  %v2930_v52 = vshll.u32 %v6439_v39, 16  ;;  %v2940_v13 = vshll.u32 %v6457_v16, 16 }
 0x202   : > { %2407 = vst.msk [vmem:[#allocation2 + $0x28] sm:$0xf] %vm2396_vm10, %v2321_v31  ;;  %v2319_v26 = vpop.permute.xlu0 %2318 }
 0x203   : > { %2406 = vst.msk [vmem:[#allocation2 + $0x24] sm:$0xf] %vm2396_vm10, %v2319_v26  ;;  %2593 = vrot.lane.b32.xlu2 %v2511_v46, %s4863_s16  ;;  %v2914_v26 = vrot.slane %v2913_v54, 4  ;;  %v2924_v54 = vshll.u32 %v4483_v14, 16 }
 0x205   : > { %v2335_v49 = vpop.permute.xlu2 %2334 }
 0x206   : > { %2414 = vst.msk [vmem:[#allocation2 + $0x44] sm:$0xf] %vm2396_vm10, %v2335_v49 }
 0x207   : > { %2603 = vrot.lane.b32.xlu1 %v2528_v48, %s4863_s16  ;;  %v6406_v48 = vld [vmem:[%s5104_s11 + $0x1f0] sm:$0xf] }
 0x208   : > { %2601 = vrot.lane.b32.xlu0 %v2525_v21, %s4863_s16  ;;  %v3487_v21 = vsel %vm5456_vm6, %v3485_v10, %v3486_v56  ;;  %v3122_v45 = vshll.u32 %v6406_v48, 16  ;;  %v3126_v49 = vshrl.u32 %v6406_v48, 16  ;;  %v2926_v56 = vrot.slane %v2924_v54, 5  ;;  %v6525_v54 = vld [vmem:[%s5104_s11 + $0x1a0] sm:$0x1] }
 0x209   : > { %v2327_v62 = vpop.permute.xlu1 %2326 }
 0x20a   : > { %2410 = vst.msk [vmem:[#allocation2 + $0x34] sm:$0xf] %vm2396_vm10, %v2327_v62  ;;  %v2325_v40 = vpop.permute.xlu0 %2324  ;;  %v2904_v62 = vrot.slane %v2903_v34, 4  ;;  %v6472_v34 = vld [vmem:[%s5104_s11 + $0x1fc] sm:$0xf] }
 0x20b   : > { %2409 = vst.msk [vmem:[#allocation2 + $0x30] sm:$0xf] %vm2396_vm10, %v2325_v40  ;;  %2599 = vrot.lane.b32.xlu2 %v2521_v38, %s4863_s16  ;;  %v3124_v40 = vrot.slane %v3122_v45, 5  ;;  %v3113_v38 = vshrl.u32 %v4507_v8, 16 }
 0x20c   : > { %v2909_v43 = vsel %vm5138_vm2, %v2904_v62, %v2908_v59  ;;  %v3146_v62 = vshll.u32 %v6472_v34, 16 }
 0x20d   : > { %v2341_v5 = vpop.permute.xlu2 %2340  ;;  %v3115_v4 = vrot.slane %v3113_v38, 4  ;;  %v4510_v38 = vld [vmem:[%s5104_s11 + $0x1f8] sm:$0xf] }
 0x20e   : > { %2417 = vst.msk [vmem:[#allocation2 + $0x50] sm:$0xf] %vm2396_vm10, %v2341_v5  ;;  %v3490_v5 = vrot.slane %v6406_v48, 5 }
 0x20f   : > { %2801 = vrot.lane.b32.xlu1 %v6331_v37, %s4864_s21  ;;  %v2918_v37 = vrot.slane %v2916_v41, 5 }
 0x210   : > { %2799 = vrot.lane.b32.xlu0 %v4504_v29, %s4864_s21  ;;  %v3128_v29 = vrot.slane %v3126_v49, 4  ;;  %v3492_v19 = vrot.slane %v3490_v5, 4 }
 0x211   : > { %v2333_v15 = vpop.permute.xlu1 %2332  ;;  %v2919_v55 = vsel %vm5138_vm2, %v2914_v26, %v2918_v37 }
 0x212   : > { %2413 = vst.msk [vmem:[#allocation2 + $0x40] sm:$0xf] %vm2396_vm10, %v2333_v15  ;;  %v2331_v20 = vpop.permute.xlu0 %2330  ;;  %v3129_v2 = vor.u32 %v3128_v29, %v3124_v40  ;;  %v4537_v15 = vrot.slane %v4507_v8, 9 }
 0x213   : > { %2412 = vst.msk [vmem:[#allocation2 + $0x3c] sm:$0xf] %vm2396_vm10, %v2331_v20  ;;  %2605 = vrot.lane.b32.xlu2 %v2532_v51, %s4863_s16 }
 0x214   : > { %v3130_v20 = vrot.slane %v3129_v2, 4  ;;  %v3491_v27 = vsel %vm5456_vm6, %v4537_v15, %v3490_v5  ;;  %v3140_v2 = vshll.u32 %v4510_v38, 16  ;;  %v3437_v15 = vrot.slane %v6457_v16, 5 }
 0x215   : > { %v2347_v61 = vpop.permute.xlu2 %2346 }
 0x216   : > { %2420 = vst.msk [vmem:[#allocation2 + $0x5c] sm:$0xf] %vm2396_vm10, %v2347_v61  ;;  %v2934_v61 = vshrl.u32 %v6439_v39, 16 }
 0x217   : > { %3569 = vrot.lane.b32.xlu1 %v3484_v35, %s4865_s23  ;;  %v3431_v35 = vsel %vm5456_vm6, %v3429_v12, %v3430_v30  ;;  %v3142_v30 = vrot.slane %v3140_v2, 5 }
 0x218   : > { %3314 = vrot.lane.b32.xlu0 %v3111_v36, %s4866_s24  ;;  %v3119_v36 = vor.u32 %v3118_v23, %v3115_v4  ;;  %v3156_v23 = vshll.u32 %v6490_v22, 16 }
 0x219   : > { %v2339_v6 = vpop.permute.xlu1 %2338 }
 0x21a   : > { %2416 = vst.msk [vmem:[#allocation2 + $0x4c] sm:$0xf] %vm2396_vm10, %v2339_v6  ;;  %v2337_v11 = vpop.permute.xlu0 %2336  ;;  %v3120_v6 = vrot.slane %v3119_v36, 4  ;;  %v6505_v36 = vld [vmem:[%s5104_s11 + $0x19c] sm:$0xf] }
 0x21b   : > { %2415 = vst.msk [vmem:[#allocation2 + $0x48] sm:$0xf] %vm2396_vm10, %v2337_v11  ;;  %3312 = vrot.lane.b32.xlu2 %v3101_v24, %s4866_s24  ;;  %v2932_v11 = vrot.slane %v2930_v52, 5  ;;  %v2921_v24 = vshrl.u32 %v4483_v14, 16 }
 0x21c   : > { %v3125_v41 = vsel %vm5138_vm2, %v3120_v6, %v3124_v40  ;;  %v2954_v6 = vshll.u32 %v6505_v36, 16 }
 0x21d   : > { %v2353_v44 = vpop.permute.xlu2 %2352  ;;  %v2923_v10 = vrot.slane %v2921_v24, 4  ;;  %v4486_v24 = vld [vmem:[%s5104_s11 + $0x198] sm:$0xf] }
 0x21e   : > { %2423 = vst.msk [vmem:[#allocation2 + $0x68] sm:$0xf] %vm2396_vm10, %v2353_v44  ;;  %v3434_v44 = vrot.slane %v6439_v39, 5 }
 0x21f   : > { %2769 = vrot.lane.b32.xlu1 %v6371_v63, %s4864_s21  ;;  %v3134_v63 = vrot.slane %v3132_v0, 5 }
 0x220   : > { %2767 = vrot.lane.b32.xlu0 %v4480_v50, %s4864_s21  ;;  %v2936_v50 = vrot.slane %v2934_v61, 4  ;;  %v3436_v5 = vrot.slane %v3434_v44, 4 }
 0x221   : > { %v2345_v31 = vpop.permute.xlu1 %2344  ;;  %v3135_v57 = vsel %vm5138_vm2, %v3130_v20, %v3134_v63 }
 0x222   : > { %2419 = vst.msk [vmem:[#allocation2 + $0x58] sm:$0xf] %vm2396_vm10, %v2345_v31  ;;  %v2343_v46 = vpop.permute.xlu0 %2342  ;;  %v2937_v32 = vor.u32 %v2936_v50, %v2932_v11  ;;  %v4529_v31 = vrot.slane %v4483_v14, 9 }
 0x223   : > { %2418 = vst.msk [vmem:[#allocation2 + $0x54] sm:$0xf] %vm2396_vm10, %v2343_v46  ;;  %3571 = vrot.lane.b32.xlu2 %v3487_v21, %s4865_s23 }
 0x224   : > { %v2938_v46 = vrot.slane %v2937_v32, 4  ;;  %v3435_v45 = vsel %vm5456_vm6, %v4529_v31, %v3434_v44  ;;  %v2948_v32 = vshll.u32 %v4486_v24, 16  ;;  %v3500_v31 = vrot.slane %v6490_v22, 5 }
 0x225   : > { %v2359_v9 = vpop.permute.xlu2 %2358 }
 0x226   : > { %2426 = vst.msk [vmem:[#allocation2 + $0x74] sm:$0xf] %vm2396_vm10, %v2359_v9  ;;  %v3150_v9 = vshrl.u32 %v6472_v34, 16 }
 0x227   : > { %3537 = vrot.lane.b32.xlu1 %v3428_v28, %s4865_s23  ;;  %v3494_v28 = vsel %vm5456_vm6, %v3492_v19, %v3493_v7  ;;  %v2950_v7 = vrot.slane %v2948_v32, 5 }
 0x228   : > { %3282 = vrot.lane.b32.xlu0 %v2919_v55, %s4866_s24  ;;  %v2927_v55 = vor.u32 %v2926_v56, %v2923_v10  ;;  %v2964_v56 = vshll.u32 %v6525_v54, 16 }
 0x229   : > { %v2351_v58 = vpop.permute.xlu1 %2350 }
 0x22a   : > { %2422 = vst.msk [vmem:[#allocation2 + $0x64] sm:$0xf] %vm2396_vm10, %v2351_v58  ;;  %v2349_v17 = vpop.permute.xlu0 %2348  ;;  %v2928_v58 = vrot.slane %v2927_v55, 4 }
 0x22b   : > { %2421 = vst.msk [vmem:[#allocation2 + $0x60] sm:$0xf] %vm2396_vm10, %v2349_v17  ;;  %3280 = vrot.lane.b32.xlu2 %v2909_v43, %s4866_s24  ;;  %v3148_v17 = vrot.slane %v3146_v62, 5  ;;  %v3137_v43 = vshrl.u32 %v4510_v38, 16 }
 0x22c   : > { %v2933_v0 = vsel %vm5138_vm2, %v2928_v58, %v2932_v11 }
 0x22d   : > { %v2558_v47 = vpop.permute.xlu2 %2557  ;;  %v3139_v12 = vrot.slane %v3137_v43, 4 }
 0x22e   : > { %2654 = vst.msk [vmem:[#allocation2] sm:$0xf] %vm2653_vm11, %v2558_v47  ;;  %v3497_v47 = vrot.slane %v6472_v34, 5 }
 0x22f   : > { %2805 = vrot.lane.b32.xlu1 %v6406_v48, %s4864_s21  ;;  %v2942_v48 = vrot.slane %v2940_v13, 5 }
 0x230   : > { %2803 = vrot.lane.b32.xlu0 %v4507_v8, %s4864_s21  ;;  %v3152_v8 = vrot.slane %v3150_v9, 4  ;;  %v3499_v44 = vrot.slane %v3497_v47, 4 }
 0x231   : > { %v2357_v1 = vpop.permute.xlu1 %2356  ;;  %v2943_v49 = vsel %vm5138_vm2, %v2938_v46, %v2942_v48 }
 0x232   : > { %2425 = vst.msk [vmem:[#allocation2 + $0x70] sm:$0xf] %vm2396_vm10, %v2357_v1  ;;  %v2355_v51 = vpop.permute.xlu0 %2354  ;;  %v3153_v4 = vor.u32 %v3152_v8, %v3148_v17  ;;  %v4538_v1 = vrot.slane %v4510_v38, 9 }
 0x233   : > { %2424 = vst.msk [vmem:[#allocation2 + $0x6c] sm:$0xf] %vm2396_vm10, %v2355_v51  ;;  %3539 = vrot.lane.b32.xlu2 %v3431_v35, %s4865_s23 }
 0x234   : > { %v3154_v51 = vrot.slane %v3153_v4, 4  ;;  %v3498_v52 = vsel %vm5456_vm6, %v4538_v1, %v3497_v47  ;;  %v6564_v1 = vld [vmem:[%s5104_s11 + $0x20c] sm:$0x1] }
 0x235   : > { %v2564_v59 = vpop.permute.xlu2 %2563 }
 0x236   : > { %2657 = vst.msk [vmem:[#allocation2 + $0xc] sm:$0xf] %vm2653_vm11, %v2564_v59  ;;  %v2958_v59 = vshrl.u32 %v6505_v36, 16 }
 0x237   : > { %3573 = vrot.lane.b32.xlu1 %v3491_v27, %s4865_s23  ;;  %v3438_v27 = vsel %vm5456_vm6, %v3436_v5, %v3437_v15 }
 0x238   : > { %3318 = vrot.lane.b32.xlu0 %v3135_v57, %s4866_s24  ;;  %v3143_v57 = vor.u32 %v3142_v30, %v3139_v12 }
 0x239   : > { %v2363_v42 = vpop.permute.xlu1 %2362 }
 0x23a   : > { %2428 = vst.msk [vmem:[#allocation2 + $0x7c] sm:$0xf] %vm2396_vm10, %v2363_v42  ;;  %v2361_v25 = vpop.permute.xlu0 %2360  ;;  %v3144_v42 = vrot.slane %v3143_v57, 4  ;;  %v3180_v57 = vshll.u32 %v6564_v1, 16 }
 0x23b   : > { %2427 = vst.msk [vmem:[#allocation2 + $0x78] sm:$0xf] %vm2396_vm10, %v2361_v25  ;;  %3316 = vrot.lane.b32.xlu2 %v3125_v41, %s4866_s24  ;;  %v6519_v25 = vrot.slane %v2954_v6, 5  ;;  %v2945_v41 = vshrl.u32 %v4486_v24, 16 }
 0x23c   : > { %v3149_v13 = vsel %vm5138_vm2, %v3144_v42, %v3148_v17  ;;  %v3444_v42 = vrot.slane %v6525_v54, 5  ;;  %v4710_v54 = vld [vmem:[%s7301_s1 + $0x4] sm:$0xf] }
 0x23d   : > { %v2570_v26 = vpop.permute.xlu2 %2569  ;;  %v2947_v19 = vrot.slane %v2945_v41, 4  ;;  %v4612_v41 = vld [vmem:[%s7301_s1 + $0x8] sm:$0xf0] }
 0x23e   : > { %2660 = vst.msk [vmem:[#allocation2 + $0x18] sm:$0xf] %vm2653_vm11, %v2570_v26  ;;  %v3441_v26 = vrot.slane %v6505_v36, 5 }
 0x23f   : > { %2773 = vrot.lane.b32.xlu1 %v6439_v39, %s4864_s21  ;;  %v3158_v39 = vrot.slane %v3156_v23, 5  ;;  %v4513_v23 = vld [vmem:[%s5104_s11 + $0x204] sm:$0xf] }
 0x240   : > { %2771 = vrot.lane.b32.xlu0 %v4483_v14, %s4864_s21  ;;  %v2960_v14 = vrot.slane %v2958_v59, 4  ;;  %v3161_v15 = vshrl.u32 %v4513_v23, 16  ;;  %v3164_v47 = vshll.u32 %v4513_v23, 16  ;;  %v3443_v59 = vrot.slane %v3441_v26, 4 }
 0x241   : > { %v2562_v37 = vpop.permute.xlu1 %2561  ;;  %v3159_v61 = vsel %vm5138_vm2, %v3154_v51, %v3158_v39  ;;  %v4713_v51 = vld [vmem:[%s7301_s1 + $0x14] sm:$0xf0] }
 0x242   : > { %2656 = vst.msk [vmem:[#allocation2 + $0x8] sm:$0xf] %vm2653_vm11, %v2562_v37  ;;  %v2560_v21 = vpop.permute.xlu0 %2559  ;;  %v2961_v10 = vor.u32 %v2960_v14, %v6519_v25  ;;  %v4530_v37 = vrot.slane %v4486_v24, 9  ;;  %v3166_v6 = vrot.slane %v3164_v47, 5  ;;  %v4539_v14 = vrot.slane %v4513_v23, 9 }
 0x243   : > { %2655 = vst.msk [vmem:[#allocation2 + $0x4] sm:$0xf] %vm2653_vm11, %v2560_v21  ;;  %3575 = vrot.lane.b32.xlu2 %v3494_v28, %s4865_s23  ;;  %v6540_v28 = vld [vmem:[%s5104_s11 + $0x208] sm:$0xf]  ;;  %v6643_v47 = vld [vmem:[%s5104_s11 + $0x210] sm:$0xf] }
 0x244   : > { %v2962_v21 = vrot.slane %v2961_v10, 4  ;;  %v3442_v62 = vsel %vm5456_vm6, %v4530_v37, %v3441_v26  ;;  %v3170_v9 = vshll.u32 %v6540_v28, 16  ;;  %v3174_v58 = vshrl.u32 %v6540_v28, 16 }
 0x245   : > { %v2576_v40 = vpop.permute.xlu2 %2575  ;;  %v3182_v10 = vrot.slane %v3180_v57, 5 }
 0x246   : > { %2663 = vst.msk [vmem:[#allocation2 + $0x24] sm:$0xf] %vm2653_vm11, %v2576_v40  ;;  %v3702_v40 = vld [vmem:[%s7301_s1 + $0x20] sm:$0x33]  ;;  %v6558_v43 = vrot.slane %v3170_v9, 5  ;;  %v3176_v2 = vrot.slane %v3174_v58, 4 }
 0x247   : > { %3541 = vrot.lane.b32.xlu1 %v3435_v45, %s4865_s23  ;;  %v3501_v45 = vsel %vm5456_vm6, %v3499_v44, %v3500_v31  ;;  %v3802_v17 = vunpack.c.l.b16 %v3702_v40  ;;  %v3803_v8 = vunpack.c.h.b16 %v3702_v40  ;;  %v3445_v44 = vsel %vm5456_vm6, %v3443_v59, %v3444_v42  ;;  %v6624_v9 = vld [vmem:[%s5104_s11 + $0x1ac] sm:$0x1] }
 0x248   : > { %3286 = vrot.lane.b32.xlu0 %v2943_v49, %s4866_s24  ;;  %v2951_v49 = vor.u32 %v2950_v7, %v2947_v19  ;;  %v6605_v7 = vld [vmem:[%s5104_s11 + $0x1a8] sm:$0xf] }
 0x249   : > { %v2568_v29 = vpop.permute.xlu1 %2567  ;;  %v3809_v22 = vpack.c.b16 %v3803_v8, %v3803_v8  ;;  %v2988_v8 = vshll.u32 %v6624_v9, 16 }
 0x24a   : > { %2659 = vst.msk [vmem:[#allocation2 + $0x14] sm:$0xf] %vm2653_vm11, %v2568_v29  ;;  %v2566_v60 = vpop.permute.xlu0 %2565 }
 0x24b   : > { %2658 = vst.msk [vmem:[#allocation2 + $0x10] sm:$0xf] %vm2653_vm11, %v2566_v60  ;;  %3284 = vrot.lane.b32.xlu2 %v2933_v0, %s4866_s24  ;;  %v2952_v60 = vrot.slane %v2951_v49, 4  ;;  %v3868_v30 = vsel %vm3863_vm12, %v3809_v22, 0 }
 0x24c   : > { %4719 = vmatpush.bf16.msra.mxu3 %v3868_v30  ;;  %3964 = vmatpush.bf16.msra.mxu1 %v3868_v30  ;;  %v2990_v30 = vrot.slane %v2988_v8, 5 }
 0x24d   : > { %v2582_v20 = vpop.permute.xlu2 %2581 }
 0x24e   : > { %2666 = vst.msk [vmem:[#allocation2 + $0x30] sm:$0xf] %vm2653_vm11, %v2582_v20  ;;  %v2957_v20 = vsel %vm5138_vm2, %v2952_v60, %v6519_v25  ;;  %v3504_v25 = vrot.slane %v6540_v28, 5 }
 0x24f   : > { %2809 = vrot.lane.b32.xlu1 %v6472_v34, %s4864_s21  ;;  %v2966_v34 = vrot.slane %v2964_v56, 5  ;;  %v4615_v56 = vor.u32 %v4710_v54, %v4612_v41  ;;  %v4787_v54 = vld [vmem:[%s5104_s11 + $0x158] sm:$0x1] }
 0x250   : > { %2807 = vrot.lane.b32.xlu0 %v4510_v38, %s4864_s21  ;;  %v3808_v38 = vpack.c.b16 %v3802_v17, %v3802_v17  ;;  %v3505_v26 = vsel %vm5456_vm6, %v4539_v14, %v3504_v25  ;;  %v3506_v22 = vrot.slane %v3504_v25, 4  ;;  %v2534_v41 = vrot.slane %v4787_v54, 5  ;;  %v6742_v54 = vld [vmem:[%s5104_s11 + $0x220] sm:$0xf] }
 0x251   : > { %v2574_v63 = vpop.permute.xlu1 %2573  ;;  %v2967_v29 = vsel %vm5138_vm2, %v2962_v21, %v2966_v34 }
 0x252   : > { %2662 = vst.msk [vmem:[#allocation2 + $0x20] sm:$0xf] %vm2653_vm11, %v2574_v63  ;;  %v2572_v35 = vpop.permute.xlu0 %2571  ;;  %v3865_v12 = vsel %vm3863_vm12, %v3808_v38, 0  ;;  %v4618_v63 = vld [vmem:[%s7301_s1 + $0x10] sm:$0xf] }
 0x253   : > { %2661 = vst.msk [vmem:[#allocation2 + $0x1c] sm:$0xf] %vm2653_vm11, %v2572_v35  ;;  %3543 = vrot.lane.b32.xlu2 %v3438_v27, %s4865_s23  ;;  %4716 = vmatpush.bf16.msra.mxu2 %v3865_v12  ;;  %v4619_v39 = vor.u32 %v4713_v51, %v4618_v63  ;;  %v4712_v35 = vld [vmem:[%s7301_s1 + $0x14] sm:$0xf]  ;;  %v3177_v27 = vor.u32 %v3176_v2, %v6558_v43  ;;  %v3507_v2 = vrot.slane %v6564_v1, 5 }
 0x254   : > { %3875 = vmatpush.bf16.msra.mxu0 %v3865_v12 }
 0x255   : > { %v2588_v11 = vpop.permute.xlu2 %2587  ;;  %v3508_v1 = vsel %vm5456_vm6, %v3506_v22, %v3507_v2 }
 0x256   : > { %2669 = vst.msk [vmem:[#allocation2 + $0x3c] sm:$0xf] %vm2653_vm11, %v2588_v11  ;;  %v4610_v11 = vld [vmem:[%s7301_s1] sm:$0xf] }
 0x257   : > { %3577 = vrot.lane.b32.xlu1 %v3498_v52, %s4865_s23  ;;  %4717 = vmatpush.bf16.msra.mxu2 %v4619_v39 }
 0x258   : > { %3322 = vrot.lane.b32.xlu0 %v3159_v61, %s4866_s24  ;;  %v3163_v61 = vrot.slane %v3161_v15, 4  ;;  %3876 = vmatpush.bf16.msra.mxu0 %v4619_v39 }
 0x259   : > { %v2580_v50 = vpop.permute.xlu1 %2579 }
 0x25a   : > { %2665 = vst.msk [vmem:[#allocation2 + $0x2c] sm:$0xf] %vm2653_vm11, %v2580_v50  ;;  %v2578_v16 = vpop.permute.xlu0 %2577  ;;  %v4711_v50 = vld [vmem:[%s7301_s1 + $0x4] sm:$0xf0]  ;;  %v3167_v31 = vor.u32 %v3166_v6, %v3163_v61  ;;  %v4786_v6 = vld [vmem:[%s5104_s11 + $0x15c] sm:$0xf] }
 0x25b   : > { %2664 = vst.msk [vmem:[#allocation2 + $0x28] sm:$0xf] %vm2653_vm11, %v2578_v16  ;;  %3320 = vrot.lane.b32.xlu2 %v3149_v13, %s4866_s24  ;;  %v3178_v13 = vrot.slane %v3177_v27, 4  ;;  %v3188_v27 = vshll.u32 %v6643_v47, 16  ;;  %v4477_v59 = vrot.slane %v4786_v6, 9 }
 0x25c   : > { %v3168_v21 = vrot.slane %v3167_v31, 4  ;;  %v3451_v31 = vrot.slane %v6624_v9, 5 }
 0x25d   : > { %v2594_v46 = vpop.permute.xlu2 %2593  ;;  %v3183_v37 = vsel %vm5138_vm2, %v3178_v13, %v3182_v10 }
 0x25e   : > { %2672 = vst.msk [vmem:[#allocation2 + $0x48] sm:$0xf] %vm2653_vm11, %v2594_v46  ;;  %v2978_v46 = vshll.u32 %v6605_v7, 16 }
 0x25f   : > { %2777 = vrot.lane.b32.xlu1 %v6505_v36, %s4864_s21  ;;  %v4620_v36 = vld [vmem:[%s7301_s1 + $0x18] sm:$0xf0] }
 0x260   : > { %2775 = vrot.lane.b32.xlu0 %v4486_v24, %s4864_s21  ;;  %v4623_v52 = vor.u32 %v4712_v35, %v4620_v36  ;;  %v4611_v24 = vor.u32 %v4711_v50, %v4610_v11  ;;  %v3185_v36 = vshrl.u32 %v6643_v47, 16 }
 0x261   : > { %v2586_v48 = vpop.permute.xlu1 %2585 }
 0x262   : > { %2668 = vst.msk [vmem:[#allocation2 + $0x38] sm:$0xf] %vm2653_vm11, %v2586_v48  ;;  %v2584_v55 = vpop.permute.xlu0 %2583  ;;  %4720 = vmatpush.bf16.msra.mxu3 %v4623_v52  ;;  %3965 = vmatpush.bf16.msra.mxu1 %v4623_v52  ;;  %v2982_v48 = vshrl.u32 %v6605_v7, 16  ;;  %v6660_v52 = vld [vmem:[%s5104_s11 + $0x160] sm:$0xf]  ;;  %v3187_v14 = vrot.slane %v3185_v36, 4 }
 0x263   : > { %2667 = vst.msk [vmem:[#allocation2 + $0x34] sm:$0xf] %vm2653_vm11, %v2584_v55  ;;  %3579 = vrot.lane.b32.xlu2 %v3501_v45, %s4865_s23  ;;  %4718 = vmatpush.bf16.msra.mxu2 %v4611_v24  ;;  %v6619_v55 = vrot.slane %v2978_v46, 5  ;;  %v2538_v61 = vrot.slane %v6660_v52, 5 }
 0x264   : > { %3877 = vmatpush.bf16.msra.mxu0 %v4611_v24  ;;  %v2984_v45 = vrot.slane %v2982_v48, 4  ;;  %v2533_v24 = vrot.slane %v2531_v53, 4 }
 0x265   : > { %v2600_v0 = vpop.permute.xlu2 %2599  ;;  %v6679_v18 = vsel %vm5456_vm6, %v4477_v59, %v2538_v61 }
 0x266   : > { %2675 = vst.msk [vmem:[#allocation2 + $0x54] sm:$0xf] %vm2653_vm11, %v2600_v0  ;;  %4721 = vmatpush.bf16.msra.mxu3 %v4615_v56  ;;  %3966 = vmatpush.bf16.msra.mxu1 %v4615_v56  ;;  %v2985_v17 = vor.u32 %v2984_v45, %v6619_v55  ;;  %v3448_v0 = vrot.slane %v6605_v7, 5  ;;  %v2535_v53 = vsel %vm5456_vm6, %v2533_v24, %v2534_v41 }
 0x267   : > { %3545 = vrot.lane.b32.xlu1 %v3442_v62, %s4865_s23  ;;  %v4489_v62 = vld [vmem:[%s5104_s11 + $0x1a4] sm:$0xf] }
 0x268   : > { %3290 = vrot.lane.b32.xlu0 %v2967_v29, %s4866_s24  ;;  %v2969_v58 = vshrl.u32 %v4489_v62, 16  ;;  %v2972_v40 = vshll.u32 %v4489_v62, 16  ;;  %v3173_v29 = vsel %vm5138_vm2, %v3168_v21, %v6558_v43  ;;  %v2986_v12 = vrot.slane %v2985_v17, 4 }
 0x269   : > { %v2592_v4 = vpop.permute.xlu1 %2591 }
 0x26a   : > { %2671 = vst.msk [vmem:[#allocation2 + $0x44] sm:$0xf] %vm2653_vm11, %v2592_v4  ;;  %v2590_v5 = vpop.permute.xlu0 %2589  ;;  %v2971_v60 = vrot.slane %v2969_v58, 4  ;;  %v2974_v38 = vrot.slane %v2972_v40, 5  ;;  %v4531_v4 = vrot.slane %v4489_v62, 9  ;;  %v2991_v35 = vsel %vm5138_vm2, %v2986_v12, %v2990_v30 }
 0x26b   : > { %2670 = vst.msk [vmem:[#allocation2 + $0x40] sm:$0xf] %vm2653_vm11, %v2590_v5  ;;  %3288 = vrot.lane.b32.xlu2 %v2957_v20, %s4866_s24  ;;  %v6639_v5 = vld [vmem:[%s5104_s11 + $0x214] sm:$0xf]  ;;  %v4494_v12 = vld [vmem:[%s5104_s11 + $0x1b8] sm:$0x1] }
 0x26c   : > { %v2975_v20 = vor.u32 %v2974_v38, %v2971_v60  ;;  %v3449_v63 = vsel %vm5456_vm6, %v4531_v4, %v3448_v0  ;;  %v3194_v51 = vshll.u32 %v6639_v5, 16  ;;  %v3198_v39 = vshrl.u32 %v6639_v5, 16 }
 0x26d   : > { %v2606_v16 = vpop.permute.xlu2 %2605  ;;  %v3511_v8 = vrot.slane %v6639_v5, 5 }
 0x26e   : > { %2678 = vst.msk [vmem:[#allocation2 + $0x60] sm:$0xf] %vm2653_vm11, %v2606_v16  ;;  %v2976_v57 = vrot.slane %v2975_v20, 4  ;;  %v3196_v11 = vrot.slane %v3194_v51, 5  ;;  %v3200_v50 = vrot.slane %v3198_v39, 4  ;;  %v3190_v16 = vrot.slane %v3188_v27, 5 }
 0x26f   : > { %2813 = vrot.lane.b32.xlu1 %v6540_v28, %s4864_s21  ;;  %v4540_v51 = vrot.slane %v6643_v47, 9 }
 0x270   : > { %2811 = vrot.lane.b32.xlu0 %v4513_v23, %s4864_s21  ;;  %v2981_v10 = vsel %vm5138_vm2, %v2976_v57, %v6619_v55  ;;  %v3201_v56 = vor.u32 %v3200_v50, %v3196_v11  ;;  %v6693_v55 = vld [vmem:[%s5104_s11 + $0x1b0] sm:$0xf] }
 0x271   : > { %v2598_v32 = vpop.permute.xlu1 %2597  ;;  %v2996_v17 = vshll.u32 %v6693_v55, 16 }
 0x272   : > { %2674 = vst.msk [vmem:[#allocation2 + $0x50] sm:$0xf] %vm2653_vm11, %v2598_v32  ;;  %v2596_v19 = vpop.permute.xlu0 %2595  ;;  %v4518_v32 = vld [vmem:[%s5104_s11 + $0x218] sm:$0x1] }
 0x273   : > { %2673 = vst.msk [vmem:[#allocation2 + $0x4c] sm:$0xf] %vm2653_vm11, %v2596_v19  ;;  %3547 = vrot.lane.b32.xlu2 %v3445_v44, %s4865_s23  ;;  %v3204_v19 = vshll.u32 %v4518_v32, 16  ;;  %v3450_v44 = vrot.slane %v3448_v0, 4  ;;  %v2998_v4 = vrot.slane %v2996_v17, 5 }
 0x275   : > { %v3313_v34 = vpop.permute.xlu2 %3312 }
 0x277   : > { %3581 = vrot.lane.b32.xlu1 %v3505_v26, %s4865_s23  ;;  %v3202_v26 = vrot.slane %v3201_v56, 4 }
 0x278   : > { %3326 = vrot.lane.b32.xlu0 %v3183_v37, %s4866_s24  ;;  %v3206_v37 = vrot.slane %v3204_v19, 5 }
 0x279   : > { %v2604_v28 = vpop.permute.xlu1 %2603 }
 0x27a   : > { %2677 = vst.msk [vmem:[#allocation2 + $0x5c] sm:$0xf] %vm2653_vm11, %v2604_v28  ;;  %v2602_v49 = vpop.permute.xlu0 %2601 }
 0x27b   : > { %2676 = vst.msk [vmem:[#allocation2 + $0x58] sm:$0xf] %vm2653_vm11, %v2602_v49  ;;  %3324 = vrot.lane.b32.xlu2 %v3173_v29, %s4866_s24  ;;  %v3452_v49 = vsel %vm5456_vm6, %v3450_v44, %v3451_v31  ;;  %v2993_v29 = vshrl.u32 %v6693_v55, 16  ;;  %v4519_v31 = vld [vmem:[%s5104_s11 + $0x21c] sm:$0xf] }
 0x27d   : > { %v3572_v43 = vpop.permute.xlu2 %3571  ;;  %v2995_v0 = vrot.slane %v2993_v29, 4 }
 0x27f   : > { %2781 = vrot.lane.b32.xlu1 %v6605_v7, %s4864_s21  ;;  %v3191_v7 = vor.u32 %v3190_v16, %v3187_v14  ;;  %v3458_v16 = vrot.slane %v4494_v12, 5 }
 0x280   : > { %2779 = vrot.lane.b32.xlu0 %v4489_v62, %s4864_s21  ;;  %v3207_v62 = vsel %vm5138_vm2, %v3202_v26, %v3206_v37  ;;  %v6761_v26 = vld [vmem:[%s5104_s11 + $0x224] sm:$0x1] }
 0x281   : > { %v2802_v23 = vpop.permute.xlu1 %2801  ;;  %v3192_v21 = vrot.slane %v3191_v7, 4 }
 0x282   : > { %2881 = vst.msk [vmem:[#allocation2 + $0x44] sm:$0xf] %vm2863_vm13, %v2802_v23  ;;  %v2800_v15 = vpop.permute.xlu0 %2799  ;;  %v3514_v23 = vrot.slane %v4518_v32, 5  ;;  %v3218_v32 = vshll.u32 %v6742_v54, 16 }
 0x283   : > { %2880 = vst.msk [vmem:[#allocation2 + $0x40] sm:$0xf] %vm2863_vm13, %v2800_v15  ;;  %3583 = vrot.lane.b32.xlu2 %v3508_v1, %s4865_s23  ;;  %v3197_v40 = vsel %vm5138_vm2, %v3192_v21, %v3196_v11  ;;  %v3012_v1 = vshll.u32 %v4494_v12, 16 }
 0x284   : > { %3393 = vst.msk [vmem:[#allocation2 + $0x40] sm:$0xf] %vm3376_vm14, %v3313_v34  ;;  %v6689_v34 = vld [vmem:[%s5104_s11 + $0x1b4] sm:$0xf] }
 0x285   : > { %v3281_v42 = vpop.permute.xlu2 %3280  ;;  %v3002_v9 = vshll.u32 %v6689_v34, 16  ;;  %v3006_v58 = vshrl.u32 %v6689_v34, 16  ;;  %v3455_v11 = vrot.slane %v6689_v34, 5 }
 0x287   : > { %3549 = vrot.lane.b32.xlu1 %v3449_v63, %s4865_s23  ;;  %v3004_v38 = vrot.slane %v3002_v9, 5  ;;  %v3008_v22 = vrot.slane %v3006_v58, 4  ;;  %v2999_v63 = vor.u32 %v2998_v4, %v2995_v0  ;;  %v3457_v14 = vrot.slane %v3455_v11, 4 }
 0x288   : > { %3294 = vrot.lane.b32.xlu0 %v2991_v35, %s4866_s24  ;;  %v3014_v35 = vrot.slane %v3012_v1, 5  ;;  %v3518_v9 = vrot.slane %v6742_v54, 5  ;;  %v4541_v58 = vrot.slane %v4519_v31, 9 }
 0x289   : > { %v3570_v25 = vpop.permute.xlu1 %3569  ;;  %v3009_v15 = vor.u32 %v3008_v22, %v3004_v38  ;;  %v3000_v57 = vrot.slane %v2999_v63, 4  ;;  %v3459_v41 = vsel %vm5456_vm6, %v3457_v14, %v3458_v16  ;;  %v6801_v63 = vld [vmem:[%s5104_s11 + $0x1c4] sm:$0x1] }
 0x28a   : > { %3650 = vst.msk [vmem:[#allocation2 + $0x40] sm:$0xf] %vm3633_vm15, %v3570_v25  ;;  %v3315_v13 = vpop.permute.xlu0 %3314  ;;  %v3519_v22 = vsel %vm5456_vm6, %v4541_v58, %v3518_v9 }
 0x28b   : > { %3394 = vst.msk [vmem:[#allocation2 + $0x44] sm:$0xf] %vm3376_vm14, %v3315_v13  ;;  %3292 = vrot.lane.b32.xlu2 %v2981_v10, %s4866_s24  ;;  %v3010_v39 = vrot.slane %v3009_v15, 4  ;;  %v3222_v13 = vshrl.u32 %v6742_v54, 16  ;;  %v4532_v10 = vrot.slane %v6693_v55, 9 }
 0x28c   : > { %3651 = vst.msk [vmem:[#allocation2 + $0x44] sm:$0xf] %vm3633_vm15, %v3572_v43  ;;  %v3513_v43 = vrot.slane %v3511_v8, 4 }
 0x28d   : > { %v3540_v46 = vpop.permute.xlu2 %3539  ;;  %v3224_v7 = vrot.slane %v3222_v13, 4  ;;  %v4789_v13 = vld [vmem:[%s5104_s11 + $0x16c] sm:$0xf] }
 0x28e   : > { %v3515_v20 = vsel %vm5456_vm6, %v3513_v43, %v3514_v23 }
 0x28f   : > { %2815 = vrot.lane.b32.xlu1 %v6643_v47, %s4864_s21  ;;  %v3015_v47 = vsel %vm5138_vm2, %v3010_v39, %v3014_v35 }
 0x290   : > { %2607 = vrot.lane.b32.xlu0 %v2535_v53, %s4863_s16  ;;  %v6756_v53 = vrot.slane %v3218_v32, 5 }
 0x291   : > { %v2770_v48 = vpop.permute.xlu1 %2769 }
 0x292   : > { %2865 = vst.msk [vmem:[#allocation2 + $0x4] sm:$0xf] %vm2863_vm13, %v2770_v48  ;;  %v2768_v28 = vpop.permute.xlu0 %2767  ;;  %v3212_v48 = vshll.u32 %v4519_v31, 16  ;;  %v3225_v21 = vor.u32 %v3224_v7, %v6756_v53 }
 0x293   : > { %2864 = vst.msk [vmem:[#allocation2] sm:$0xf] %vm2863_vm13, %v2768_v28  ;;  %v4702_v45 = vld [vmem:[#allocation2 + $0x40] sm:$0xff]  ;;  %3551 = vrot.lane.b32.xlu2 %v3452_v49, %s4865_s23 }
 0x294   : > { %3377 = vst.msk [vmem:[#allocation2] sm:$0xf] %vm3376_vm14, %v3281_v42  ;;  %4632 = vmatmul.msk.bf16.vlgmr.msra.gmra.mxu2 %vm3814_vm0, %v4702_v45  ;;  %4648 = vmatmul.msk.bf16.vlgmr.msra.gmra.mxu3 %vm3814_vm0, %v4702_v45  ;;  %v3005_v42 = vsel %vm5138_vm2, %v3000_v57, %v3004_v38  ;;  %v2540_v45 = vrot.slane %v2538_v61, 4  ;;  %v4788_v49 = vld [vmem:[%s5104_s11 + $0x164] sm:$0x1]  ;;  %v3226_v17 = vrot.slane %v3225_v21, 4 }
 0x295   : > { %v3317_v60 = vpop.permute.xlu2 %3316  ;;  %v6781_v38 = vld [vmem:[%s5104_s11 + $0x1c0] sm:$0xf]  ;;  %v3036_v57 = vshll.u32 %v6801_v63, 16  ;;  %v4791_v21 = vld [vmem:[%s5104_s11 + $0x168] sm:$0xf] }
 0x296   : > { %v3026_v0 = vshll.u32 %v6781_v38, 16  ;;  %v3030_v4 = vshrl.u32 %v6781_v38, 16 }
 0x297   : > { %3330 = vrot.lane.b32.xlu1 %v3207_v62, %s4866_s24  ;;  %v2541_v62 = vrot.slane %v4788_v49, 5  ;;  %v3038_v16 = vrot.slane %v3036_v57, 5  ;;  %v4499_v57 = vld [vmem:[%s5104_s11 + $0x1cc] sm:$0xf] }
 0x298   : > { %3328 = vrot.lane.b32.xlu0 %v3197_v40, %s4866_s24  ;;  %v3032_v15 = vrot.slane %v3030_v4, 4 }
 0x299   : > { %v3538_v2 = vpop.permute.xlu1 %3537  ;;  %v2542_v52 = vsel %vm5456_vm6, %v2540_v45, %v2541_v62 }
 0x29a   : > { %3634 = vst.msk [vmem:[#allocation2] sm:$0xf] %vm3633_vm15, %v3538_v2  ;;  %v3283_v30 = vpop.permute.xlu0 %3282 }
 0x29b   : > { %3378 = vst.msk [vmem:[#allocation2 + $0x4] sm:$0xf] %vm3376_vm14, %v3283_v30  ;;  %2817 = vrot.lane.b32.xlu2 %v6639_v5, %s4864_s21  ;;  %v3512_v5 = vsel %vm5456_vm6, %v4540_v51, %v3511_v8  ;;  %v6796_v30 = vrot.slane %v3026_v0, 5 }
 0x29c   : > { %3635 = vst.msk [vmem:[#allocation2 + $0x4] sm:$0xf] %vm3633_vm15, %v3540_v46  ;;  %v3209_v46 = vshrl.u32 %v4519_v31, 16 }
 0x29d   : > { %v3576_v36 = vpop.permute.xlu2 %3575 }
 0x29e   : > { %v3211_v28 = vrot.slane %v3209_v46, 4 }
 0x29f   : > { %2783 = vrot.lane.b32.xlu1 %v6693_v55, %s4864_s21  ;;  %v3214_v55 = vrot.slane %v3212_v48, 5 }
 0x2a0   : > { %3587 = vrot.lane.b32.xlu0 %v3515_v20, %s4865_s23  ;;  %v4495_v20 = vld [vmem:[%s5104_s11 + $0x1bc] sm:$0xf] }
 0x2a1   : > { %v2806_v27 = vpop.permute.xlu1 %2805  ;;  %v3215_v61 = vor.u32 %v3214_v55, %v3211_v28  ;;  %v3017_v39 = vshrl.u32 %v4495_v20, 16  ;;  %v3020_v35 = vshll.u32 %v4495_v20, 16  ;;  %v4523_v55 = vld [vmem:[%s5104_s11 + $0x22c] sm:$0xf] }
 0x2a2   : > { %2883 = vst.msk [vmem:[#allocation2 + $0x4c] sm:$0xf] %vm2863_vm13, %v2806_v27  ;;  %v2804_v6 = vpop.permute.xlu0 %2803  ;;  %v3033_v27 = vor.u32 %v3032_v15, %v6796_v30  ;;  %v3246_v4 = vshrl.u32 %v4523_v55, 16  ;;  %v4524_v15 = vld [vmem:[%s5104_s11 + $0x230] sm:$0x1] }
 0x2a3   : > { %2882 = vst.msk [vmem:[#allocation2 + $0x48] sm:$0xf] %vm2863_vm13, %v2804_v6  ;;  %v4694_v59 = vld [vmem:[#allocation2] sm:$0xff]  ;;  %3585 = vrot.lane.b32.xlu2 %v3512_v5, %s4865_s23  ;;  %v3216_v43 = vrot.slane %v3215_v61, 4  ;;  %v3019_v6 = vrot.slane %v3017_v39, 4  ;;  %v3520_v5 = vrot.slane %v3518_v9, 4 }
 0x2a4   : > { %3395 = vst.msk [vmem:[#allocation2 + $0x48] sm:$0xf] %vm3376_vm14, %v3317_v60  ;;  %4624 = vmatmul.msk.bf16.vlgmr.msra.gmra.mxu0 %vm3814_vm0, %v4694_v59  ;;  %4640 = vmatmul.msk.bf16.vlgmr.msra.gmra.mxu1 %vm3814_vm0, %v4694_v59  ;;  %v3022_v59 = vrot.slane %v3020_v35, 5  ;;  %v3034_v14 = vrot.slane %v3033_v27, 4 }
 0x2a5   : > { %v3285_v50 = vpop.permute.xlu2 %3284 }
 0x2a6   : > { %v3023_v32 = vor.u32 %v3022_v59, %v3019_v6  ;;  %v3039_v7 = vsel %vm5138_vm2, %v3034_v14, %v3038_v16 }
 0x2a7   : > { %3298 = vrot.lane.b32.xlu1 %v3015_v47, %s4866_s24  ;;  %v3521_v47 = vrot.slane %v6761_v26, 5 }
 0x2a8   : > { %3296 = vrot.lane.b32.xlu0 %v3005_v42, %s4866_s24  ;;  %v3462_v42 = vrot.slane %v6781_v38, 5 }
 0x2a9   : > { %v3574_v25 = vpop.permute.xlu1 %3573 }
 0x2aa   : > { %3652 = vst.msk [vmem:[#allocation2 + $0x48] sm:$0xf] %vm3633_vm15, %v3574_v25  ;;  %v3319_v24 = vpop.permute.xlu0 %3318 }
 0x2ab   : > { %3396 = vst.msk [vmem:[#allocation2 + $0x4c] sm:$0xf] %vm3376_vm14, %v3319_v24  ;;  %2785 = vrot.lane.b32.xlu2 %v6689_v34, %s4864_s21  ;;  %v3228_v34 = vshll.u32 %v6761_v26, 16  ;;  %v6819_v24 = vld [vmem:[%s5104_s11 + $0x228] sm:$0xf] }
 0x2ac   : > { %3653 = vst.msk [vmem:[#allocation2 + $0x4c] sm:$0xf] %vm3633_vm15, %v3576_v36  ;;  %v3221_v36 = vsel %vm5138_vm2, %v3216_v43, %v6756_v53  ;;  %v3236_v53 = vshll.u32 %v6819_v24, 16  ;;  %v4790_v26 = vld [vmem:[%s5104_s11 + $0x170] sm:$0x1]  ;;  %v4542_v27 = vrot.slane %v6819_v24, 9 }
 0x2ad   : > { %v3544_v56 = vpop.permute.xlu2 %3543  ;;  %v3230_v8 = vrot.slane %v3228_v34, 5  ;;  %v4478_v34 = vrot.slane %v4791_v21, 9 }
 0x2af   : > { %2609 = vrot.lane.b32.xlu1 %v6679_v18, %s4863_s16  ;;  %v3456_v18 = vsel %vm5456_vm6, %v4532_v10, %v3455_v11  ;;  %v3231_v2 = vsel %vm5138_vm2, %v3226_v17, %v3230_v8  ;;  %v4533_v11 = vrot.slane %v4495_v20, 9  ;;  %v2545_v10 = vrot.slane %v4789_v13, 5 }
 0x2b0   : > { %3555 = vrot.lane.b32.xlu0 %v3459_v41, %s4865_s23  ;;  %v3522_v41 = vsel %vm5456_vm6, %v3520_v5, %v3521_v47  ;;  %v3464_v17 = vrot.slane %v3462_v42, 4  ;;  %v3465_v8 = vrot.slane %v6801_v63, 5  ;;  %v3528_v63 = vrot.slane %v4524_v15, 5 }
 0x2b1   : > { %v2774_v19 = vpop.permute.xlu1 %2773  ;;  %v3252_v47 = vshll.u32 %v4524_v15, 16 }
 0x2b2   : > { %2867 = vst.msk [vmem:[#allocation2 + $0xc] sm:$0xf] %vm2863_vm13, %v2774_v19  ;;  %v2772_v44 = vpop.permute.xlu0 %2771  ;;  %v3233_v19 = vshrl.u32 %v6819_v24, 16  ;;  %v3466_v0 = vsel %vm5456_vm6, %v3464_v17, %v3465_v8 }
 0x2b3   : > { %2866 = vst.msk [vmem:[#allocation2 + $0x8] sm:$0xf] %vm2863_vm13, %v2772_v44  ;;  %v4703_v37 = vld [vmem:[#allocation2 + $0x48] sm:$0xff]  ;;  %3553 = vrot.lane.b32.xlu2 %v3456_v18, %s4865_s23  ;;  %v3024_v44 = vrot.slane %v3023_v32, 4  ;;  %v3238_v18 = vrot.slane %v3236_v53, 5  ;;  %v3254_v16 = vrot.slane %v3252_v47, 5 }
 0x2b4   : > { %3379 = vst.msk [vmem:[#allocation2 + $0x8] sm:$0xf] %vm3376_vm14, %v3285_v50  ;;  %4633 = vmatmul.msk.bf16.gmra.mxu2 %vm3814_vm0, %v4703_v37  ;;  %4649 = vmatmul.msk.bf16.gmra.mxu3 %vm3814_vm0, %v4703_v37  ;;  %v2548_v37 = vrot.slane %v4790_v26, 5  ;;  %v3235_v48 = vrot.slane %v3233_v19, 4  ;;  %v3469_v53 = vrot.slane %v4499_v57, 5 }
 0x2b5   : > { %v3321_v40 = vpop.permute.xlu2 %3320  ;;  %v3029_v62 = vsel %vm5138_vm2, %v3024_v44, %v6796_v30  ;;  %v4792_v44 = vld [vmem:[%s5104_s11 + $0x174] sm:$0xf] }
 0x2b6   : > { %v3239_v58 = vor.u32 %v3238_v18, %v3235_v48  ;;  %v4793_v18 = vld [vmem:[%s5104_s11 + $0x178] sm:$0xf] }
 0x2b7   : > { %2821 = vrot.lane.b32.xlu1 %v6742_v54, %s4864_s21  ;;  %v2552_v21 = vrot.slane %v4793_v18, 5 }
 0x2b8   : > { %2819 = vrot.lane.b32.xlu0 %v4519_v31, %s4864_s21  ;;  %v2547_v31 = vrot.slane %v2545_v10, 4 }
 0x2b9   : > { %v3542_v29 = vpop.permute.xlu1 %3541 }
 0x2ba   : > { %3636 = vst.msk [vmem:[#allocation2 + $0x8] sm:$0xf] %vm3633_vm15, %v3542_v29  ;;  %v3287_v60 = vpop.permute.xlu0 %3286  ;;  %v2549_v9 = vsel %vm5456_vm6, %v2547_v31, %v2548_v37  ;;  %v2546_v29 = vsel %vm5456_vm6, %v4478_v34, %v2545_v10  ;;  %v4479_v31 = vrot.slane %v4792_v44, 9  ;;  %v3471_v37 = vrot.slane %v3469_v53, 4 }
 0x2bb   : > { %3380 = vst.msk [vmem:[#allocation2 + $0xc] sm:$0xf] %vm3376_vm14, %v3287_v60  ;;  %2611 = vrot.lane.b32.xlu2 %v2542_v52, %s4863_s16  ;;  %v3240_v60 = vrot.slane %v3239_v58, 4 }
 0x2bc   : > { %3637 = vst.msk [vmem:[#allocation2 + $0xc] sm:$0xf] %vm3633_vm15, %v3544_v56  ;;  %v3463_v56 = vsel %vm5456_vm6, %v4533_v11, %v3462_v42 }
 0x2bd   : > { %v3580_v23 = vpop.permute.xlu2 %3579 }
 0x2bf   : > { %3589 = vrot.lane.b32.xlu1 %v3519_v22, %s4865_s23  ;;  %v6856_v22 = vld [vmem:[%s5104_s11 + $0x1c8] sm:$0xf] }
 0x2c0   : > { %3334 = vrot.lane.b32.xlu0 %v3231_v2, %s4866_s24  ;;  %v3044_v30 = vshll.u32 %v6856_v22, 16 }
 0x2c1   : > { %v2810_v12 = vpop.permute.xlu1 %2809 }
 0x2c2   : > { %2885 = vst.msk [vmem:[#allocation2 + $0x54] sm:$0xf] %vm2863_vm13, %v2810_v12  ;;  %v2808_v1 = vpop.permute.xlu0 %2807  ;;  %v3041_v12 = vshrl.u32 %v6856_v22, 16  ;;  %v3046_v35 = vrot.slane %v3044_v30, 5 }
 0x2c3   : > { %2884 = vst.msk [vmem:[#allocation2 + $0x50] sm:$0xf] %vm2863_vm13, %v2808_v1  ;;  %v4695_v51 = vld [vmem:[#allocation2 + $0x8] sm:$0xff]  ;;  %3332 = vrot.lane.b32.xlu2 %v3221_v36, %s4866_s24  ;;  %v3248_v1 = vrot.slane %v3246_v4, 4 }
 0x2c4   : > { %3397 = vst.msk [vmem:[#allocation2 + $0x50] sm:$0xf] %vm3376_vm14, %v3321_v40  ;;  %4625 = vmatmul.msk.bf16.gmra.mxu0 %vm3814_vm0, %v4695_v51  ;;  %4641 = vmatmul.msk.bf16.gmra.mxu1 %vm3814_vm0, %v4695_v51  ;;  %v3242_v40 = vshll.u32 %v4523_v55, 16  ;;  %v3043_v39 = vrot.slane %v3041_v12, 4  ;;  %v4794_v12 = vld [vmem:[%s5104_s11 + $0x17c] sm:$0x1] }
 0x2c5   : > { %v3289_v50 = vpop.permute.xlu2 %3288  ;;  %v2555_v30 = vrot.slane %v4794_v12, 5 }
 0x2c6   : > { %v3047_v11 = vor.u32 %v3046_v35, %v3043_v39 }
 0x2c7   : > { %2789 = vrot.lane.b32.xlu1 %v6781_v38, %s4864_s21  ;;  %v3244_v38 = vrot.slane %v3242_v40, 5  ;;  %v2553_v40 = vsel %vm5456_vm6, %v4479_v31, %v2552_v21 }
 0x2c8   : > { %2787 = vrot.lane.b32.xlu0 %v4495_v20, %s4864_s21 }
 0x2c9   : > { %v3578_v25 = vpop.permute.xlu1 %3577  ;;  %v3245_v43 = vsel %vm5138_vm2, %v3240_v60, %v3244_v38  ;;  %v3249_v5 = vor.u32 %v3248_v1, %v3244_v38 }
 0x2ca   : > { %3654 = vst.msk [vmem:[#allocation2 + $0x50] sm:$0xf] %vm3633_vm15, %v3578_v25  ;;  %v3323_v54 = vpop.permute.xlu0 %3322 }
 0x2cb   : > { %3398 = vst.msk [vmem:[#allocation2 + $0x54] sm:$0xf] %vm3376_vm14, %v3323_v54  ;;  %3591 = vrot.lane.b32.xlu2 %v3522_v41, %s4865_s23  ;;  %v3250_v14 = vrot.slane %v3249_v5, 4  ;;  %v3048_v54 = vrot.slane %v3047_v11, 4  ;;  %v6940_v11 = vld [vmem:[%s5104_s11 + $0x1d4] sm:$0xf] }
 0x2cc   : > { %3655 = vst.msk [vmem:[#allocation2 + $0x54] sm:$0xf] %vm3633_vm15, %v3580_v23  ;;  %v3525_v23 = vrot.slane %v4523_v55, 5 }
 0x2cd   : > { %v3548_v46 = vpop.permute.xlu2 %3547 }
 0x2ce   : > { %v3527_v20 = vrot.slane %v3525_v23, 4  ;;  %v3526_v25 = vsel %vm5456_vm6, %v4542_v27, %v3525_v23  ;;  %v2554_v23 = vrot.slane %v2552_v21, 4 }
 0x2cf   : > { %3557 = vrot.lane.b32.xlu1 %v3463_v56, %s4865_s23  ;;  %v3054_v56 = vshrl.u32 %v4499_v57, 16 }
 0x2d0   : > { %3302 = vrot.lane.b32.xlu0 %v3039_v7, %s4866_s24  ;;  %v3529_v42 = vsel %vm5456_vm6, %v3527_v20, %v3528_v63  ;;  %v4500_v7 = vld [vmem:[%s5104_s11 + $0x1d0] sm:$0x1]  ;;  %v4527_v20 = vld [vmem:[%s5104_s11 + $0x23c] sm:$0x1] }
 0x2d1   : > { %v2778_v28 = vpop.permute.xlu1 %2777  ;;  %v3056_v26 = vrot.slane %v3054_v56, 4  ;;  %v3060_v58 = vshll.u32 %v4500_v7, 16  ;;  %v3276_v35 = vshll.u32 %v4527_v20, 16  ;;  %v3535_v56 = vrot.slane %v4527_v20, 5 }
 0x2d2   : > { %2869 = vst.msk [vmem:[#allocation2 + $0x14] sm:$0xf] %vm2863_vm13, %v2778_v28  ;;  %v2776_v45 = vpop.permute.xlu0 %2775  ;;  %v4534_v28 = vrot.slane %v6856_v22, 9 }
 0x2d3   : > { %2868 = vst.msk [vmem:[#allocation2 + $0x10] sm:$0xf] %vm2863_vm13, %v2776_v45  ;;  %v4704_v49 = vld [vmem:[#allocation2 + $0x50] sm:$0xff]  ;;  %3300 = vrot.lane.b32.xlu2 %v3029_v62, %s4866_s24  ;;  %v6906_v62 = vld [vmem:[%s5104_s11 + $0x238] sm:$0xf] }
 0x2d4   : > { %3381 = vst.msk [vmem:[#allocation2 + $0x10] sm:$0xf] %vm3376_vm14, %v3289_v50  ;;  %4634 = vmatmul.msk.bf16.gmra.mxu2 %vm3814_vm0, %v4704_v49  ;;  %4650 = vmatmul.msk.bf16.gmra.mxu3 %vm3814_vm0, %v4704_v49  ;;  %v3050_v50 = vshll.u32 %v4499_v57, 16  ;;  %v6902_v45 = vld [vmem:[%s5104_s11 + $0x234] sm:$0xf]  ;;  %v3270_v17 = vshrl.u32 %v6906_v62, 16  ;;  %v3470_v8 = vsel %vm5456_vm6, %v4534_v28, %v3469_v53 }
 0x2d5   : > { %v3325_v52 = vpop.permute.xlu2 %3324  ;;  %v3257_v60 = vshrl.u32 %v6902_v45, 16  ;;  %v3260_v38 = vshll.u32 %v6902_v45, 16  ;;  %v4543_v28 = vrot.slane %v6902_v45, 9 }
 0x2d6   : > { %v3052_v41 = vrot.slane %v3050_v50, 5  ;;  %v3272_v4 = vrot.slane %v3270_v17, 4 }
 0x2d7   : > { %2615 = vrot.lane.b32.xlu1 %v2549_v9, %s4863_s16  ;;  %v3259_v15 = vrot.slane %v3257_v60, 4  ;;  %v3262_v1 = vrot.slane %v3260_v38, 5 }
 0x2d8   : > { %2613 = vrot.lane.b32.xlu0 %v2546_v29, %s4863_s16  ;;  %v3053_v19 = vsel %vm5138_vm2, %v3048_v54, %v3052_v41  ;;  %v3057_v9 = vor.u32 %v3056_v26, %v3052_v41  ;;  %v4503_v26 = vld [vmem:[%s5104_s11 + $0x1dc] sm:$0x1] }
 0x2d9   : > { %v3546_v61 = vpop.permute.xlu1 %3545  ;;  %v3263_v27 = vor.u32 %v3262_v1, %v3259_v15  ;;  %v3084_v18 = vshll.u32 %v4503_v26, 16  ;;  %v3479_v12 = vrot.slane %v4503_v26, 5 }
 0x2da   : > { %3638 = vst.msk [vmem:[#allocation2 + $0x10] sm:$0xf] %vm3633_vm15, %v3546_v61  ;;  %v3291_v2 = vpop.permute.xlu0 %3290  ;;  %v3058_v61 = vrot.slane %v3057_v9, 4 }
 0x2db   : > { %3382 = vst.msk [vmem:[#allocation2 + $0x14] sm:$0xf] %vm3376_vm14, %v3291_v2  ;;  %3559 = vrot.lane.b32.xlu2 %v3466_v0, %s4865_s23  ;;  %v3062_v2 = vrot.slane %v3060_v58, 5  ;;  %v3264_v47 = vrot.slane %v3263_v27, 4  ;;  %v3086_v9 = vrot.slane %v3084_v18, 5 }
 0x2dc   : > { %3639 = vst.msk [vmem:[#allocation2 + $0x14] sm:$0xf] %vm3633_vm15, %v3548_v46  ;;  %v3472_v46 = vrot.slane %v4500_v7, 5 }
 0x2dd   : > { %v3584_v51 = vpop.permute.xlu2 %3583 }
 0x2de   : > { %v3473_v29 = vsel %vm5456_vm6, %v3471_v37, %v3472_v46 }
 0x2df   : > { %3336 = vrot.lane.b32.xlu1 %v3245_v43, %s4866_s24 }
 0x2e0   : > { %2825 = vrot.lane.b32.xlu0 %v4523_v55, %s4864_s21 }
 0x2e1   : > { %v2814_v36 = vpop.permute.xlu1 %2813 }
 0x2e2   : > { %2887 = vst.msk [vmem:[#allocation2 + $0x5c] sm:$0xf] %vm2863_vm13, %v2814_v36  ;;  %v2812_v6 = vpop.permute.xlu0 %2811  ;;  %v2556_v36 = vsel %vm5456_vm6, %v2554_v23, %v2555_v30 }
 0x2e3   : > { %2886 = vst.msk [vmem:[#allocation2 + $0x58] sm:$0xf] %vm2863_vm13, %v2812_v6  ;;  %v4696_v59 = vld [vmem:[#allocation2 + $0x10] sm:$0xff]  ;;  %2823 = vrot.lane.b32.xlu2 %v6819_v24, %s4864_s21  ;;  %v3255_v24 = vsel %vm5138_vm2, %v3250_v14, %v3254_v16  ;;  %v3532_v16 = vrot.slane %v6906_v62, 5 }
 0x2e4   : > { %3399 = vst.msk [vmem:[#allocation2 + $0x58] sm:$0xf] %vm3376_vm14, %v3325_v52  ;;  %4626 = vmatmul.msk.bf16.gmra.mxu0 %vm3814_vm0, %v4696_v59  ;;  %4642 = vmatmul.msk.bf16.gmra.mxu1 %vm3814_vm0, %v4696_v59  ;;  %v3266_v52 = vshll.u32 %v6906_v62, 16  ;;  %v3278_v59 = vrot.slane %v3276_v35, 5  ;;  %v4535_v35 = vrot.slane %v6940_v11, 9 }
 0x2e5   : > { %v3293_v32 = vpop.permute.xlu2 %3292 }
 0x2e6   : > { %v3268_v63 = vrot.slane %v3266_v52, 5 }
 0x2e7   : > { %3595 = vrot.lane.b32.xlu1 %v3529_v42, %s4865_s23 }
 0x2e8   : > { %3593 = vrot.lane.b32.xlu0 %v3526_v25, %s4865_s23  ;;  %v3273_v39 = vor.u32 %v3272_v4, %v3268_v63  ;;  %v6944_v25 = vld [vmem:[%s5104_s11 + $0x1d8] sm:$0xf]  ;;  %v3269_v41 = vsel %vm5138_vm2, %v3264_v47, %v3268_v63  ;;  %s4048_s11 = sld [smem:[#allocation3]] }
 0x2e9   : > { %v3582_v13 = vpop.permute.xlu1 %3581  ;;  %v3078_v54 = vshrl.u32 %v6944_v25, 16  ;;  %v3476_v52 = vrot.slane %v6944_v25, 5 }
 0x2ea   : > { %3656 = vst.msk [vmem:[#allocation2 + $0x58] sm:$0xf] %vm3633_vm15, %v3582_v13  ;;  %v3327_v10 = vpop.permute.xlu0 %3326  ;;  %v3274_v6 = vrot.slane %v3273_v39, 4  ;;  %v3068_v13 = vshll.u32 %v6940_v11, 16 }
 0x2eb   : > { %3400 = vst.msk [vmem:[#allocation2 + $0x5c] sm:$0xf] %vm3376_vm14, %v3327_v10  ;;  %3338 = vrot.lane.b32.xlu2 %v3255_v24, %s4866_s24  ;;  %v3074_v10 = vshll.u32 %v6944_v25, 16  ;;  %v3534_v24 = vrot.slane %v3532_v16, 4  ;;  %v3080_v53 = vrot.slane %v3078_v54, 4  ;;  %v3478_v23 = vrot.slane %v3476_v52, 4 }
 0x2ec   : > { %3657 = vst.msk [vmem:[#allocation2 + $0x5c] sm:$0xf] %vm3633_vm15, %v3584_v51  ;;  %v3063_v51 = vsel %vm5138_vm2, %v3058_v61, %v3062_v2  ;;  %v3279_v14 = vsel %vm5138_vm2, %v3274_v6, %v3278_v59  ;;  %v3070_v31 = vrot.slane %v3068_v13, 5 }
 0x2ed   : > { %v3552_v48 = vpop.permute.xlu2 %3551  ;;  %v3076_v46 = vrot.slane %v3074_v10, 5  ;;  %v3536_v21 = vsel %vm5456_vm6, %v3534_v24, %v3535_v56  ;;  %v3480_v39 = vsel %vm5456_vm6, %v3478_v23, %v3479_v12 }
 0x2ee   : > { %v6994_v2 = vstv %s4048_s11 }
 0x2ef   : > { %3304 = vrot.lane.b32.xlu1 %v3053_v19, %s4866_s24 }
 0x2f0   : > { %2793 = vrot.lane.b32.xlu0 %v4499_v57, %s4864_s21 }
 0x2f1   : > { %v2782_v34 = vpop.permute.xlu1 %2781 }
 0x2f2   : > { %2871 = vst.msk [vmem:[#allocation2 + $0x1c] sm:$0xf] %vm2863_vm13, %v2782_v34  ;;  %v2780_v55 = vpop.permute.xlu0 %2779 }
 0x2f3   : > { %2870 = vst.msk [vmem:[#allocation2 + $0x18] sm:$0xf] %vm2863_vm13, %v2780_v55  ;;  %v4705_v49 = vld [vmem:[#allocation2 + $0x58] sm:$0xff]  ;;  %2791 = vrot.lane.b32.xlu2 %v6856_v22, %s4864_s21 }
 0x2f4   : > { %3383 = vst.msk [vmem:[#allocation2 + $0x18] sm:$0xf] %vm3376_vm14, %v3293_v32  ;;  %4635 = vmatmul.msk.bf16.gmra.mxu2 %vm3814_vm0, %v4705_v49  ;;  %4651 = vmatmul.msk.bf16.gmra.mxu3 %vm3814_vm0, %v4705_v49  ;;  %v3065_v32 = vshrl.u32 %v6940_v11, 16 }
 0x2f5   : > { %v2818_v0 = vpop.permute.xlu2 %2817 }
 0x2f6   : > { %v3067_v44 = vrot.slane %v3065_v32, 4 }
 0x2f7   : > { %3563 = vrot.lane.b32.xlu1 %v3473_v29, %s4865_s23 }
 0x2f8   : > { %3561 = vrot.lane.b32.xlu0 %v3470_v8, %s4865_s23  ;;  %v3071_v34 = vor.u32 %v3070_v31, %v3067_v44 }
 0x2f9   : > { %v3550_v43 = vpop.permute.xlu1 %3549 }
 0x2fa   : > { %3640 = vst.msk [vmem:[#allocation2 + $0x18] sm:$0xf] %vm3633_vm15, %v3550_v43  ;;  %v3295_v22 = vpop.permute.xlu0 %3294 }
 0x2fb   : > { %3384 = vst.msk [vmem:[#allocation2 + $0x1c] sm:$0xf] %vm3376_vm14, %v3295_v22  ;;  %3306 = vrot.lane.b32.xlu2 %v3063_v51, %s4866_s24 }
 0x2fc   : > { %3641 = vst.msk [vmem:[#allocation2 + $0x1c] sm:$0xf] %vm3633_vm15, %v3552_v48  ;;  %v3081_v48 = vor.u32 %v3080_v53, %v3076_v46 }
 0x2fd   : > { %v3586_v57 = vpop.permute.xlu2 %3585 }
 0x2fe   : > { %v3082_v49 = vrot.slane %v3081_v48, 4 }
 0x2ff   : > { %2827 = vrot.lane.b32.xlu1 %v6902_v45, %s4864_s21  ;;  %v3533_v45 = vsel %vm5456_vm6, %v4543_v28, %v3532_v16 }
 0x300   : > { %2619 = vrot.lane.b32.xlu0 %v2556_v36, %s4863_s16  ;;  %v3087_v17 = vsel %vm5138_vm2, %v3082_v49, %v3086_v9 }
 0x301   : > { %v2816_v5 = vpop.permute.xlu1 %2815 }
 0x302   : > { %2888 = vst.msk [vmem:[#allocation2 + $0x60] sm:$0xf] %vm2863_vm13, %v2816_v5  ;;  %v2608_v42 = vpop.permute.xlu0 %2607 }
 0x303   : > { %2679 = vst.msk [vmem:[#allocation2 + $0x64] sm:$0xf] %vm2653_vm11, %v2608_v42  ;;  %v4697_v50 = vld [vmem:[#allocation2 + $0x18] sm:$0xff]  ;;  %2617 = vrot.lane.b32.xlu2 %v2553_v40, %s4863_s16  ;;  %v3072_v40 = vrot.slane %v3071_v34, 4 }
 0x304   : > { %2889 = vst.msk [vmem:[#allocation2 + $0x64] sm:$0xf] %vm2863_vm13, %v2818_v0  ;;  %4627 = vmatmul.msk.bf16.gmra.mxu0 %vm3814_vm0, %v4697_v50  ;;  %4643 = vmatmul.msk.bf16.gmra.mxu1 %vm3814_vm0, %v4697_v50 }
 0x305   : > { %v2786_v19 = vpop.permute.xlu2 %2785  ;;  %v3077_v8 = vsel %vm5138_vm2, %v3072_v40, %v3076_v46 }
 0x306   : > { %2873 = vst.msk [vmem:[#allocation2 + $0x24] sm:$0xf] %vm2863_vm13, %v2786_v19 }
 0x307   : > { %3342 = vrot.lane.b32.xlu1 %v3279_v14, %s4866_s24 }
 0x308   : > { %3340 = vrot.lane.b32.xlu0 %v3269_v41, %s4866_s24 }
 0x309   : > { %v3331_v7 = vpop.permute.xlu1 %3330 }
 0x30a   : > { %3402 = vst.msk [vmem:[#allocation2 + $0x64] sm:$0xf] %vm3376_vm14, %v3331_v7  ;;  %v3329_v37 = vpop.permute.xlu0 %3328 }
 0x30b   : > { %3401 = vst.msk [vmem:[#allocation2 + $0x60] sm:$0xf] %vm3376_vm14, %v3329_v37  ;;  %2829 = vrot.lane.b32.xlu2 %v6906_v62, %s4864_s21  ;;  %v3703_v62 = vld [vmem:[%s7302_s2] sm:$0x3] }
 0x30c   : > { %3658 = vst.msk [vmem:[#allocation2 + $0x60] sm:$0xf] %vm3633_vm15, %v3586_v57  ;;  %v6985_v60 = vperm.slane %v3703_v62, 0  ;;  %v6987_v38 = vperm.slane %v3703_v62, 1 }
 0x30d   : > { %v3554_v55 = vpop.permute.xlu2 %3553 }
 0x30f   : > { %2795 = vrot.lane.b32.xlu1 %v6940_v11, %s4864_s21  ;;  %v3477_v11 = vsel %vm5456_vm6, %v4535_v35, %v3476_v52 }
 0x310   : > { %3599 = vrot.lane.b32.xlu0 %v3536_v21, %s4865_s23 }
 0x311   : > { %v2784_v58 = vpop.permute.xlu1 %2783 }
 0x312   : > { %2872 = vst.msk [vmem:[#allocation2 + $0x20] sm:$0xf] %vm2863_vm13, %v2784_v58  ;;  %v3588_v29 = vpop.permute.xlu0 %3587 }
 0x313   : > { %3659 = vst.msk [vmem:[#allocation2 + $0x64] sm:$0xf] %vm3633_vm15, %v3588_v29  ;;  %3597 = vrot.lane.b32.xlu2 %v3533_v45, %s4865_s23 }
 0x315   : > { %v2612_v30 = vpop.permute.xlu2 %2611 }
 0x316   : > { %2681 = vst.msk [vmem:[#allocation2 + $0x6c] sm:$0xf] %vm2653_vm11, %v2612_v30 }
 0x317   : > { %3310 = vrot.lane.b32.xlu1 %v3087_v17, %s4866_s24  ;;  %v3919_v61 = vpop.f32.mrf.mxu2  ;;  %v4008_v0 = vpop.f32.mrf.mxu3 }
 0x318   : > { %3308 = vrot.lane.b32.xlu0 %v3077_v8, %s4866_s24  ;;  %v3920_v33 = vadd.f32 %v3919_v61, %v6985_v60  ;;  %v4009_v4 = vadd.f32 %v4008_v0, %v6987_v38  ;;  %s7009_s24 = scalar_lea.vmem [#allocation5], %s4399_s12 }
 0x319   : > { %v3299_v43 = vpop.permute.xlu1 %3298  ;;  %s4321_s28 = sshll.u32 %s7009_s24, 4  ;;  %s4322_s28 = int_to_ptr.vmem [resolvable:$true] %s4321_s28 }
 0x31a   : > { %3386 = vst.msk [vmem:[#allocation2 + $0x24] sm:$0xf] %vm3376_vm14, %v3299_v43  ;;  %v3297_v15 = vpop.permute.xlu0 %3296  ;;  %v4706_v1 = vld [vmem:[#allocation2 + $0x60] sm:$0xff]  ;;  %vm4081_vm1 = vcmp.ge.f32.partialorder %v3920_v33, 0.0  ;;  %v4146_v20 = vmul.f32 %v6994_v2, %v3920_v33  ;;  %vm4082_vm2 = vcmp.ge.f32.partialorder %v4009_v4, 0.0  ;;  %v4147_v22 = vmul.f32 %v6994_v2, %v4009_v4 }
 0x31b   : > { %3385 = vst.msk [vmem:[#allocation2 + $0x20] sm:$0xf] %vm3376_vm14, %v3297_v15  ;;  %4636 = vmatmul.msk.bf16.gmra.mxu2 %vm3814_vm0, %v4706_v1  ;;  %4652 = vmatmul.msk.bf16.gmra.mxu3 %vm3814_vm0, %v4706_v1 }
 0x31c   : > { %3642 = vst.msk [vmem:[#allocation2 + $0x20] sm:$0xf] %vm3633_vm15, %v3554_v55  ;;  %v4210_v63 = vsel %vm4081_vm1, %v3920_v33, %v4146_v20  ;;  %v4211_v51 = vsel %vm4082_vm2, %v4009_v4, %v4147_v22  ;;  %2797 = vrot.lane.b32.xlu2 %v6944_v25, %s4864_s21  ;;  %s4715_s21 = sshll.u32 %s4391_s3, 9 }
 0x31d   : > { %4258 = vst [vmem:[%s7009_s24 + $0x100] sm:$0xff] %v4210_v63  ;;  %v3333_v5 = vpop.permute.xlu2 %3332  ;;  %s4320_s15 = scalar_lea.hbm %s7304_s4, %s4715_s21 }
 0x31e   : > { %4672 = vst [vmem:[%s7009_s24 + $0x110] sm:$0xff] %v4211_v51  ;;  %s7263_s3 = sshll.u32 %s4320_s15, 4  ;;  %s4324_s3 = int_to_ptr.hbm [resolvable:$true] %s7263_s3 }
 0x31f   : > { %v3921_v36 = vpop.f32.mrf.mxu2  ;;  %v4010_v27 = vpop.f32.mrf.mxu3  ;;  %s4809_s30 = sshra.s32 %s4324_s3, 4  ;;  %s4810_s30 = int_to_ptr.hbm [resolvable:$true] %s4809_s30 }
 0x320   : > { %3567 = vrot.lane.b32.xlu0 %v3480_v39, %s4865_s23  ;;  %v3922_v57 = vadd.f32 %v3921_v36, %v6985_v60  ;;  %v4011_v6 = vadd.f32 %v4010_v27, %v6987_v38  ;;  %s4811_s5 = scalar_lea.hbm %s4810_s30, 512  ;;  %p4816_p2 = scmp.lt.s32.totalorder %s4810_s30, %s7304_s4 }
 0x321   : > { %v2610_v59 = vpop.permute.xlu1 %2609  ;;  %v3879_v42 = vpop.f32.mrf.mxu0  ;;  %p4812_p13 = scmp.ne.s32.totalorder %s4810_s30, %s4811_s5  ;;  %p4817_p3 = scmp.lt.s32.totalorder %s4815_s8, %s4811_s5 }
 0x322   : > { %2680 = vst.msk [vmem:[#allocation2 + $0x68] sm:$0xf] %vm2653_vm11, %v2610_v59  ;;  %v3556_v47 = vpop.permute.xlu0 %3555  ;;  %vm4083_vm3 = vcmp.ge.f32.partialorder %v3922_v57, 0.0  ;;  %v4148_v50 = vmul.f32 %v6994_v2, %v3922_v57  ;;  %vm4084_vm4 = vcmp.ge.f32.partialorder %v4011_v6, 0.0  ;;  %v4149_v25 = vmul.f32 %v6994_v2, %v4011_v6  ;;  %v3968_v14 = vpop.f32.mrf.mxu1 }
 0x323   : > { %3643 = vst.msk [vmem:[#allocation2 + $0x24] sm:$0xf] %vm3633_vm15, %v3556_v47  ;;  %v3880_v16 = vadd.f32 %v3879_v42, %v6985_v60  ;;  %v3969_v54 = vadd.f32 %v3968_v14, %v6987_v38  ;;  %p4813_p0 = pnand %p4812_p13, %p4934_p6  ;;  %p4818_p4 = por %p4817_p3, %p4816_p2 }
 0x324   : > { %v4212_v41 = vsel %vm4083_vm3, %v3922_v57, %v4148_v50  ;;  %v4213_v32 = vsel %vm4084_vm4, %v4011_v6, %v4149_v25  ;;  %3565 = vrot.lane.b32.xlu2 %v3477_v11, %s4865_s23 }
 0x325   : > { %4259 = vst [vmem:[%s7009_s24 + $0x108] sm:$0xff] %v4212_v41  ;;  %vm4049_vm5 = vcmp.ge.f32.partialorder %v3880_v16, 0.0  ;;  %v4114_v3 = vmul.f32 %v6994_v2, %v3880_v16  ;;  %vm4050_vm6 = vcmp.ge.f32.partialorder %v3969_v54, 0.0  ;;  %v4115_v13 = vmul.f32 %v6994_v2, %v3969_v54  ;;  %v3592_v19 = vpop.permute.xlu2 %3591  ;;  %p4814_p1 = pneg %p4813_p0 }
 0x326   : > { %4673 = vst [vmem:[%s7009_s24 + $0x118] sm:$0xff] %v4213_v32 }
 0x327   : > { %v4178_v10 = vsel %vm4049_vm5, %v3880_v16, %v4114_v3  ;;  %v4179_v24 = vsel %vm4050_vm6, %v3969_v54, %v4115_v13  ;;  %p4819_p5 = pnand %p4818_p4, %p4814_p1 }
 0x328   : > { %4242 = vst [vmem:[%s7009_s24] sm:$0xff] %v4178_v10 }
 0x329   : > { %v2822_v56 = vpop.permute.xlu1 %2821  ;;  %4656 = vst [vmem:[%s7009_s24 + $0x10] sm:$0xff] %v4179_v24  ;;  %v3881_v7 = vpop.f32.mrf.mxu0 }
 0x32a   : > { %v2820_v53 = vpop.permute.xlu0 %2819  ;;  %v4698_v44 = vld [vmem:[#allocation2 + $0x20] sm:$0xff]  ;;  %2891 = vst.msk [vmem:[#allocation2 + $0x6c] sm:$0xf] %vm2863_vm13, %v2822_v56  ;;  %v3882_v31 = vadd.f32 %v3881_v7, %v6985_v60  ;;  %v3970_v26 = vpop.f32.mrf.mxu1 }
 0x32b   : > { %2890 = vst.msk [vmem:[#allocation2 + $0x68] sm:$0xf] %vm2863_vm13, %v2820_v53  ;;  %v3971_v37 = vadd.f32 %v3970_v26, %v6987_v38  ;;  %4628 = vmatmul.msk.bf16.gmra.mxu0 %vm3814_vm0, %v4698_v44  ;;  %4644 = vmatmul.msk.bf16.gmra.mxu1 %vm3814_vm0, %v4698_v44 }
 0x32c   : > { %3403 = vst.msk [vmem:[#allocation2 + $0x68] sm:$0xf] %vm3376_vm14, %v3333_v5  ;;  %vm4051_vm7 = vcmp.ge.f32.partialorder %v3882_v31, 0.0  ;;  %v4116_v46 = vmul.f32 %v6994_v2, %v3882_v31 }
 0x32d   : > { %vm4052_vm8 = vcmp.ge.f32.partialorder %v3971_v37, 0.0  ;;  %v4117_v48 = vmul.f32 %v6994_v2, %v3971_v37  ;;  %v3301_v28 = vpop.permute.xlu2 %3300 }
 0x32e   : > { %v4180_v18 = vsel %vm4051_vm7, %v3882_v31, %v4116_v46 }
 0x32f   : > { %4243 = vst [vmem:[%s7009_s24 + $0x8] sm:$0xff] %v4180_v18  ;;  %v4181_v21 = vsel %vm4052_vm8, %v3971_v37, %v4117_v48 }
 0x330   : > { %4657 = vst [vmem:[%s7009_s24 + $0x18] sm:$0xff] %v4181_v21 }
 0x331   : > { %v3590_v34 = vpop.permute.xlu1 %3589 }
 0x332   : > { %3660 = vst.msk [vmem:[#allocation2 + $0x68] sm:$0xf] %vm3633_vm15, %v3590_v34  ;;  %v3335_v55 = vpop.permute.xlu0 %3334 }
 0x333   : > { %3404 = vst.msk [vmem:[#allocation2 + $0x6c] sm:$0xf] %vm3376_vm14, %v3335_v55 }
 0x334   : > { %3661 = vst.msk [vmem:[#allocation2 + $0x6c] sm:$0xf] %vm3633_vm15, %v3592_v19 }
 0x335   : > { %v3560_v62 = vpop.permute.xlu2 %3559 }
 0x337   : > { %v3924_v49 = vpop.f32.mrf.mxu2  ;;  %v4013_v9 = vpop.f32.mrf.mxu3 }
 0x338   : > { %v3925_v58 = vadd.f32 %v3924_v49, %v6985_v60  ;;  %v4014_v40 = vadd.f32 %v4013_v9, %v6987_v38 }
 0x339   : > { %v2790_v29 = vpop.permute.xlu1 %2789 }
 0x33a   : > { %2875 = vst.msk [vmem:[#allocation2 + $0x2c] sm:$0xf] %vm2863_vm13, %v2790_v29  ;;  %v2788_v45 = vpop.permute.xlu0 %2787  ;;  %vm4085_vm9 = vcmp.ge.f32.partialorder %v3925_v58, 0.0  ;;  %v4150_v17 = vmul.f32 %v6994_v2, %v3925_v58  ;;  %vm4086_vm10 = vcmp.ge.f32.partialorder %v4014_v40, 0.0  ;;  %v4151_v8 = vmul.f32 %v6994_v2, %v4014_v40 }
 0x33b   : > { %2874 = vst.msk [vmem:[#allocation2 + $0x28] sm:$0xf] %vm2863_vm13, %v2788_v45  ;;  %v4707_v52 = vld [vmem:[#allocation2 + $0x68] sm:$0xff] }
 0x33c   : > { %3387 = vst.msk [vmem:[#allocation2 + $0x28] sm:$0xf] %vm3376_vm14, %v3301_v28  ;;  %v4214_v61 = vsel %vm4085_vm9, %v3925_v58, %v4150_v17  ;;  %v4215_v0 = vsel %vm4086_vm10, %v4014_v40, %v4151_v8  ;;  %4637 = vmatmul.msk.bf16.gmra.mxu2 %vm3814_vm0, %v4707_v52  ;;  %4653 = vmatmul.msk.bf16.gmra.mxu3 %vm3814_vm0, %v4707_v52 }
 0x33d   : > { %4260 = vst [vmem:[%s7009_s24 + $0x120] sm:$0xff] %v4214_v61  ;;  %v2824_v30 = vpop.permute.xlu2 %2823 }
 0x33e   : > { %4674 = vst [vmem:[%s7009_s24 + $0x130] sm:$0xff] %v4215_v0 }
 0x33f   : > { %v3926_v33 = vpop.f32.mrf.mxu2  ;;  %v4015_v4 = vpop.f32.mrf.mxu3 }
 0x340   : > { %v3927_v43 = vadd.f32 %v3926_v33, %v6985_v60  ;;  %v4016_v23 = vadd.f32 %v4015_v4, %v6987_v38 }
 0x341   : > { %v3558_v12 = vpop.permute.xlu1 %3557  ;;  %v3884_v1 = vpop.f32.mrf.mxu0 }
 0x342   : > { %3644 = vst.msk [vmem:[#allocation2 + $0x28] sm:$0xf] %vm3633_vm15, %v3558_v12  ;;  %v3303_v15 = vpop.permute.xlu0 %3302  ;;  %vm4087_vm12 = vcmp.ge.f32.partialorder %v3927_v43, 0.0  ;;  %v4152_v20 = vmul.f32 %v6994_v2, %v3927_v43  ;;  %vm4088_vm1 = vcmp.ge.f32.partialorder %v4016_v23, 0.0  ;;  %v4153_v22 = vmul.f32 %v6994_v2, %v4016_v23  ;;  %v3973_v63 = vpop.f32.mrf.mxu1 }
 0x343   : > { %3388 = vst.msk [vmem:[#allocation2 + $0x2c] sm:$0xf] %vm3376_vm14, %v3303_v15  ;;  %v3885_v51 = vadd.f32 %v3884_v1, %v6985_v60  ;;  %v3974_v39 = vadd.f32 %v3973_v63, %v6987_v38 }
 0x344   : > { %3645 = vst.msk [vmem:[#allocation2 + $0x2c] sm:$0xf] %vm3633_vm15, %v3560_v62  ;;  %v4216_v35 = vsel %vm4087_vm12, %v3927_v43, %v4152_v20  ;;  %v4217_v36 = vsel %vm4088_vm1, %v4016_v23, %v4153_v22 }
 0x345   : > { %4261 = vst [vmem:[%s7009_s24 + $0x128] sm:$0xff] %v4216_v35  ;;  %vm4053_vm2 = vcmp.ge.f32.partialorder %v3885_v51, 0.0  ;;  %v4118_v27 = vmul.f32 %v6994_v2, %v3885_v51  ;;  %vm4054_vm3 = vcmp.ge.f32.partialorder %v3974_v39, 0.0  ;;  %v4119_v57 = vmul.f32 %v6994_v2, %v3974_v39  ;;  %v3339_v47 = vpop.permute.xlu2 %3338 }
 0x346   : > { %4675 = vst [vmem:[%s7009_s24 + $0x138] sm:$0xff] %v4217_v36 }
 0x347   : > { %v4182_v6 = vsel %vm4053_vm2, %v3885_v51, %v4118_v27  ;;  %v4183_v59 = vsel %vm4054_vm3, %v3974_v39, %v4119_v57 }
 0x348   : > { %4244 = vst [vmem:[%s7009_s24 + $0x20] sm:$0xff] %v4182_v6 }
 0x349   : > { %v2616_v5 = vpop.permute.xlu1 %2615  ;;  %4658 = vst [vmem:[%s7009_s24 + $0x30] sm:$0xff] %v4183_v59  ;;  %v3886_v11 = vpop.f32.mrf.mxu0 }
 0x34a   : > { %v2614_v42 = vpop.permute.xlu0 %2613  ;;  %2683 = vst.msk [vmem:[#allocation2 + $0x74] sm:$0xf] %vm2653_vm11, %v2616_v5  ;;  %v3887_v50 = vadd.f32 %v3886_v11, %v6985_v60  ;;  %v3975_v25 = vpop.f32.mrf.mxu1 }
 0x34b   : > { %v4699_v14 = vld [vmem:[#allocation2 + $0x28] sm:$0xff]  ;;  %2682 = vst.msk [vmem:[#allocation2 + $0x70] sm:$0xf] %vm2653_vm11, %v2614_v42  ;;  %v3976_v16 = vadd.f32 %v3975_v25, %v6987_v38 }
 0x34c   : > { %vm4055_vm4 = vcmp.ge.f32.partialorder %v3887_v50, 0.0  ;;  %v4120_v54 = vmul.f32 %v6994_v2, %v3887_v50  ;;  %4629 = vmatmul.msk.bf16.gmra.mxu0 %vm3814_vm0, %v4699_v14  ;;  %4645 = vmatmul.msk.bf16.gmra.mxu1 %vm3814_vm0, %v4699_v14  ;;  %2892 = vst.msk [vmem:[#allocation2 + $0x70] sm:$0xf] %vm2863_vm13, %v2824_v30 }
 0x34d   : > { %vm4056_vm5 = vcmp.ge.f32.partialorder %v3976_v16, 0.0  ;;  %v4121_v41 = vmul.f32 %v6994_v2, %v3976_v16  ;;  %v2792_v10 = vpop.permute.xlu2 %2791 }
 0x34e   : > { %v4184_v32 = vsel %vm4055_vm4, %v3887_v50, %v4120_v54  ;;  %2876 = vst.msk [vmem:[#allocation2 + $0x30] sm:$0xf] %vm2863_vm13, %v2792_v10 }
 0x34f   : > { %4245 = vst [vmem:[%s7009_s24 + $0x28] sm:$0xff] %v4184_v32  ;;  %v4185_v3 = vsel %vm4056_vm5, %v3976_v16, %v4121_v41 }
 0x350   : > { %4659 = vst [vmem:[%s7009_s24 + $0x38] sm:$0xff] %v4185_v3 }
 0x351   : > { %v3337_v13 = vpop.permute.xlu1 %3336 }
 0x352   : > { %3405 = vst.msk [vmem:[#allocation2 + $0x70] sm:$0xf] %vm3376_vm14, %v3337_v13  ;;  %v2826_v24 = vpop.permute.xlu0 %2825 }
 0x353   : > { %2893 = vst.msk [vmem:[#allocation2 + $0x74] sm:$0xf] %vm2863_vm13, %v2826_v24 }
 0x354   : > { %3406 = vst.msk [vmem:[#allocation2 + $0x74] sm:$0xf] %vm3376_vm14, %v3339_v47 }
 0x355   : > { %v3307_v31 = vpop.permute.xlu2 %3306 }
 0x357   : > { %v3929_v56 = vpop.f32.mrf.mxu2  ;;  %v4018_v19 = vpop.f32.mrf.mxu3 }
 0x358   : > { %v3930_v53 = vadd.f32 %v3929_v56, %v6985_v60  ;;  %v4019_v7 = vadd.f32 %v4018_v19, %v6987_v38 }
 0x359   : > { %v3596_v44 = vpop.permute.xlu1 %3595 }
 0x35a   : > { %3663 = vst.msk [vmem:[#allocation2 + $0x74] sm:$0xf] %vm3633_vm15, %v3596_v44  ;;  %v3594_v26 = vpop.permute.xlu0 %3593  ;;  %vm4089_vm6 = vcmp.ge.f32.partialorder %v3930_v53, 0.0  ;;  %v4154_v37 = vmul.f32 %v6994_v2, %v3930_v53  ;;  %vm4090_vm7 = vcmp.ge.f32.partialorder %v4019_v7, 0.0  ;;  %v4155_v46 = vmul.f32 %v6994_v2, %v4019_v7 }
 0x35b   : > { %3662 = vst.msk [vmem:[#allocation2 + $0x70] sm:$0xf] %vm3633_vm15, %v3594_v26 }
 0x35c   : > { %v4218_v48 = vsel %vm4089_vm6, %v3930_v53, %v4154_v37  ;;  %v4219_v18 = vsel %vm4090_vm7, %v4019_v7, %v4155_v46 }
 0x35d   : > { %4262 = vst [vmem:[%s7009_s24 + $0x140] sm:$0xff] %v4218_v48  ;;  %v2618_v9 = vpop.permute.xlu2 %2617 }
 0x35e   : > { %4676 = vst [vmem:[%s7009_s24 + $0x150] sm:$0xff] %v4219_v18 }
 0x35f   : > { %v3931_v21 = vpop.f32.mrf.mxu2  ;;  %v4020_v34 = vpop.f32.mrf.mxu3  ;;  %2684 = vst.msk [vmem:[#allocation2 + $0x78] sm:$0xf] %vm2653_vm11, %v2618_v9 }
 0x360   : > { %v3932_v28 = vadd.f32 %v3931_v21, %v6985_v60  ;;  %v4021_v55 = vadd.f32 %v4020_v34, %v6987_v38 }
 0x361   : > { %v3305_v49 = vpop.permute.xlu1 %3304  ;;  %v3889_v40 = vpop.f32.mrf.mxu0 }
 0x362   : > { %3389 = vst.msk [vmem:[#allocation2 + $0x30] sm:$0xf] %vm3376_vm14, %v3305_v49  ;;  %v2794_v58 = vpop.permute.xlu0 %2793  ;;  %v4708_v29 = vld [vmem:[#allocation2 + $0x70] sm:$0xff]  ;;  %vm4091_vm8 = vcmp.ge.f32.partialorder %v3932_v28, 0.0  ;;  %v4156_v62 = vmul.f32 %v6994_v2, %v3932_v28  ;;  %vm4092_vm9 = vcmp.ge.f32.partialorder %v4021_v55, 0.0  ;;  %v4157_v45 = vmul.f32 %v6994_v2, %v4021_v55  ;;  %v3978_v17 = vpop.f32.mrf.mxu1 }
 0x363   : > { %2877 = vst.msk [vmem:[#allocation2 + $0x34] sm:$0xf] %vm2863_vm13, %v2794_v58  ;;  %v3890_v8 = vadd.f32 %v3889_v40, %v6985_v60  ;;  %v3979_v52 = vadd.f32 %v3978_v17, %v6987_v38  ;;  %4638 = vmatmul.msk.bf16.gmra.mxu2 %vm3814_vm0, %v4708_v29  ;;  %4654 = vmatmul.msk.bf16.gmra.mxu3 %vm3814_vm0, %v4708_v29 }
 0x364   : > { %3390 = vst.msk [vmem:[#allocation2 + $0x34] sm:$0xf] %vm3376_vm14, %v3307_v31  ;;  %v4220_v61 = vsel %vm4091_vm8, %v3932_v28, %v4156_v62  ;;  %v4221_v0 = vsel %vm4092_vm9, %v4021_v55, %v4157_v45 }
 0x365   : > { %4263 = vst [vmem:[%s7009_s24 + $0x148] sm:$0xff] %v4220_v61  ;;  %vm4057_vm10 = vcmp.ge.f32.partialorder %v3890_v8, 0.0  ;;  %v4122_v33 = vmul.f32 %v6994_v2, %v3890_v8  ;;  %vm4058_vm12 = vcmp.ge.f32.partialorder %v3979_v52, 0.0  ;;  %v4123_v4 = vmul.f32 %v6994_v2, %v3979_v52  ;;  %v2830_v30 = vpop.permute.xlu2 %2829 }
 0x366   : > { %4677 = vst [vmem:[%s7009_s24 + $0x158] sm:$0xff] %v4221_v0 }
 0x367   : > { %v4186_v43 = vsel %vm4057_vm10, %v3890_v8, %v4122_v33  ;;  %v4187_v23 = vsel %vm4058_vm12, %v3979_v52, %v4123_v4 }
 0x368   : > { %4246 = vst [vmem:[%s7009_s24 + $0x40] sm:$0xff] %v4186_v43 }
 0x369   : > { %v3564_v12 = vpop.permute.xlu1 %3563  ;;  %4660 = vst [vmem:[%s7009_s24 + $0x50] sm:$0xff] %v4187_v23  ;;  %v3891_v1 = vpop.f32.mrf.mxu0 }
 0x36a   : > { %v3562_v15 = vpop.permute.xlu0 %3561  ;;  %3647 = vst.msk [vmem:[#allocation2 + $0x34] sm:$0xf] %vm3633_vm15, %v3564_v12  ;;  %v3892_v20 = vadd.f32 %v3891_v1, %v6985_v60  ;;  %v3980_v22 = vpop.f32.mrf.mxu1 }
 0x36b   : > { %3646 = vst.msk [vmem:[#allocation2 + $0x30] sm:$0xf] %vm3633_vm15, %v3562_v15  ;;  %v3981_v63 = vadd.f32 %v3980_v22, %v6987_v38 }
 0x36c   : > { %vm4059_vm1 = vcmp.ge.f32.partialorder %v3892_v20, 0.0  ;;  %v4124_v51 = vmul.f32 %v6994_v2, %v3892_v20 }
 0x36d   : > { %vm4060_vm2 = vcmp.ge.f32.partialorder %v3981_v63, 0.0  ;;  %v4125_v39 = vmul.f32 %v6994_v2, %v3981_v63  ;;  %v3598_v57 = vpop.permute.xlu2 %3597 }
 0x36e   : > { %v4188_v35 = vsel %vm4059_vm1, %v3892_v20, %v4124_v51 }
 0x36f   : > { %4247 = vst [vmem:[%s7009_s24 + $0x48] sm:$0xff] %v4188_v35  ;;  %v4189_v36 = vsel %vm4060_vm2, %v3981_v63, %v4125_v39 }
 0x370   : > { %4661 = vst [vmem:[%s7009_s24 + $0x58] sm:$0xff] %v4189_v36 }
 0x371   : > { %v2828_v27 = vpop.permute.xlu1 %2827 }
 0x372   : > { %v2620_v6 = vpop.permute.xlu0 %2619  ;;  %2894 = vst.msk [vmem:[#allocation2 + $0x78] sm:$0xf] %vm2863_vm13, %v2828_v27  ;;  %v4700_v59 = vld [vmem:[#allocation2 + $0x30] sm:$0xff] }
 0x373   : > { %2685 = vst.msk [vmem:[#allocation2 + $0x7c] sm:$0xf] %vm2653_vm11, %v2620_v6  ;;  %4630 = vmatmul.msk.bf16.gmra.mxu0 %vm3814_vm0, %v4700_v59  ;;  %4646 = vmatmul.msk.bf16.gmra.mxu1 %vm3814_vm0, %v4700_v59 }
 0x374   : > { %2895 = vst.msk [vmem:[#allocation2 + $0x7c] sm:$0xf] %vm2863_vm13, %v2830_v30 }
 0x376   : > { %v2798_v14 = vpop.permute.xlu2 %2797 }
 0x377   : > { %v3934_v5 = vpop.f32.mrf.mxu2  ;;  %v4023_v47 = vpop.f32.mrf.mxu3  ;;  %2879 = vst.msk [vmem:[#allocation2 + $0x3c] sm:$0xf] %vm2863_vm13, %v2798_v14 }
 0x378   : > { %v3935_v42 = vadd.f32 %v3934_v5, %v6985_v60  ;;  %v4024_v11 = vadd.f32 %v4023_v47, %v6987_v38 }
 0x379   : > { %v3343_v50 = vpop.permute.xlu1 %3342 }
 0x37a   : > { %v3341_v25 = vpop.permute.xlu0 %3340  ;;  %3408 = vst.msk [vmem:[#allocation2 + $0x7c] sm:$0xf] %vm3376_vm14, %v3343_v50  ;;  %vm4093_vm11 = vcmp.ge.f32.partialorder %v3935_v42, 0.0  ;;  %v4158_v16 = vmul.f32 %v6994_v2, %v3935_v42  ;;  %vm4094_vm3 = vcmp.ge.f32.partialorder %v4024_v11, 0.0  ;;  %v4159_v54 = vmul.f32 %v6994_v2, %v4024_v11 }
 0x37b   : > { %3407 = vst.msk [vmem:[#allocation2 + $0x78] sm:$0xf] %vm3376_vm14, %v3341_v25 }
 0x37c   : > { %3664 = vst.msk [vmem:[#allocation2 + $0x78] sm:$0xf] %vm3633_vm15, %v3598_v57  ;;  %v4222_v41 = vsel %vm4093_vm11, %v3935_v42, %v4158_v16  ;;  %v4223_v32 = vsel %vm4094_vm3, %v4024_v11, %v4159_v54 }
 0x37d   : > { %4264 = vst [vmem:[%s7009_s24 + $0x160] sm:$0xff] %v4222_v41 }
 0x37e   : > { %4678 = vst [vmem:[%s7009_s24 + $0x170] sm:$0xff] %v4223_v32  ;;  %v3566_v49 = vpop.permute.xlu2 %3565 }
 0x37f   : > { %v3936_v3 = vpop.f32.mrf.mxu2  ;;  %v4025_v13 = vpop.f32.mrf.mxu3 }
 0x380   : > { %v3937_v10 = vadd.f32 %v3936_v3, %v6985_v60  ;;  %v4026_v24 = vadd.f32 %v4025_v13, %v6987_v38 }
 0x381   : > { %v2796_v56 = vpop.permute.xlu1 %2795  ;;  %v3894_v53 = vpop.f32.mrf.mxu0 }
 0x382   : > { %v3600_v19 = vpop.permute.xlu0 %3599  ;;  %2878 = vst.msk [vmem:[#allocation2 + $0x38] sm:$0xf] %vm2863_vm13, %v2796_v56  ;;  %vm4095_vm4 = vcmp.ge.f32.partialorder %v3937_v10, 0.0  ;;  %v4160_v7 = vmul.f32 %v6994_v2, %v3937_v10  ;;  %vm4096_vm5 = vcmp.ge.f32.partialorder %v4026_v24, 0.0  ;;  %v4161_v44 = vmul.f32 %v6994_v2, %v4026_v24  ;;  %v3983_v31 = vpop.f32.mrf.mxu1 }
 0x383   : > { %3665 = vst.msk [vmem:[#allocation2 + $0x7c] sm:$0xf] %vm3633_vm15, %v3600_v19  ;;  %v3895_v26 = vadd.f32 %v3894_v53, %v6985_v60  ;;  %v3984_v37 = vadd.f32 %v3983_v31, %v6987_v38 }
 0x384   : > { %v4224_v46 = vsel %vm4095_vm4, %v3937_v10, %v4160_v7  ;;  %v4225_v48 = vsel %vm4096_vm5, %v4026_v24, %v4161_v44 }
 0x385   : > { %4265 = vst [vmem:[%s7009_s24 + $0x168] sm:$0xff] %v4224_v46  ;;  %vm4061_vm13 = vcmp.ge.f32.partialorder %v3895_v26, 0.0  ;;  %v4126_v18 = vmul.f32 %v6994_v2, %v3895_v26  ;;  %vm4062_vm6 = vcmp.ge.f32.partialorder %v3984_v37, 0.0  ;;  %v4127_v21 = vmul.f32 %v6994_v2, %v3984_v37 }
 0x386   : > { %4679 = vst [vmem:[%s7009_s24 + $0x178] sm:$0xff] %v4225_v48 }
 0x387   : > { %v4190_v34 = vsel %vm4061_vm13, %v3895_v26, %v4126_v18  ;;  %v4191_v28 = vsel %vm4062_vm6, %v3984_v37, %v4127_v21 }
 0x388   : > { %4248 = vst [vmem:[%s7009_s24 + $0x60] sm:$0xff] %v4190_v34 }
 0x389   : > { %v3311_v55 = vpop.permute.xlu1 %3310  ;;  %4662 = vst [vmem:[%s7009_s24 + $0x70] sm:$0xff] %v4191_v28  ;;  %v3896_v58 = vpop.f32.mrf.mxu0 }
 0x38a   : > { %v3309_v9 = vpop.permute.xlu0 %3308  ;;  %v4709_v40 = vld [vmem:[#allocation2 + $0x78] sm:$0xff]  ;;  %v3897_v29 = vadd.f32 %v3896_v58, %v6985_v60  ;;  %v3985_v62 = vpop.f32.mrf.mxu1  ;;  %3392 = vst.msk [vmem:[#allocation2 + $0x3c] sm:$0xf] %vm3376_vm14, %v3311_v55 }
 0x38b   : > { %3391 = vst.msk [vmem:[#allocation2 + $0x38] sm:$0xf] %vm3376_vm14, %v3309_v9  ;;  %v3986_v45 = vadd.f32 %v3985_v62, %v6987_v38  ;;  %4639 = vmatmul.msk.bf16.gmra.mxu2 %vm3814_vm0, %v4709_v40  ;;  %4655 = vmatmul.msk.bf16.gmra.mxu3 %vm3814_vm0, %v4709_v40 }
 0x38c   : > { %vm4063_vm7 = vcmp.ge.f32.partialorder %v3897_v29, 0.0  ;;  %v4128_v17 = vmul.f32 %v6994_v2, %v3897_v29  ;;  %3648 = vst.msk [vmem:[#allocation2 + $0x38] sm:$0xf] %vm3633_vm15, %v3566_v49 }
 0x38d   : > { %vm4064_vm8 = vcmp.ge.f32.partialorder %v3986_v45, 0.0  ;;  %v4129_v8 = vmul.f32 %v6994_v2, %v3986_v45 }
 0x38e   : > { %v4192_v52 = vsel %vm4063_vm7, %v3897_v29, %v4128_v17 }
 0x38f   : > { %4249 = vst [vmem:[%s7009_s24 + $0x68] sm:$0xff] %v4192_v52  ;;  %v4193_v61 = vsel %vm4064_vm8, %v3986_v45, %v4129_v8 }
 0x390   : > { %4663 = vst [vmem:[%s7009_s24 + $0x78] sm:$0xff] %v4193_v61 }
 0x392   : > { %v3568_v0 = vpop.permute.xlu0 %3567 }
 0x393   : > { %3649 = vst.msk [vmem:[#allocation2 + $0x3c] sm:$0xf] %vm3633_vm15, %v3568_v0 }
 0x39a   : > { %v4701_v33 = vld [vmem:[#allocation2 + $0x38] sm:$0xff] }
 0x39b   : > { %4631 = vmatmul.msk.bf16.gmra.mxu0 %vm3814_vm0, %v4701_v33  ;;  %4647 = vmatmul.msk.bf16.gmra.mxu1 %vm3814_vm0, %v4701_v33 }
 0x39e   : > { %v3939_v4 = vpop.f32.mrf.mxu2  ;;  %v4028_v43 = vpop.f32.mrf.mxu3 }
 0x39f   : > { %v3940_v23 = vadd.f32 %v3939_v4, %v6985_v60  ;;  %v4029_v12 = vadd.f32 %v4028_v43, %v6987_v38 }
 0x3a1   : > { %vm4097_vm14 = vcmp.ge.f32.partialorder %v3940_v23, 0.0  ;;  %v4162_v30 = vmul.f32 %v6994_v2, %v3940_v23  ;;  %vm4098_vm9 = vcmp.ge.f32.partialorder %v4029_v12, 0.0  ;;  %v4163_v15 = vmul.f32 %v6994_v2, %v4029_v12 }
 0x3a3   : > { %v4226_v1 = vsel %vm4097_vm14, %v3940_v23, %v4162_v30  ;;  %v4227_v20 = vsel %vm4098_vm9, %v4029_v12, %v4163_v15 }
 0x3a4   : > { %4266 = vst [vmem:[%s7009_s24 + $0x180] sm:$0xff] %v4226_v1 }
 0x3a5   : > { %4680 = vst [vmem:[%s7009_s24 + $0x190] sm:$0xff] %v4227_v20 }
 0x3a6   : > { %v3941_v22 = vpop.f32.mrf.mxu2  ;;  %v4030_v63 = vpop.f32.mrf.mxu3 }
 0x3a7   : > { %v3942_v51 = vadd.f32 %v3941_v22, %v6985_v60  ;;  %v4031_v39 = vadd.f32 %v4030_v63, %v6987_v38 }
 0x3a8   : > { %v3899_v35 = vpop.f32.mrf.mxu0  ;;  %v3988_v36 = vpop.f32.mrf.mxu1 }
 0x3a9   : > { %vm4099_vm15 = vcmp.ge.f32.partialorder %v3942_v51, 0.0  ;;  %v4164_v27 = vmul.f32 %v6994_v2, %v3942_v51  ;;  %vm4100_vm0 = vcmp.ge.f32.partialorder %v4031_v39, 0.0  ;;  %v4165_v57 = vmul.f32 %v6994_v2, %v4031_v39 }
 0x3aa   : > { %v3900_v6 = vadd.f32 %v3899_v35, %v6985_v60  ;;  %v3989_v59 = vadd.f32 %v3988_v36, %v6987_v38 }
 0x3ab   : > { %v4228_v5 = vsel %vm4099_vm15, %v3942_v51, %v4164_v27  ;;  %v4229_v47 = vsel %vm4100_vm0, %v4031_v39, %v4165_v57 }
 0x3ac   : > { %4267 = vst [vmem:[%s7009_s24 + $0x188] sm:$0xff] %v4228_v5  ;;  %vm4065_vm10 = vcmp.ge.f32.partialorder %v3900_v6, 0.0  ;;  %v4130_v42 = vmul.f32 %v6994_v2, %v3900_v6  ;;  %vm4066_vm12 = vcmp.ge.f32.partialorder %v3989_v59, 0.0  ;;  %v4131_v11 = vmul.f32 %v6994_v2, %v3989_v59 }
 0x3ad   : > { %4681 = vst [vmem:[%s7009_s24 + $0x198] sm:$0xff] %v4229_v47 }
 0x3ae   : > { %v4194_v50 = vsel %vm4065_vm10, %v3900_v6, %v4130_v42  ;;  %v4195_v25 = vsel %vm4066_vm12, %v3989_v59, %v4131_v11 }
 0x3af   : > { %4250 = vst [vmem:[%s7009_s24 + $0x80] sm:$0xff] %v4194_v50 }
 0x3b0   : > { %4664 = vst [vmem:[%s7009_s24 + $0x90] sm:$0xff] %v4195_v25  ;;  %v3901_v14 = vpop.f32.mrf.mxu0  ;;  %v3990_v16 = vpop.f32.mrf.mxu1 }
 0x3b1   : > { %v3902_v54 = vadd.f32 %v3901_v14, %v6985_v60  ;;  %v3991_v41 = vadd.f32 %v3990_v16, %v6987_v38 }
 0x3b3   : > { %vm4067_vm1 = vcmp.ge.f32.partialorder %v3902_v54, 0.0  ;;  %v4132_v32 = vmul.f32 %v6994_v2, %v3902_v54  ;;  %vm4068_vm2 = vcmp.ge.f32.partialorder %v3991_v41, 0.0  ;;  %v4133_v3 = vmul.f32 %v6994_v2, %v3991_v41 }
 0x3b5   : > { %v4196_v13 = vsel %vm4067_vm1, %v3902_v54, %v4132_v32  ;;  %v4197_v10 = vsel %vm4068_vm2, %v3991_v41, %v4133_v3 }
 0x3b6   : > { %4251 = vst [vmem:[%s7009_s24 + $0x88] sm:$0xff] %v4196_v13 }
 0x3b7   : > { %4665 = vst [vmem:[%s7009_s24 + $0x98] sm:$0xff] %v4197_v10 }
 0x3bf   : > { %v3944_v24 = vpop.f32.mrf.mxu2  ;;  %v4033_v56 = vpop.f32.mrf.mxu3 }
 0x3c0   : > { %v3945_v19 = vadd.f32 %v3944_v24, %v6985_v60  ;;  %v4034_v53 = vadd.f32 %v4033_v56, %v6987_v38 }
 0x3c2   : > { %vm4101_vm11 = vcmp.ge.f32.partialorder %v3945_v19, 0.0  ;;  %v4166_v7 = vmul.f32 %v6994_v2, %v3945_v19  ;;  %vm4102_vm3 = vcmp.ge.f32.partialorder %v4034_v53, 0.0  ;;  %v4167_v44 = vmul.f32 %v6994_v2, %v4034_v53 }
 0x3c4   : > { %v4230_v31 = vsel %vm4101_vm11, %v3945_v19, %v4166_v7  ;;  %v4231_v26 = vsel %vm4102_vm3, %v4034_v53, %v4167_v44 }
 0x3c5   : > { %4268 = vst [vmem:[%s7009_s24 + $0x1a0] sm:$0xff] %v4230_v31 }
 0x3c6   : > { %4682 = vst [vmem:[%s7009_s24 + $0x1b0] sm:$0xff] %v4231_v26 }
 0x3c7   : > { %v3946_v37 = vpop.f32.mrf.mxu2  ;;  %v4035_v46 = vpop.f32.mrf.mxu3 }
 0x3c8   : > { %v3947_v48 = vadd.f32 %v3946_v37, %v6985_v60  ;;  %v4036_v18 = vadd.f32 %v4035_v46, %v6987_v38 }
 0x3c9   : > { %v3904_v21 = vpop.f32.mrf.mxu0  ;;  %v3993_v34 = vpop.f32.mrf.mxu1 }
 0x3ca   : > { %vm4103_vm4 = vcmp.ge.f32.partialorder %v3947_v48, 0.0  ;;  %v4168_v28 = vmul.f32 %v6994_v2, %v3947_v48  ;;  %vm4104_vm5 = vcmp.ge.f32.partialorder %v4036_v18, 0.0  ;;  %v4169_v55 = vmul.f32 %v6994_v2, %v4036_v18 }
 0x3cb   : > { %v3905_v49 = vadd.f32 %v3904_v21, %v6985_v60  ;;  %v3994_v9 = vadd.f32 %v3993_v34, %v6987_v38 }
 0x3cc   : > { %v4232_v58 = vsel %vm4103_vm4, %v3947_v48, %v4168_v28  ;;  %v4233_v40 = vsel %vm4104_vm5, %v4036_v18, %v4169_v55 }
 0x3cd   : > { %4269 = vst [vmem:[%s7009_s24 + $0x1a8] sm:$0xff] %v4232_v58  ;;  %vm4069_vm13 = vcmp.ge.f32.partialorder %v3905_v49, 0.0  ;;  %v4134_v29 = vmul.f32 %v6994_v2, %v3905_v49  ;;  %vm4070_vm6 = vcmp.ge.f32.partialorder %v3994_v9, 0.0  ;;  %v4135_v62 = vmul.f32 %v6994_v2, %v3994_v9 }
 0x3ce   : > { %4683 = vst [vmem:[%s7009_s24 + $0x1b8] sm:$0xff] %v4233_v40 }
 0x3cf   : > { %v4198_v45 = vsel %vm4069_vm13, %v3905_v49, %v4134_v29  ;;  %v4199_v17 = vsel %vm4070_vm6, %v3994_v9, %v4135_v62 }
 0x3d0   : > { %4252 = vst [vmem:[%s7009_s24 + $0xa0] sm:$0xff] %v4198_v45 }
 0x3d1   : > { %4666 = vst [vmem:[%s7009_s24 + $0xb0] sm:$0xff] %v4199_v17  ;;  %v3906_v8 = vpop.f32.mrf.mxu0  ;;  %v3995_v52 = vpop.f32.mrf.mxu1 }
 0x3d2   : > { %v3907_v61 = vadd.f32 %v3906_v8, %v6985_v60  ;;  %v3996_v0 = vadd.f32 %v3995_v52, %v6987_v38 }
 0x3d4   : > { %vm4071_vm7 = vcmp.ge.f32.partialorder %v3907_v61, 0.0  ;;  %v4136_v33 = vmul.f32 %v6994_v2, %v3907_v61  ;;  %vm4072_vm8 = vcmp.ge.f32.partialorder %v3996_v0, 0.0  ;;  %v4137_v4 = vmul.f32 %v6994_v2, %v3996_v0 }
 0x3d6   : > { %v4200_v43 = vsel %vm4071_vm7, %v3907_v61, %v4136_v33  ;;  %v4201_v23 = vsel %vm4072_vm8, %v3996_v0, %v4137_v4 }
 0x3d7   : > { %4253 = vst [vmem:[%s7009_s24 + $0xa8] sm:$0xff] %v4200_v43 }
 0x3d8   : > { %4667 = vst [vmem:[%s7009_s24 + $0xb8] sm:$0xff] %v4201_v23 }
 0x3e6   : > { %v3949_v12 = vpop.f32.mrf.mxu2  ;;  %v4038_v30 = vpop.f32.mrf.mxu3 }
 0x3e7   : > { %v3950_v15 = vadd.f32 %v3949_v12, %v6985_v60  ;;  %v4039_v1 = vadd.f32 %v4038_v30, %v6987_v38 }
 0x3e9   : > { %vm4105_vm14 = vcmp.ge.f32.partialorder %v3950_v15, 0.0  ;;  %v4170_v20 = vmul.f32 %v6994_v2, %v3950_v15  ;;  %vm4106_vm9 = vcmp.ge.f32.partialorder %v4039_v1, 0.0  ;;  %v4171_v22 = vmul.f32 %v6994_v2, %v4039_v1 }
 0x3eb   : > { %v4234_v63 = vsel %vm4105_vm14, %v3950_v15, %v4170_v20  ;;  %v4235_v51 = vsel %vm4106_vm9, %v4039_v1, %v4171_v22 }
 0x3ec   : > { %4270 = vst [vmem:[%s7009_s24 + $0x1c0] sm:$0xff] %v4234_v63 }
 0x3ed   : > { %4684 = vst [vmem:[%s7009_s24 + $0x1d0] sm:$0xff] %v4235_v51 }
 0x3ee   : > { %v3951_v39 = vpop.f32.mrf.mxu2  ;;  %v4040_v35 = vpop.f32.mrf.mxu3 }
 0x3ef   : > { %v3952_v36 = vadd.f32 %v3951_v39, %v6985_v60  ;;  %v4041_v27 = vadd.f32 %v4040_v35, %v6987_v38 }
 0x3f0   : > { %v3909_v59 = vpop.f32.mrf.mxu0  ;;  %v3998_v5 = vpop.f32.mrf.mxu1 }
 0x3f1   : > { %vm4107_vm15 = vcmp.ge.f32.partialorder %v3952_v36, 0.0  ;;  %v4172_v57 = vmul.f32 %v6994_v2, %v3952_v36  ;;  %vm4108_vm0 = vcmp.ge.f32.partialorder %v4041_v27, 0.0  ;;  %v4173_v6 = vmul.f32 %v6994_v2, %v4041_v27 }
 0x3f2   : > { %v3910_v47 = vadd.f32 %v3909_v59, %v6985_v60  ;;  %v3999_v42 = vadd.f32 %v3998_v5, %v6987_v38 }
 0x3f3   : > { %v4236_v11 = vsel %vm4107_vm15, %v3952_v36, %v4172_v57  ;;  %v4237_v50 = vsel %vm4108_vm0, %v4041_v27, %v4173_v6 }
 0x3f4   : > { %4271 = vst [vmem:[%s7009_s24 + $0x1c8] sm:$0xff] %v4236_v11  ;;  %vm4073_vm10 = vcmp.ge.f32.partialorder %v3910_v47, 0.0  ;;  %v4138_v25 = vmul.f32 %v6994_v2, %v3910_v47  ;;  %vm4074_vm12 = vcmp.ge.f32.partialorder %v3999_v42, 0.0  ;;  %v4139_v14 = vmul.f32 %v6994_v2, %v3999_v42 }
 0x3f5   : > { %4685 = vst [vmem:[%s7009_s24 + $0x1d8] sm:$0xff] %v4237_v50 }
 0x3f6   : > { %v4202_v16 = vsel %vm4073_vm10, %v3910_v47, %v4138_v25  ;;  %v4203_v54 = vsel %vm4074_vm12, %v3999_v42, %v4139_v14 }
 0x3f7   : > { %4254 = vst [vmem:[%s7009_s24 + $0xc0] sm:$0xff] %v4202_v16 }
 0x3f8   : > { %4668 = vst [vmem:[%s7009_s24 + $0xd0] sm:$0xff] %v4203_v54  ;;  %v3911_v41 = vpop.f32.mrf.mxu0  ;;  %v4000_v32 = vpop.f32.mrf.mxu1 }
 0x3f9   : > { %v3912_v3 = vadd.f32 %v3911_v41, %v6985_v60  ;;  %v4001_v13 = vadd.f32 %v4000_v32, %v6987_v38 }
 0x3fb   : > { %vm4075_vm1 = vcmp.ge.f32.partialorder %v3912_v3, 0.0  ;;  %v4140_v10 = vmul.f32 %v6994_v2, %v3912_v3  ;;  %vm4076_vm2 = vcmp.ge.f32.partialorder %v4001_v13, 0.0  ;;  %v4141_v24 = vmul.f32 %v6994_v2, %v4001_v13 }
 0x3fd   : > { %v4204_v56 = vsel %vm4075_vm1, %v3912_v3, %v4140_v10  ;;  %v4205_v19 = vsel %vm4076_vm2, %v4001_v13, %v4141_v24 }
 0x3fe   : > { %4255 = vst [vmem:[%s7009_s24 + $0xc8] sm:$0xff] %v4204_v56 }
 0x3ff   : > { %4669 = vst [vmem:[%s7009_s24 + $0xd8] sm:$0xff] %v4205_v19 }
 0x40e   : > { %v3954_v53 = vpop.f32.mrf.mxu2  ;;  %v4043_v7 = vpop.f32.mrf.mxu3 }
 0x40f   : > { %v3955_v44 = vadd.f32 %v3954_v53, %v6985_v60  ;;  %v4044_v31 = vadd.f32 %v4043_v7, %v6987_v38 }
 0x411   : > { %vm4109_vm11 = vcmp.ge.f32.partialorder %v3955_v44, 0.0  ;;  %v4174_v26 = vmul.f32 %v6994_v2, %v3955_v44  ;;  %vm4110_vm3 = vcmp.ge.f32.partialorder %v4044_v31, 0.0  ;;  %v4175_v37 = vmul.f32 %v6994_v2, %v4044_v31 }
 0x413   : > { %v4238_v46 = vsel %vm4109_vm11, %v3955_v44, %v4174_v26  ;;  %v4239_v48 = vsel %vm4110_vm3, %v4044_v31, %v4175_v37 }
 0x414   : > { %4272 = vst [vmem:[%s7009_s24 + $0x1e0] sm:$0xff] %v4238_v46 }
 0x415   : > { %4686 = vst [vmem:[%s7009_s24 + $0x1f0] sm:$0xff] %v4239_v48 }
 0x416   : > { %v3956_v18 = vpop.f32.mrf.mxu2  ;;  %v4045_v21 = vpop.f32.mrf.mxu3 }
 0x417   : > { %v3957_v34 = vadd.f32 %v3956_v18, %v6985_v60  ;;  %v4046_v28 = vadd.f32 %v4045_v21, %v6987_v38 }
 0x418   : > { %v3914_v55 = vpop.f32.mrf.mxu0  ;;  %v4003_v49 = vpop.f32.mrf.mxu1 }
 0x419   : > { %vm4111_vm4 = vcmp.ge.f32.partialorder %v3957_v34, 0.0  ;;  %v4176_v9 = vmul.f32 %v6994_v2, %v3957_v34  ;;  %vm4112_vm5 = vcmp.ge.f32.partialorder %v4046_v28, 0.0  ;;  %v4177_v58 = vmul.f32 %v6994_v2, %v4046_v28 }
 0x41a   : > { %v3915_v40 = vadd.f32 %v3914_v55, %v6985_v60  ;;  %v4004_v29 = vadd.f32 %v4003_v49, %v6987_v38 }
 0x41b   : > { %v4240_v62 = vsel %vm4111_vm4, %v3957_v34, %v4176_v9  ;;  %v4241_v45 = vsel %vm4112_vm5, %v4046_v28, %v4177_v58 }
 0x41c   : > { %4273 = vst [vmem:[%s7009_s24 + $0x1e8] sm:$0xff] %v4240_v62  ;;  %vm4077_vm13 = vcmp.ge.f32.partialorder %v3915_v40, 0.0  ;;  %v4142_v17 = vmul.f32 %v6994_v2, %v3915_v40  ;;  %vm4078_vm6 = vcmp.ge.f32.partialorder %v4004_v29, 0.0  ;;  %v4143_v8 = vmul.f32 %v6994_v2, %v4004_v29 }
 0x41d   : > { %4687 = vst [vmem:[%s7009_s24 + $0x1f8] sm:$0xff] %v4241_v45 }
 0x41e   : > { %v4206_v52 = vsel %vm4077_vm13, %v3915_v40, %v4142_v17  ;;  %v4207_v61 = vsel %vm4078_vm6, %v4004_v29, %v4143_v8 }
 0x41f   : > { %4256 = vst [vmem:[%s7009_s24 + $0xe0] sm:$0xff] %v4206_v52 }
 0x420   : > { %4670 = vst [vmem:[%s7009_s24 + $0xf0] sm:$0xff] %v4207_v61  ;;  %v3916_v0 = vpop.f32.mrf.mxu0  ;;  %v4005_v33 = vpop.f32.mrf.mxu1 }
 0x421   : > { %v3917_v4 = vadd.f32 %v3916_v0, %v6985_v60  ;;  %v4006_v43 = vadd.f32 %v4005_v33, %v6987_v38 }
 0x423   : > { %vm4079_vm7 = vcmp.ge.f32.partialorder %v3917_v4, 0.0  ;;  %v4144_v23 = vmul.f32 %v6994_v2, %v3917_v4  ;;  %vm4080_vm8 = vcmp.ge.f32.partialorder %v4006_v43, 0.0  ;;  %v4145_v12 = vmul.f32 %v6994_v2, %v4006_v43 }
 0x425   : > { %v4208_v30 = vsel %vm4079_vm7, %v3917_v4, %v4144_v23  ;;  %v4209_v15 = vsel %vm4080_vm8, %v4006_v43, %v4145_v12 }
 0x426   : > { %4257 = vst [vmem:[%s7009_s24 + $0xe8] sm:$0xff] %v4208_v30 }
 0x427   : > { %4671 = vst [vmem:[%s7009_s24 + $0xf8] sm:$0xff] %v4209_v15 }
 0x428   : > { %4822 = shalt.err (!%p4819_p5)
}
 0x429   : > { %s4867_s9 = smov 128  }
 0x42a   : > { %4725 = dma.vmem_to_hbm [thread:$0]  (%p4934_p6), %s4322_s28, 8192, %s4324_s3, %s4308_s29, %s4867_s9, %s4867_s9, %s4860_s13  }
 0x42b PF: > { %s4338_s10 = sand.u32 1, %s4845_s17   ;;  %p4728_p7 = pnand %p4394_p9, %p4938_p8 }
 0x42c   : > { %s4339_s12 = scalar_lea.sflag [#allocation6], %s4338_s10 }
 0x42d   : > { %p4729_p10 = pneg %p4728_p7 }
 0x42f   : > { %4840 = dma.done.wait (%p4729_p10), %s4339_s12, 8192  }
 0x430   : > { %4842 = vsyncadd (%p4729_p10), %s4339_s12, 4294959104  ;;  %p15_p11 = scmp.ge.s32.totalorder %s4919_s22, 4   ;;  %s7359_s17 = smov %s4849_s18 }
 0x431   : > { %s7360_s18 = smov %s4853_s19  ;;  %s7361_s19 = smov %s4932_s25 }
 0x432   : > { %s7362_s20 = smov %s4919_s22  ;;  %17 = sbr.rel (!%p15_p11) target bundleno = 5 (0x5), region = 120 }
 0x437   :  { %4345 = vsyncpa [#allocation6], 1 }
 0x438   :  { %4347 = vsyncpa [#allocation6 + $0x1], 1 }

</bundles_post_ra>
